<compile_context>
chip_gen: v7x
topology: tpu7x:2x2x1
jax: 0.10.0
libtpu: 0.0.40
codegen_flags: <defaults>
</compile_context>

<pallas_src>
import functools

import jax
import jax.numpy as jnp
from jax import lax
from jax.experimental import pallas as pl
from jax.experimental.pallas import tpu as pltpu


# --------------------------------------------------------------------------- #
# Kernel
# --------------------------------------------------------------------------- #
def bigru_kernel(lens_ref, x_ref, wih_ref, bi_ref,
                 whh_f_ref, bhn_f_ref, whh_b_ref, bhn_b_ref,
                 out_ref, gi_f_ref, gi_b_ref, *, T, TB, Hp):
    H3 = 3 * Hp

    # ---- hoisted loads / broadcasts (outside the recurrent loop) ----
    whh_f = whh_f_ref[...]                                # [Hp, 3Hp]
    whh_b = whh_b_ref[...]                                # [Hp, 3Hp]
    bhn_f = jnp.broadcast_to(bhn_f_ref[...], (TB, Hp))    # [TB, Hp]
    bhn_b = jnp.broadcast_to(bhn_b_ref[...], (TB, Hp))    # [TB, Hp]
    lens = lens_ref[...]                                  # [TB, Hp] int32

    # ---- input projection for both directions in ONE big MXU matmul ----
    # gi = x @ [W_ih_f | W_ih_b] + (b_ih + b_hh for r,z gates ; b_ih for n)
    x2d = x_ref[...].reshape(T * TB, x_ref.shape[-1])     # [T*TB, E]
    gi = jnp.dot(x2d, wih_ref[...],
                 preferred_element_type=jnp.float32) + bi_ref[...]
    gi_f_ref[...] = gi[:, :H3].reshape(T, TB, H3)
    gi_b_ref[...] = gi[:, H3:].reshape(T, TB, H3)

    out_ref[...] = jnp.zeros_like(out_ref)

    def cell(gi_t, h, whh, bhn):
        # PyTorch GRU cell, gate order (r, z, n); r/z biases pre-folded in gi_t.
        gh = jnp.dot(h, whh, preferred_element_type=jnp.float32)   # [TB, 3Hp]
        r = jax.nn.sigmoid(gi_t[:, 0:Hp] + gh[:, 0:Hp])
        z = jax.nn.sigmoid(gi_t[:, Hp:2 * Hp] + gh[:, Hp:2 * Hp])
        n = jnp.tanh(gi_t[:, 2 * Hp:] + r * (gh[:, 2 * Hp:] + bhn))
        return (1.0 - z) * n + z * h

    h0 = jnp.zeros((TB, Hp), jnp.float32)

    # Fused forward/backward recurrence: two independent dependency chains per
    # step keep the MXU / EUP / VPU pipelines busy.
    def body(s, carry):
        h_f, h_b = carry
        t_b = T - 1 - s

        # forward at t = s.  The carry needs no masking: padded steps come
        # after every valid step and their outputs are masked below.
        h_f = cell(gi_f_ref[s], h_f, whh_f, bhn_f)
        m_f = lens > s
        out_ref[s] = out_ref[s] + jnp.where(m_f, 0.5 * h_f, 0.0)

        # backward at t = T-1-s.  Masking the carry reproduces
        # pack_padded_sequence: sequence b starts at t = len_b - 1 with h = 0.
        hb_new = cell(gi_b_ref[t_b], h_b, whh_b, bhn_b)
        m_b = lens > t_b
        h_b = jnp.where(m_b, hb_new, h_b)
        out_ref[t_b] = out_ref[t_b] + jnp.where(m_b, 0.5 * hb_new, 0.0)
        return h_f, h_b

    lax.fori_loop(0, T, body, (h0, h0), unroll=True if T <= 16 else 4)


# --------------------------------------------------------------------------- #
# Parameter packing (gate blocks at 128-aligned lane offsets, padded H)
# --------------------------------------------------------------------------- #
def _round_up(x, m):
    return (x + m - 1) // m * m


def _pad_gate_cols(w, H, Hp):
    """[in, 3H] (gate order r|z|n) -> [in, 3Hp], each gate at a 128-aligned offset."""
    parts = []
    for g in range(3):
        blk = w[:, g * H:(g + 1) * H]
        parts.append(jnp.pad(blk, ((0, 0), (0, Hp - H))))
    return jnp.concatenate(parts, axis=1)


def _pack_direction(wih, whh, bih, bhh, H, Hp):
    """-> (wih_p [E,3Hp], whh_p [Hp,3Hp], bi_p [1,3Hp], bhn_p [1,Hp])."""
    wih_p = _pad_gate_cols(wih, H, Hp)
    whh_p = jnp.pad(_pad_gate_cols(whh, H, Hp), ((0, Hp - H), (0, 0)))
    # Fold b_hh of the r and z gates into the input-side bias (added outside
    # the r-multiplication); the n-gate b_hh must stay inside r*(...).
    b_rzn = jnp.concatenate([bih[:, :2 * H] + bhh[:, :2 * H], bih[:, 2 * H:]], axis=1)
    bi_p = _pad_gate_cols(b_rzn, H, Hp)
    bhn_p = jnp.pad(bhh[:, 2 * H:], ((0, 0), (0, Hp - H)))
    return wih_p, whh_p, bi_p, bhn_p


# --------------------------------------------------------------------------- #
# Wrapper (pack_padded_sequence -> GRU -> pad_packed_sequence -> mean over dir)
# --------------------------------------------------------------------------- #
def text_encoder_forward(text, embedding_length, params, *, batch_tile=8):
    """text: [B, T, E] float32 (batch-first); embedding_length: list of ints."""
    B, T, E = text.shape
    H = params["whh_f"].shape[0]
    Hp = _round_up(H, 128)
    TB = batch_tile
    B_pad = _round_up(max(B, TB), TB)

    wih_f, whh_f, bi_f, bhn_f = _pack_direction(
        params["wih_f"], params["whh_f"], params["bih_f"], params["bhh_f"], H, Hp)
    wih_b, whh_b, bi_b, bhn_b = _pack_direction(
        params["wih_b"], params["whh_b"], params["bih_b"], params["bhh_b"], H, Hp)
    wih_cat = jnp.concatenate([wih_f, wih_b], axis=1)       # [E, 6Hp]
    bi_cat = jnp.concatenate([bi_f, bi_b], axis=1)          # [1, 6Hp]

    lengths = jnp.asarray(embedding_length, jnp.int32)
    lens_b = jnp.zeros((B_pad,), jnp.int32).at[:B].set(lengths)
    lens_bh = jnp.broadcast_to(lens_b[:, None], (B_pad, Hp))

    x_tbe = jnp.transpose(text, (1, 0, 2))                  # time-major [T, B, E]
    x_tbe = jnp.pad(x_tbe, ((0, 0), (0, B_pad - B), (0, 0)))

    full = lambda b: (0, 0)
    kern = functools.partial(bigru_kernel, T=T, TB=TB, Hp=Hp)
    out_tbh = pl.pallas_call(
        kern,
        out_shape=jax.ShapeDtypeStruct((T, B_pad, Hp), jnp.float32),
        grid_spec=pltpu.PrefetchScalarGridSpec(
            num_scalar_prefetch=0,
            grid=(B_pad // TB,),
            in_specs=[
                pl.BlockSpec((TB, Hp), lambda b: (b, 0)),        # lengths
                pl.BlockSpec((T, TB, E), lambda b: (0, b, 0)),   # x (time-major)
                pl.BlockSpec((E, 6 * Hp), full),                 # W_ih both dirs
                pl.BlockSpec((1, 6 * Hp), full),                 # folded input bias
                pl.BlockSpec((Hp, 3 * Hp), full),                # W_hh fwd
                pl.BlockSpec((1, Hp), full),                     # b_hh(n) fwd
                pl.BlockSpec((Hp, 3 * Hp), full),                # W_hh bwd
                pl.BlockSpec((1, Hp), full),                     # b_hh(n) bwd
            ],
            out_specs=pl.BlockSpec((T, TB, Hp), lambda b: (0, b, 0)),
            scratch_shapes=[pltpu.VMEM((T, TB, 3 * Hp), jnp.float32),
                            pltpu.VMEM((T, TB, 3 * Hp), jnp.float32)],
        ),
        compiler_params=pltpu.CompilerParams(
            dimension_semantics=("parallel",),
            vmem_limit_bytes=32 * 1024 * 1024),
    )(lens_bh, x_tbe, wih_cat, bi_cat, whh_f, bhn_f, whh_b, bhn_b)

    out = jnp.transpose(out_tbh[:, :B, :H], (1, 0, 2))       # [B, T, H]
    # pad_packed_sequence pads only up to the max length in the batch.
    return out[:, :int(max(embedding_length))]


# --------------------------------------------------------------------------- #
# Init + pure-JAX reference (PyTorch packed bidirectional GRU semantics)
# --------------------------------------------------------------------------- #
def init_params(key, E, H):
    k = 1.0 / float(H) ** 0.5
    keys = jax.random.split(key, 8)
    u = lambda kk, shape: jax.random.uniform(kk, shape, jnp.float32, -k, k)
    return dict(
        wih_f=u(keys[0], (E, 3 * H)), whh_f=u(keys[1], (H, 3 * H)),
        bih_f=u(keys[2], (1, 3 * H)), bhh_f=u(keys[3], (1, 3 * H)),
        wih_b=u(keys[4], (E, 3 * H)), whh_b=u(keys[5], (H, 3 * H)),
        bih_b=u(keys[6], (1, 3 * H)), bhh_b=u(keys[7], (1, 3 * H)),
    )


def ref_forward(text, embedding_length, params):
    B, T, E = text.shape
    H = params["whh_f"].shape[0]
    lengths = jnp.asarray(embedding_length, jnp.int32)

    def cell(x_t, h, wih, whh, bih, bhh):
        gi = x_t @ wih + bih
        gh = h @ whh + bhh
        r = jax.nn.sigmoid(gi[:, :H] + gh[:, :H])
        z = jax.nn.sigmoid(gi[:, H:2 * H] + gh[:, H:2 * H])
        n = jnp.tanh(gi[:, 2 * H:] + r * gh[:, 2 * H:])
        return (1 - z) * n + z * h

    h = jnp.zeros((B, H), jnp.float32)
    fwd = []
    for t in range(T):
        m = (t < lengths).astype(jnp.float32)[:, None]
        hn = cell(text[:, t], h, params["wih_f"], params["whh_f"],
                  params["bih_f"], params["bhh_f"])
        fwd.append(m * hn)
        h = m * hn + (1 - m) * h

    h = jnp.zeros((B, H), jnp.float32)
    bwd = [None] * T
    for t in range(T - 1, -1, -1):
        m = (t < lengths).astype(jnp.float32)[:, None]
        hn = cell(text[:, t], h, params["wih_b"], params["whh_b"],
                  params["bih_b"], params["bhh_b"])
        bwd[t] = m * hn
        h = m * hn + (1 - m) * h

    out = 0.5 * (jnp.stack(fwd, axis=1) + jnp.stack(bwd, axis=1))
    return out[:, :int(max(embedding_length))]


if __name__ == "__main__":
    B, T, E, H = 2, 8, 32, 32  # batch, seq, embedding_dim, attention_dim
    key = jax.random.PRNGKey(0)
    kp, kx = jax.random.split(key)
    params = init_params(kp, E, H)
    text = jax.random.normal(kx, (B, T, E), jnp.float32)
    embedding_length = [8, 5]

    out = jax.block_until_ready(text_encoder_forward(text, embedding_length, params))
    ref = ref_forward(text, embedding_length, params)
    assert out.shape == (B, max(embedding_length), H), out.shape
    assert jnp.allclose(out, ref, atol=2e-4, rtol=2e-4), \
        float(jnp.max(jnp.abs(out - ref)))
    print("KERNEL_OK")
</pallas_src>

<mosaic_0001>
module attributes {stable_mosaic.version = 11 : i64} {
  func.func @bigru_kernel(%arg0: i32, %arg1: memref<8x128xi32, #tpu.memory_space<vmem>>, %arg2: memref<8x8x32xf32, #tpu.memory_space<vmem>>, %arg3: memref<32x768xf32, #tpu.memory_space<vmem>>, %arg4: memref<1x768xf32, #tpu.memory_space<vmem>>, %arg5: memref<128x384xf32, #tpu.memory_space<vmem>>, %arg6: memref<1x128xf32, #tpu.memory_space<vmem>>, %arg7: memref<128x384xf32, #tpu.memory_space<vmem>>, %arg8: memref<1x128xf32, #tpu.memory_space<vmem>>, %arg9: memref<8x8x128xf32, #tpu.memory_space<vmem>>, %arg10: memref<8x8x384xf32, #tpu.memory_space<vmem>>, %arg11: memref<8x8x384xf32, #tpu.memory_space<vmem>>) attributes {dimension_semantics = [#tpu.dimension_semantics<parallel>], iteration_bounds = array<i64: 1>, scalar_prefetch = 0 : i64, scratch_operands = 2 : i64, tpu.core_type = #tpu.core_type<tc>, window_params = [{transform_indices = @transform_0, window_bounds = array<i64: 8, 128>}, {transform_indices = @transform_1, window_bounds = array<i64: 8, 8, 32>}, {pipeline_mode = #tpu.pipeline_mode<synchronous>, transform_indices = @transform_2, window_bounds = array<i64: 32, 768>}, {pipeline_mode = #tpu.pipeline_mode<synchronous>, transform_indices = @transform_3, window_bounds = array<i64: 1, 768>}, {pipeline_mode = #tpu.pipeline_mode<synchronous>, transform_indices = @transform_4, window_bounds = array<i64: 128, 384>}, {pipeline_mode = #tpu.pipeline_mode<synchronous>, transform_indices = @transform_5, window_bounds = array<i64: 1, 128>}, {pipeline_mode = #tpu.pipeline_mode<synchronous>, transform_indices = @transform_6, window_bounds = array<i64: 128, 384>}, {pipeline_mode = #tpu.pipeline_mode<synchronous>, transform_indices = @transform_7, window_bounds = array<i64: 1, 128>}, {transform_indices = @transform_8, window_bounds = array<i64: 8, 8, 128>}]} {
    %c0 = arith.constant 0 : index
    %c0_0 = arith.constant 0 : index
    %0 = vector.load %arg5[%c0, %c0_0] : memref<128x384xf32, #tpu.memory_space<vmem>>, vector<128x384xf32>
    %c0_1 = arith.constant 0 : index
    %c0_2 = arith.constant 0 : index
    %1 = vector.load %arg7[%c0_1, %c0_2] : memref<128x384xf32, #tpu.memory_space<vmem>>, vector<128x384xf32>
    %c0_3 = arith.constant 0 : index
    %c0_4 = arith.constant 0 : index
    %2 = vector.load %arg6[%c0_3, %c0_4] : memref<1x128xf32, #tpu.memory_space<vmem>>, vector<1x128xf32>
    %3 = vector.shape_cast %2 : vector<1x128xf32> to vector<1x128xf32>
    %4 = vector.broadcast %3 : vector<1x128xf32> to vector<8x128xf32>
    %c0_5 = arith.constant 0 : index
    %c0_6 = arith.constant 0 : index
    %5 = vector.load %arg8[%c0_5, %c0_6] : memref<1x128xf32, #tpu.memory_space<vmem>>, vector<1x128xf32>
    %6 = vector.shape_cast %5 : vector<1x128xf32> to vector<1x128xf32>
    %7 = vector.broadcast %6 : vector<1x128xf32> to vector<8x128xf32>
    %c0_7 = arith.constant 0 : index
    %c0_8 = arith.constant 0 : index
    %8 = vector.load %arg1[%c0_7, %c0_8] : memref<8x128xi32, #tpu.memory_space<vmem>>, vector<8x128xi32>
    %c0_9 = arith.constant 0 : index
    %c0_10 = arith.constant 0 : index
    %c0_11 = arith.constant 0 : index
    %9 = vector.load %arg2[%c0_9, %c0_10, %c0_11] : memref<8x8x32xf32, #tpu.memory_space<vmem>>, vector<8x8x32xf32>
    %10 = vector.shape_cast %9 : vector<8x8x32xf32> to vector<64x32xf32>
    %c0_12 = arith.constant 0 : index
    %c0_13 = arith.constant 0 : index
    %11 = vector.load %arg3[%c0_12, %c0_13] : memref<32x768xf32, #tpu.memory_space<vmem>>, vector<32x768xf32>
    %cst = arith.constant dense<0.000000e+00> : vector<64x768xf32>
    %12 = tpu.matmul %10, %11, %cst {dimension_numbers = #tpu.dot_dimension_numbers<[1], [0], [0], [1], [0, 0, 1, 1], [], []>} : vector<64x32xf32>, vector<32x768xf32>, vector<64x768xf32> -> vector<64x768xf32>
    %c0_14 = arith.constant 0 : index
    %c0_15 = arith.constant 0 : index
    %13 = vector.load %arg4[%c0_14, %c0_15] : memref<1x768xf32, #tpu.memory_space<vmem>>, vector<1x768xf32>
    %14 = vector.broadcast %13 : vector<1x768xf32> to vector<64x768xf32>
    %15 = arith.addf %12, %14 : vector<64x768xf32>
    %16 = vector.extract_strided_slice %15 {offsets = [0, 0], sizes = [64, 384], strides = [1, 1]} : vector<64x768xf32> to vector<64x384xf32>
    %17 = vector.shape_cast %16 : vector<64x384xf32> to vector<8x8x384xf32>
    %c0_16 = arith.constant 0 : index
    %c0_17 = arith.constant 0 : index
    %c0_18 = arith.constant 0 : index
    %18 = vector.load %arg10[%c0_16, %c0_17, %c0_18] : memref<8x8x384xf32, #tpu.memory_space<vmem>>, vector<8x8x384xf32>
    tpu.vector_store %arg10[%c0_16, %c0_17, %c0_18], %17 {strides = array<i32>} : memref<8x8x384xf32, #tpu.memory_space<vmem>>, vector<8x8x384xf32>,
    %19 = vector.extract_strided_slice %15 {offsets = [0, 384], sizes = [64, 384], strides = [1, 1]} : vector<64x768xf32> to vector<64x384xf32>
    %20 = vector.shape_cast %19 : vector<64x384xf32> to vector<8x8x384xf32>
    %c0_19 = arith.constant 0 : index
    %c0_20 = arith.constant 0 : index
    %c0_21 = arith.constant 0 : index
    %21 = vector.load %arg11[%c0_19, %c0_20, %c0_21] : memref<8x8x384xf32, #tpu.memory_space<vmem>>, vector<8x8x384xf32>
    tpu.vector_store %arg11[%c0_19, %c0_20, %c0_21], %20 {strides = array<i32>} : memref<8x8x384xf32, #tpu.memory_space<vmem>>, vector<8x8x384xf32>,
    %cst_22 = arith.constant 0.000000e+00 : f32
    %22 = vector.broadcast %cst_22 : f32 to vector<8x8x128xf32>
    %c0_23 = arith.constant 0 : index
    %c0_24 = arith.constant 0 : index
    %c0_25 = arith.constant 0 : index
    %23 = vector.load %arg9[%c0_23, %c0_24, %c0_25] : memref<8x8x128xf32, #tpu.memory_space<vmem>>, vector<8x8x128xf32>
    tpu.vector_store %arg9[%c0_23, %c0_24, %c0_25], %22 {strides = array<i32>} : memref<8x8x128xf32, #tpu.memory_space<vmem>>, vector<8x8x128xf32>,
    %cst_26 = arith.constant 0.000000e+00 : f32
    %24 = vector.broadcast %cst_26 : f32 to vector<8x128xf32>
    %c0_i32 = arith.constant 0 : i32
    %c7_i32 = arith.constant 7 : i32
    %25 = arith.subi %c7_i32, %c0_i32 : i32
    %26 = arith.index_cast %c0_i32 : i32 to index
    %c0_27 = arith.constant 0 : index
    %c0_28 = arith.constant 0 : index
    %27 = vector.load %arg10[%26, %c0_27, %c0_28] : memref<8x8x384xf32, #tpu.memory_space<vmem>>, vector<1x8x384xf32>
    %28 = vector.shape_cast %27 : vector<1x8x384xf32> to vector<8x384xf32>
    %cst_29 = arith.constant dense<0.000000e+00> : vector<8x384xf32>
    %29 = tpu.matmul %24, %0, %cst_29 {dimension_numbers = #tpu.dot_dimension_numbers<[1], [0], [0], [1], [0, 0, 1, 1], [], []>} : vector<8x128xf32>, vector<128x384xf32>, vector<8x384xf32> -> vector<8x384xf32>
    %30 = vector.extract_strided_slice %28 {offsets = [0, 0], sizes = [8, 128], strides = [1, 1]} : vector<8x384xf32> to vector<8x128xf32>
    %31 = vector.extract_strided_slice %29 {offsets = [0, 0], sizes = [8, 128], strides = [1, 1]} : vector<8x384xf32> to vector<8x128xf32>
    %32 = arith.addf %30, %31 : vector<8x128xf32>
    %33 = arith.negf %32 : vector<8x128xf32>
    %34 = math.exp %33 : vector<8x128xf32>
    %cst_30 = arith.constant 1.000000e+00 : f32
    %35 = vector.broadcast %cst_30 : f32 to vector<8x128xf32>
    %36 = arith.addf %35, %34 : vector<8x128xf32>
    %37 = arith.divf %35, %36 : vector<8x128xf32>
    %38 = vector.extract_strided_slice %28 {offsets = [0, 128], sizes = [8, 128], strides = [1, 1]} : vector<8x384xf32> to vector<8x128xf32>
    %39 = vector.extract_strided_slice %29 {offsets = [0, 128], sizes = [8, 128], strides = [1, 1]} : vector<8x384xf32> to vector<8x128xf32>
    %40 = arith.addf %38, %39 : vector<8x128xf32>
    %41 = arith.negf %40 : vector<8x128xf32>
    %42 = math.exp %41 : vector<8x128xf32>
    %cst_31 = arith.constant 1.000000e+00 : f32
    %43 = vector.broadcast %cst_31 : f32 to vector<8x128xf32>
    %44 = arith.addf %43, %42 : vector<8x128xf32>
    %45 = arith.divf %43, %44 : vector<8x128xf32>
    %46 = vector.extract_strided_slice %28 {offsets = [0, 256], sizes = [8, 128], strides = [1, 1]} : vector<8x384xf32> to vector<8x128xf32>
    %47 = vector.extract_strided_slice %29 {offsets = [0, 256], sizes = [8, 128], strides = [1, 1]} : vector<8x384xf32> to vector<8x128xf32>
    %48 = arith.addf %47, %4 : vector<8x128xf32>
    %49 = arith.mulf %37, %48 : vector<8x128xf32>
    %50 = arith.addf %46, %49 : vector<8x128xf32>
    %51 = math.tanh %50 : vector<8x128xf32>
    %cst_32 = arith.constant 1.000000e+00 : f32
    %52 = vector.broadcast %cst_32 : f32 to vector<8x128xf32>
    %53 = arith.subf %52, %45 : vector<8x128xf32>
    %54 = arith.mulf %53, %51 : vector<8x128xf32>
    %55 = arith.mulf %45, %24 : vector<8x128xf32>
    %56 = arith.addf %54, %55 : vector<8x128xf32>
    %57 = vector.broadcast %c0_i32 : i32 to vector<8x128xi32>
    %58 = arith.cmpi sgt, %8, %57 : vector<8x128xi32>
    %59 = arith.index_cast %c0_i32 : i32 to index
    %c0_33 = arith.constant 0 : index
    %c0_34 = arith.constant 0 : index
    %60 = vector.load %arg9[%59, %c0_33, %c0_34] : memref<8x8x128xf32, #tpu.memory_space<vmem>>, vector<1x8x128xf32>
    %61 = vector.shape_cast %60 : vector<1x8x128xf32> to vector<8x128xf32>
    %cst_35 = arith.constant 5.000000e-01 : f32
    %62 = vector.broadcast %cst_35 : f32 to vector<8x128xf32>
    %63 = arith.mulf %62, %56 : vector<8x128xf32>
    %cst_36 = arith.constant 0.000000e+00 : f32
    %64 = vector.broadcast %cst_36 : f32 to vector<8x128xf32>
    %65 = arith.select %58, %63, %64 : vector<8x128xi1>, vector<8x128xf32>
    %66 = arith.addf %61, %65 : vector<8x128xf32>
    %67 = arith.index_cast %c0_i32 : i32 to index
    %c0_37 = arith.constant 0 : index
    %c0_38 = arith.constant 0 : index
    %68 = vector.load %arg9[%67, %c0_37, %c0_38] : memref<8x8x128xf32, #tpu.memory_space<vmem>>, vector<1x8x128xf32>
    %69 = vector.shape_cast %68 : vector<1x8x128xf32> to vector<8x128xf32>
    %70 = vector.shape_cast %66 : vector<8x128xf32> to vector<1x8x128xf32>
    tpu.vector_store %arg9[%67, %c0_37, %c0_38], %70 {strides = array<i32>} : memref<8x8x128xf32, #tpu.memory_space<vmem>>, vector<1x8x128xf32>,
    %71 = arith.index_cast %25 : i32 to index
    %c0_39 = arith.constant 0 : index
    %c0_40 = arith.constant 0 : index
    %72 = vector.load %arg11[%71, %c0_39, %c0_40] : memref<8x8x384xf32, #tpu.memory_space<vmem>>, vector<1x8x384xf32>
    %73 = vector.shape_cast %72 : vector<1x8x384xf32> to vector<8x384xf32>
    %cst_41 = arith.constant dense<0.000000e+00> : vector<8x384xf32>
    %74 = tpu.matmul %24, %1, %cst_41 {dimension_numbers = #tpu.dot_dimension_numbers<[1], [0], [0], [1], [0, 0, 1, 1], [], []>} : vector<8x128xf32>, vector<128x384xf32>, vector<8x384xf32> -> vector<8x384xf32>
    %75 = vector.extract_strided_slice %73 {offsets = [0, 0], sizes = [8, 128], strides = [1, 1]} : vector<8x384xf32> to vector<8x128xf32>
    %76 = vector.extract_strided_slice %74 {offsets = [0, 0], sizes = [8, 128], strides = [1, 1]} : vector<8x384xf32> to vector<8x128xf32>
    %77 = arith.addf %75, %76 : vector<8x128xf32>
    %78 = arith.negf %77 : vector<8x128xf32>
    %79 = math.exp %78 : vector<8x128xf32>
    %cst_42 = arith.constant 1.000000e+00 : f32
    %80 = vector.broadcast %cst_42 : f32 to vector<8x128xf32>
    %81 = arith.addf %80, %79 : vector<8x128xf32>
    %82 = arith.divf %80, %81 : vector<8x128xf32>
    %83 = vector.extract_strided_slice %73 {offsets = [0, 128], sizes = [8, 128], strides = [1, 1]} : vector<8x384xf32> to vector<8x128xf32>
    %84 = vector.extract_strided_slice %74 {offsets = [0, 128], sizes = [8, 128], strides = [1, 1]} : vector<8x384xf32> to vector<8x128xf32>
    %85 = arith.addf %83, %84 : vector<8x128xf32>
    %86 = arith.negf %85 : vector<8x128xf32>
    %87 = math.exp %86 : vector<8x128xf32>
    %cst_43 = arith.constant 1.000000e+00 : f32
    %88 = vector.broadcast %cst_43 : f32 to vector<8x128xf32>
    %89 = arith.addf %88, %87 : vector<8x128xf32>
    %90 = arith.divf %88, %89 : vector<8x128xf32>
    %91 = vector.extract_strided_slice %73 {offsets = [0, 256], sizes = [8, 128], strides = [1, 1]} : vector<8x384xf32> to vector<8x128xf32>
    %92 = vector.extract_strided_slice %74 {offsets = [0, 256], sizes = [8, 128], strides = [1, 1]} : vector<8x384xf32> to vector<8x128xf32>
    %93 = arith.addf %92, %7 : vector<8x128xf32>
    %94 = arith.mulf %82, %93 : vector<8x128xf32>
    %95 = arith.addf %91, %94 : vector<8x128xf32>
    %96 = math.tanh %95 : vector<8x128xf32>
    %cst_44 = arith.constant 1.000000e+00 : f32
    %97 = vector.broadcast %cst_44 : f32 to vector<8x128xf32>
    %98 = arith.subf %97, %90 : vector<8x128xf32>
    %99 = arith.mulf %98, %96 : vector<8x128xf32>
    %100 = arith.mulf %90, %24 : vector<8x128xf32>
    %101 = arith.addf %99, %100 : vector<8x128xf32>
    %102 = vector.broadcast %25 : i32 to vector<8x128xi32>
    %103 = arith.cmpi sgt, %8, %102 : vector<8x128xi32>
    %104 = arith.select %103, %101, %24 : vector<8x128xi1>, vector<8x128xf32>
    %105 = arith.index_cast %25 : i32 to index
    %c0_45 = arith.constant 0 : index
    %c0_46 = arith.constant 0 : index
    %106 = vector.load %arg9[%105, %c0_45, %c0_46] : memref<8x8x128xf32, #tpu.memory_space<vmem>>, vector<1x8x128xf32>
    %107 = vector.shape_cast %106 : vector<1x8x128xf32> to vector<8x128xf32>
    %cst_47 = arith.constant 5.000000e-01 : f32
    %108 = vector.broadcast %cst_47 : f32 to vector<8x128xf32>
    %109 = arith.mulf %108, %101 : vector<8x128xf32>
    %cst_48 = arith.constant 0.000000e+00 : f32
    %110 = vector.broadcast %cst_48 : f32 to vector<8x128xf32>
    %111 = arith.select %103, %109, %110 : vector<8x128xi1>, vector<8x128xf32>
    %112 = arith.addf %107, %111 : vector<8x128xf32>
    %113 = arith.index_cast %25 : i32 to index
    %c0_49 = arith.constant 0 : index
    %c0_50 = arith.constant 0 : index
    %114 = vector.load %arg9[%113, %c0_49, %c0_50] : memref<8x8x128xf32, #tpu.memory_space<vmem>>, vector<1x8x128xf32>
    %115 = vector.shape_cast %114 : vector<1x8x128xf32> to vector<8x128xf32>
    %116 = vector.shape_cast %112 : vector<8x128xf32> to vector<1x8x128xf32>
    tpu.vector_store %arg9[%113, %c0_49, %c0_50], %116 {strides = array<i32>} : memref<8x8x128xf32, #tpu.memory_space<vmem>>, vector<1x8x128xf32>,
    %c1_i32 = arith.constant 1 : i32
    %c7_i32_51 = arith.constant 7 : i32
    %117 = arith.subi %c7_i32_51, %c1_i32 : i32
    %118 = arith.index_cast %c1_i32 : i32 to index
    %c0_52 = arith.constant 0 : index
    %c0_53 = arith.constant 0 : index
    %119 = vector.load %arg10[%118, %c0_52, %c0_53] : memref<8x8x384xf32, #tpu.memory_space<vmem>>, vector<1x8x384xf32>
    %120 = vector.shape_cast %119 : vector<1x8x384xf32> to vector<8x384xf32>
    %cst_54 = arith.constant dense<0.000000e+00> : vector<8x384xf32>
    %121 = tpu.matmul %56, %0, %cst_54 {dimension_numbers = #tpu.dot_dimension_numbers<[1], [0], [0], [1], [0, 0, 1, 1], [], []>} : vector<8x128xf32>, vector<128x384xf32>, vector<8x384xf32> -> vector<8x384xf32>
    %122 = vector.extract_strided_slice %120 {offsets = [0, 0], sizes = [8, 128], strides = [1, 1]} : vector<8x384xf32> to vector<8x128xf32>
    %123 = vector.extract_strided_slice %121 {offsets = [0, 0], sizes = [8, 128], strides = [1, 1]} : vector<8x384xf32> to vector<8x128xf32>
    %124 = arith.addf %122, %123 : vector<8x128xf32>
    %125 = arith.negf %124 : vector<8x128xf32>
    %126 = math.exp %125 : vector<8x128xf32>
    %cst_55 = arith.constant 1.000000e+00 : f32
    %127 = vector.broadcast %cst_55 : f32 to vector<8x128xf32>
    %128 = arith.addf %127, %126 : vector<8x128xf32>
    %129 = arith.divf %127, %128 : vector<8x128xf32>
    %130 = vector.extract_strided_slice %120 {offsets = [0, 128], sizes = [8, 128], strides = [1, 1]} : vector<8x384xf32> to vector<8x128xf32>
    %131 = vector.extract_strided_slice %121 {offsets = [0, 128], sizes = [8, 128], strides = [1, 1]} : vector<8x384xf32> to vector<8x128xf32>
    %132 = arith.addf %130, %131 : vector<8x128xf32>
    %133 = arith.negf %132 : vector<8x128xf32>
    %134 = math.exp %133 : vector<8x128xf32>
    %cst_56 = arith.constant 1.000000e+00 : f32
    %135 = vector.broadcast %cst_56 : f32 to vector<8x128xf32>
    %136 = arith.addf %135, %134 : vector<8x128xf32>
    %137 = arith.divf %135, %136 : vector<8x128xf32>
    %138 = vector.extract_strided_slice %120 {offsets = [0, 256], sizes = [8, 128], strides = [1, 1]} : vector<8x384xf32> to vector<8x128xf32>
    %139 = vector.extract_strided_slice %121 {offsets = [0, 256], sizes = [8, 128], strides = [1, 1]} : vector<8x384xf32> to vector<8x128xf32>
    %140 = arith.addf %139, %4 : vector<8x128xf32>
    %141 = arith.mulf %129, %140 : vector<8x128xf32>
    %142 = arith.addf %138, %141 : vector<8x128xf32>
    %143 = math.tanh %142 : vector<8x128xf32>
    %cst_57 = arith.constant 1.000000e+00 : f32
    %144 = vector.broadcast %cst_57 : f32 to vector<8x128xf32>
    %145 = arith.subf %144, %137 : vector<8x128xf32>
    %146 = arith.mulf %145, %143 : vector<8x128xf32>
    %147 = arith.mulf %137, %56 : vector<8x128xf32>
    %148 = arith.addf %146, %147 : vector<8x128xf32>
    %149 = vector.broadcast %c1_i32 : i32 to vector<8x128xi32>
    %150 = arith.cmpi sgt, %8, %149 : vector<8x128xi32>
    %151 = arith.index_cast %c1_i32 : i32 to index
    %c0_58 = arith.constant 0 : index
    %c0_59 = arith.constant 0 : index
    %152 = vector.load %arg9[%151, %c0_58, %c0_59] : memref<8x8x128xf32, #tpu.memory_space<vmem>>, vector<1x8x128xf32>
    %153 = vector.shape_cast %152 : vector<1x8x128xf32> to vector<8x128xf32>
    %cst_60 = arith.constant 5.000000e-01 : f32
    %154 = vector.broadcast %cst_60 : f32 to vector<8x128xf32>
    %155 = arith.mulf %154, %148 : vector<8x128xf32>
    %cst_61 = arith.constant 0.000000e+00 : f32
    %156 = vector.broadcast %cst_61 : f32 to vector<8x128xf32>
    %157 = arith.select %150, %155, %156 : vector<8x128xi1>, vector<8x128xf32>
    %158 = arith.addf %153, %157 : vector<8x128xf32>
    %159 = arith.index_cast %c1_i32 : i32 to index
    %c0_62 = arith.constant 0 : index
    %c0_63 = arith.constant 0 : index
    %160 = vector.load %arg9[%159, %c0_62, %c0_63] : memref<8x8x128xf32, #tpu.memory_space<vmem>>, vector<1x8x128xf32>
    %161 = vector.shape_cast %160 : vector<1x8x128xf32> to vector<8x128xf32>
    %162 = vector.shape_cast %158 : vector<8x128xf32> to vector<1x8x128xf32>
    tpu.vector_store %arg9[%159, %c0_62, %c0_63], %162 {strides = array<i32>} : memref<8x8x128xf32, #tpu.memory_space<vmem>>, vector<1x8x128xf32>,
    %163 = arith.index_cast %117 : i32 to index
    %c0_64 = arith.constant 0 : index
    %c0_65 = arith.constant 0 : index
    %164 = vector.load %arg11[%163, %c0_64, %c0_65] : memref<8x8x384xf32, #tpu.memory_space<vmem>>, vector<1x8x384xf32>
    %165 = vector.shape_cast %164 : vector<1x8x384xf32> to vector<8x384xf32>
    %cst_66 = arith.constant dense<0.000000e+00> : vector<8x384xf32>
    %166 = tpu.matmul %104, %1, %cst_66 {dimension_numbers = #tpu.dot_dimension_numbers<[1], [0], [0], [1], [0, 0, 1, 1], [], []>} : vector<8x128xf32>, vector<128x384xf32>, vector<8x384xf32> -> vector<8x384xf32>
    %167 = vector.extract_strided_slice %165 {offsets = [0, 0], sizes = [8, 128], strides = [1, 1]} : vector<8x384xf32> to vector<8x128xf32>
    %168 = vector.extract_strided_slice %166 {offsets = [0, 0], sizes = [8, 128], strides = [1, 1]} : vector<8x384xf32> to vector<8x128xf32>
    %169 = arith.addf %167, %168 : vector<8x128xf32>
    %170 = arith.negf %169 : vector<8x128xf32>
    %171 = math.exp %170 : vector<8x128xf32>
    %cst_67 = arith.constant 1.000000e+00 : f32
    %172 = vector.broadcast %cst_67 : f32 to vector<8x128xf32>
    %173 = arith.addf %172, %171 : vector<8x128xf32>
    %174 = arith.divf %172, %173 : vector<8x128xf32>
    %175 = vector.extract_strided_slice %165 {offsets = [0, 128], sizes = [8, 128], strides = [1, 1]} : vector<8x384xf32> to vector<8x128xf32>
    %176 = vector.extract_strided_slice %166 {offsets = [0, 128], sizes = [8, 128], strides = [1, 1]} : vector<8x384xf32> to vector<8x128xf32>
    %177 = arith.addf %175, %176 : vector<8x128xf32>
    %178 = arith.negf %177 : vector<8x128xf32>
    %179 = math.exp %178 : vector<8x128xf32>
    %cst_68 = arith.constant 1.000000e+00 : f32
    %180 = vector.broadcast %cst_68 : f32 to vector<8x128xf32>
    %181 = arith.addf %180, %179 : vector<8x128xf32>
    %182 = arith.divf %180, %181 : vector<8x128xf32>
    %183 = vector.extract_strided_slice %165 {offsets = [0, 256], sizes = [8, 128], strides = [1, 1]} : vector<8x384xf32> to vector<8x128xf32>
    %184 = vector.extract_strided_slice %166 {offsets = [0, 256], sizes = [8, 128], strides = [1, 1]} : vector<8x384xf32> to vector<8x128xf32>
    %185 = arith.addf %184, %7 : vector<8x128xf32>
    %186 = arith.mulf %174, %185 : vector<8x128xf32>
    %187 = arith.addf %183, %186 : vector<8x128xf32>
    %188 = math.tanh %187 : vector<8x128xf32>
    %cst_69 = arith.constant 1.000000e+00 : f32
    %189 = vector.broadcast %cst_69 : f32 to vector<8x128xf32>
    %190 = arith.subf %189, %182 : vector<8x128xf32>
    %191 = arith.mulf %190, %188 : vector<8x128xf32>
    %192 = arith.mulf %182, %104 : vector<8x128xf32>
    %193 = arith.addf %191, %192 : vector<8x128xf32>
    %194 = vector.broadcast %117 : i32 to vector<8x128xi32>
    %195 = arith.cmpi sgt, %8, %194 : vector<8x128xi32>
    %196 = arith.select %195, %193, %104 : vector<8x128xi1>, vector<8x128xf32>
    %197 = arith.index_cast %117 : i32 to index
    %c0_70 = arith.constant 0 : index
    %c0_71 = arith.constant 0 : index
    %198 = vector.load %arg9[%197, %c0_70, %c0_71] : memref<8x8x128xf32, #tpu.memory_space<vmem>>, vector<1x8x128xf32>
    %199 = vector.shape_cast %198 : vector<1x8x128xf32> to vector<8x128xf32>
    %cst_72 = arith.constant 5.000000e-01 : f32
    %200 = vector.broadcast %cst_72 : f32 to vector<8x128xf32>
    %201 = arith.mulf %200, %193 : vector<8x128xf32>
    %cst_73 = arith.constant 0.000000e+00 : f32
    %202 = vector.broadcast %cst_73 : f32 to vector<8x128xf32>
    %203 = arith.select %195, %201, %202 : vector<8x128xi1>, vector<8x128xf32>
    %204 = arith.addf %199, %203 : vector<8x128xf32>
    %205 = arith.index_cast %117 : i32 to index
    %c0_74 = arith.constant 0 : index
    %c0_75 = arith.constant 0 : index
    %206 = vector.load %arg9[%205, %c0_74, %c0_75] : memref<8x8x128xf32, #tpu.memory_space<vmem>>, vector<1x8x128xf32>
    %207 = vector.shape_cast %206 : vector<1x8x128xf32> to vector<8x128xf32>
    %208 = vector.shape_cast %204 : vector<8x128xf32> to vector<1x8x128xf32>
    tpu.vector_store %arg9[%205, %c0_74, %c0_75], %208 {strides = array<i32>} : memref<8x8x128xf32, #tpu.memory_space<vmem>>, vector<1x8x128xf32>,
    %c2_i32 = arith.constant 2 : i32
    %c7_i32_76 = arith.constant 7 : i32
    %209 = arith.subi %c7_i32_76, %c2_i32 : i32
    %210 = arith.index_cast %c2_i32 : i32 to index
    %c0_77 = arith.constant 0 : index
    %c0_78 = arith.constant 0 : index
    %211 = vector.load %arg10[%210, %c0_77, %c0_78] : memref<8x8x384xf32, #tpu.memory_space<vmem>>, vector<1x8x384xf32>
    %212 = vector.shape_cast %211 : vector<1x8x384xf32> to vector<8x384xf32>
    %cst_79 = arith.constant dense<0.000000e+00> : vector<8x384xf32>
    %213 = tpu.matmul %148, %0, %cst_79 {dimension_numbers = #tpu.dot_dimension_numbers<[1], [0], [0], [1], [0, 0, 1, 1], [], []>} : vector<8x128xf32>, vector<128x384xf32>, vector<8x384xf32> -> vector<8x384xf32>
    %214 = vector.extract_strided_slice %212 {offsets = [0, 0], sizes = [8, 128], strides = [1, 1]} : vector<8x384xf32> to vector<8x128xf32>
    %215 = vector.extract_strided_slice %213 {offsets = [0, 0], sizes = [8, 128], strides = [1, 1]} : vector<8x384xf32> to vector<8x128xf32>
    %216 = arith.addf %214, %215 : vector<8x128xf32>
    %217 = arith.negf %216 : vector<8x128xf32>
    %218 = math.exp %217 : vector<8x128xf32>
    %cst_80 = arith.constant 1.000000e+00 : f32
    %219 = vector.broadcast %cst_80 : f32 to vector<8x128xf32>
    %220 = arith.addf %219, %218 : vector<8x128xf32>
    %221 = arith.divf %219, %220 : vector<8x128xf32>
    %222 = vector.extract_strided_slice %212 {offsets = [0, 128], sizes = [8, 128], strides = [1, 1]} : vector<8x384xf32> to vector<8x128xf32>
    %223 = vector.extract_strided_slice %213 {offsets = [0, 128], sizes = [8, 128], strides = [1, 1]} : vector<8x384xf32> to vector<8x128xf32>
    %224 = arith.addf %222, %223 : vector<8x128xf32>
    %225 = arith.negf %224 : vector<8x128xf32>
    %226 = math.exp %225 : vector<8x128xf32>
    %cst_81 = arith.constant 1.000000e+00 : f32
    %227 = vector.broadcast %cst_81 : f32 to vector<8x128xf32>
    %228 = arith.addf %227, %226 : vector<8x128xf32>
    %229 = arith.divf %227, %228 : vector<8x128xf32>
    %230 = vector.extract_strided_slice %212 {offsets = [0, 256], sizes = [8, 128], strides = [1, 1]} : vector<8x384xf32> to vector<8x128xf32>
    %231 = vector.extract_strided_slice %213 {offsets = [0, 256], sizes = [8, 128], strides = [1, 1]} : vector<8x384xf32> to vector<8x128xf32>
    %232 = arith.addf %231, %4 : vector<8x128xf32>
    %233 = arith.mulf %221, %232 : vector<8x128xf32>
    %234 = arith.addf %230, %233 : vector<8x128xf32>
    %235 = math.tanh %234 : vector<8x128xf32>
    %cst_82 = arith.constant 1.000000e+00 : f32
    %236 = vector.broadcast %cst_82 : f32 to vector<8x128xf32>
    %237 = arith.subf %236, %229 : vector<8x128xf32>
    %238 = arith.mulf %237, %235 : vector<8x128xf32>
    %239 = arith.mulf %229, %148 : vector<8x128xf32>
    %240 = arith.addf %238, %239 : vector<8x128xf32>
    %241 = vector.broadcast %c2_i32 : i32 to vector<8x128xi32>
    %242 = arith.cmpi sgt, %8, %241 : vector<8x128xi32>
    %243 = arith.index_cast %c2_i32 : i32 to index
    %c0_83 = arith.constant 0 : index
    %c0_84 = arith.constant 0 : index
    %244 = vector.load %arg9[%243, %c0_83, %c0_84] : memref<8x8x128xf32, #tpu.memory_space<vmem>>, vector<1x8x128xf32>
    %245 = vector.shape_cast %244 : vector<1x8x128xf32> to vector<8x128xf32>
    %cst_85 = arith.constant 5.000000e-01 : f32
    %246 = vector.broadcast %cst_85 : f32 to vector<8x128xf32>
    %247 = arith.mulf %246, %240 : vector<8x128xf32>
    %cst_86 = arith.constant 0.000000e+00 : f32
    %248 = vector.broadcast %cst_86 : f32 to vector<8x128xf32>
    %249 = arith.select %242, %247, %248 : vector<8x128xi1>, vector<8x128xf32>
    %250 = arith.addf %245, %249 : vector<8x128xf32>
    %251 = arith.index_cast %c2_i32 : i32 to index
    %c0_87 = arith.constant 0 : index
    %c0_88 = arith.constant 0 : index
    %252 = vector.load %arg9[%251, %c0_87, %c0_88] : memref<8x8x128xf32, #tpu.memory_space<vmem>>, vector<1x8x128xf32>
    %253 = vector.shape_cast %252 : vector<1x8x128xf32> to vector<8x128xf32>
    %254 = vector.shape_cast %250 : vector<8x128xf32> to vector<1x8x128xf32>
    tpu.vector_store %arg9[%251, %c0_87, %c0_88], %254 {strides = array<i32>} : memref<8x8x128xf32, #tpu.memory_space<vmem>>, vector<1x8x128xf32>,
    %255 = arith.index_cast %209 : i32 to index
    %c0_89 = arith.constant 0 : index
    %c0_90 = arith.constant 0 : index
    %256 = vector.load %arg11[%255, %c0_89, %c0_90] : memref<8x8x384xf32, #tpu.memory_space<vmem>>, vector<1x8x384xf32>
    %257 = vector.shape_cast %256 : vector<1x8x384xf32> to vector<8x384xf32>
    %cst_91 = arith.constant dense<0.000000e+00> : vector<8x384xf32>
    %258 = tpu.matmul %196, %1, %cst_91 {dimension_numbers = #tpu.dot_dimension_numbers<[1], [0], [0], [1], [0, 0, 1, 1], [], []>} : vector<8x128xf32>, vector<128x384xf32>, vector<8x384xf32> -> vector<8x384xf32>
    %259 = vector.extract_strided_slice %257 {offsets = [0, 0], sizes = [8, 128], strides = [1, 1]} : vector<8x384xf32> to vector<8x128xf32>
    %260 = vector.extract_strided_slice %258 {offsets = [0, 0], sizes = [8, 128], strides = [1, 1]} : vector<8x384xf32> to vector<8x128xf32>
    %261 = arith.addf %259, %260 : vector<8x128xf32>
    %262 = arith.negf %261 : vector<8x128xf32>
    %263 = math.exp %262 : vector<8x128xf32>
    %cst_92 = arith.constant 1.000000e+00 : f32
    %264 = vector.broadcast %cst_92 : f32 to vector<8x128xf32>
    %265 = arith.addf %264, %263 : vector<8x128xf32>
    %266 = arith.divf %264, %265 : vector<8x128xf32>
    %267 = vector.extract_strided_slice %257 {offsets = [0, 128], sizes = [8, 128], strides = [1, 1]} : vector<8x384xf32> to vector<8x128xf32>
    %268 = vector.extract_strided_slice %258 {offsets = [0, 128], sizes = [8, 128], strides = [1, 1]} : vector<8x384xf32> to vector<8x128xf32>
    %269 = arith.addf %267, %268 : vector<8x128xf32>
    %270 = arith.negf %269 : vector<8x128xf32>
    %271 = math.exp %270 : vector<8x128xf32>
    %cst_93 = arith.constant 1.000000e+00 : f32
    %272 = vector.broadcast %cst_93 : f32 to vector<8x128xf32>
    %273 = arith.addf %272, %271 : vector<8x128xf32>
    %274 = arith.divf %272, %273 : vector<8x128xf32>
    %275 = vector.extract_strided_slice %257 {offsets = [0, 256], sizes = [8, 128], strides = [1, 1]} : vector<8x384xf32> to vector<8x128xf32>
    %276 = vector.extract_strided_slice %258 {offsets = [0, 256], sizes = [8, 128], strides = [1, 1]} : vector<8x384xf32> to vector<8x128xf32>
    %277 = arith.addf %276, %7 : vector<8x128xf32>
    %278 = arith.mulf %266, %277 : vector<8x128xf32>
    %279 = arith.addf %275, %278 : vector<8x128xf32>
    %280 = math.tanh %279 : vector<8x128xf32>
    %cst_94 = arith.constant 1.000000e+00 : f32
    %281 = vector.broadcast %cst_94 : f32 to vector<8x128xf32>
    %282 = arith.subf %281, %274 : vector<8x128xf32>
    %283 = arith.mulf %282, %280 : vector<8x128xf32>
    %284 = arith.mulf %274, %196 : vector<8x128xf32>
    %285 = arith.addf %283, %284 : vector<8x128xf32>
    %286 = vector.broadcast %209 : i32 to vector<8x128xi32>
    %287 = arith.cmpi sgt, %8, %286 : vector<8x128xi32>
    %288 = arith.select %287, %285, %196 : vector<8x128xi1>, vector<8x128xf32>
    %289 = arith.index_cast %209 : i32 to index
    %c0_95 = arith.constant 0 : index
    %c0_96 = arith.constant 0 : index
    %290 = vector.load %arg9[%289, %c0_95, %c0_96] : memref<8x8x128xf32, #tpu.memory_space<vmem>>, vector<1x8x128xf32>
    %291 = vector.shape_cast %290 : vector<1x8x128xf32> to vector<8x128xf32>
    %cst_97 = arith.constant 5.000000e-01 : f32
    %292 = vector.broadcast %cst_97 : f32 to vector<8x128xf32>
    %293 = arith.mulf %292, %285 : vector<8x128xf32>
    %cst_98 = arith.constant 0.000000e+00 : f32
    %294 = vector.broadcast %cst_98 : f32 to vector<8x128xf32>
    %295 = arith.select %287, %293, %294 : vector<8x128xi1>, vector<8x128xf32>
    %296 = arith.addf %291, %295 : vector<8x128xf32>
    %297 = arith.index_cast %209 : i32 to index
    %c0_99 = arith.constant 0 : index
    %c0_100 = arith.constant 0 : index
    %298 = vector.load %arg9[%297, %c0_99, %c0_100] : memref<8x8x128xf32, #tpu.memory_space<vmem>>, vector<1x8x128xf32>
    %299 = vector.shape_cast %298 : vector<1x8x128xf32> to vector<8x128xf32>
    %300 = vector.shape_cast %296 : vector<8x128xf32> to vector<1x8x128xf32>
    tpu.vector_store %arg9[%297, %c0_99, %c0_100], %300 {strides = array<i32>} : memref<8x8x128xf32, #tpu.memory_space<vmem>>, vector<1x8x128xf32>,
    %c3_i32 = arith.constant 3 : i32
    %c7_i32_101 = arith.constant 7 : i32
    %301 = arith.subi %c7_i32_101, %c3_i32 : i32
    %302 = arith.index_cast %c3_i32 : i32 to index
    %c0_102 = arith.constant 0 : index
    %c0_103 = arith.constant 0 : index
    %303 = vector.load %arg10[%302, %c0_102, %c0_103] : memref<8x8x384xf32, #tpu.memory_space<vmem>>, vector<1x8x384xf32>
    %304 = vector.shape_cast %303 : vector<1x8x384xf32> to vector<8x384xf32>
    %cst_104 = arith.constant dense<0.000000e+00> : vector<8x384xf32>
    %305 = tpu.matmul %240, %0, %cst_104 {dimension_numbers = #tpu.dot_dimension_numbers<[1], [0], [0], [1], [0, 0, 1, 1], [], []>} : vector<8x128xf32>, vector<128x384xf32>, vector<8x384xf32> -> vector<8x384xf32>
    %306 = vector.extract_strided_slice %304 {offsets = [0, 0], sizes = [8, 128], strides = [1, 1]} : vector<8x384xf32> to vector<8x128xf32>
    %307 = vector.extract_strided_slice %305 {offsets = [0, 0], sizes = [8, 128], strides = [1, 1]} : vector<8x384xf32> to vector<8x128xf32>
    %308 = arith.addf %306, %307 : vector<8x128xf32>
    %309 = arith.negf %308 : vector<8x128xf32>
    %310 = math.exp %309 : vector<8x128xf32>
    %cst_105 = arith.constant 1.000000e+00 : f32
    %311 = vector.broadcast %cst_105 : f32 to vector<8x128xf32>
    %312 = arith.addf %311, %310 : vector<8x128xf32>
    %313 = arith.divf %311, %312 : vector<8x128xf32>
    %314 = vector.extract_strided_slice %304 {offsets = [0, 128], sizes = [8, 128], strides = [1, 1]} : vector<8x384xf32> to vector<8x128xf32>
    %315 = vector.extract_strided_slice %305 {offsets = [0, 128], sizes = [8, 128], strides = [1, 1]} : vector<8x384xf32> to vector<8x128xf32>
    %316 = arith.addf %314, %315 : vector<8x128xf32>
    %317 = arith.negf %316 : vector<8x128xf32>
    %318 = math.exp %317 : vector<8x128xf32>
    %cst_106 = arith.constant 1.000000e+00 : f32
    %319 = vector.broadcast %cst_106 : f32 to vector<8x128xf32>
    %320 = arith.addf %319, %318 : vector<8x128xf32>
    %321 = arith.divf %319, %320 : vector<8x128xf32>
    %322 = vector.extract_strided_slice %304 {offsets = [0, 256], sizes = [8, 128], strides = [1, 1]} : vector<8x384xf32> to vector<8x128xf32>
    %323 = vector.extract_strided_slice %305 {offsets = [0, 256], sizes = [8, 128], strides = [1, 1]} : vector<8x384xf32> to vector<8x128xf32>
    %324 = arith.addf %323, %4 : vector<8x128xf32>
    %325 = arith.mulf %313, %324 : vector<8x128xf32>
    %326 = arith.addf %322, %325 : vector<8x128xf32>
    %327 = math.tanh %326 : vector<8x128xf32>
    %cst_107 = arith.constant 1.000000e+00 : f32
    %328 = vector.broadcast %cst_107 : f32 to vector<8x128xf32>
    %329 = arith.subf %328, %321 : vector<8x128xf32>
    %330 = arith.mulf %329, %327 : vector<8x128xf32>
    %331 = arith.mulf %321, %240 : vector<8x128xf32>
    %332 = arith.addf %330, %331 : vector<8x128xf32>
    %333 = vector.broadcast %c3_i32 : i32 to vector<8x128xi32>
    %334 = arith.cmpi sgt, %8, %333 : vector<8x128xi32>
    %335 = arith.index_cast %c3_i32 : i32 to index
    %c0_108 = arith.constant 0 : index
    %c0_109 = arith.constant 0 : index
    %336 = vector.load %arg9[%335, %c0_108, %c0_109] : memref<8x8x128xf32, #tpu.memory_space<vmem>>, vector<1x8x128xf32>
    %337 = vector.shape_cast %336 : vector<1x8x128xf32> to vector<8x128xf32>
    %cst_110 = arith.constant 5.000000e-01 : f32
    %338 = vector.broadcast %cst_110 : f32 to vector<8x128xf32>
    %339 = arith.mulf %338, %332 : vector<8x128xf32>
    %cst_111 = arith.constant 0.000000e+00 : f32
    %340 = vector.broadcast %cst_111 : f32 to vector<8x128xf32>
    %341 = arith.select %334, %339, %340 : vector<8x128xi1>, vector<8x128xf32>
    %342 = arith.addf %337, %341 : vector<8x128xf32>
    %343 = arith.index_cast %c3_i32 : i32 to index
    %c0_112 = arith.constant 0 : index
    %c0_113 = arith.constant 0 : index
    %344 = vector.load %arg9[%343, %c0_112, %c0_113] : memref<8x8x128xf32, #tpu.memory_space<vmem>>, vector<1x8x128xf32>
    %345 = vector.shape_cast %344 : vector<1x8x128xf32> to vector<8x128xf32>
    %346 = vector.shape_cast %342 : vector<8x128xf32> to vector<1x8x128xf32>
    tpu.vector_store %arg9[%343, %c0_112, %c0_113], %346 {strides = array<i32>} : memref<8x8x128xf32, #tpu.memory_space<vmem>>, vector<1x8x128xf32>,
    %347 = arith.index_cast %301 : i32 to index
    %c0_114 = arith.constant 0 : index
    %c0_115 = arith.constant 0 : index
    %348 = vector.load %arg11[%347, %c0_114, %c0_115] : memref<8x8x384xf32, #tpu.memory_space<vmem>>, vector<1x8x384xf32>
    %349 = vector.shape_cast %348 : vector<1x8x384xf32> to vector<8x384xf32>
    %cst_116 = arith.constant dense<0.000000e+00> : vector<8x384xf32>
    %350 = tpu.matmul %288, %1, %cst_116 {dimension_numbers = #tpu.dot_dimension_numbers<[1], [0], [0], [1], [0, 0, 1, 1], [], []>} : vector<8x128xf32>, vector<128x384xf32>, vector<8x384xf32> -> vector<8x384xf32>
    %351 = vector.extract_strided_slice %349 {offsets = [0, 0], sizes = [8, 128], strides = [1, 1]} : vector<8x384xf32> to vector<8x128xf32>
    %352 = vector.extract_strided_slice %350 {offsets = [0, 0], sizes = [8, 128], strides = [1, 1]} : vector<8x384xf32> to vector<8x128xf32>
    %353 = arith.addf %351, %352 : vector<8x128xf32>
    %354 = arith.negf %353 : vector<8x128xf32>
    %355 = math.exp %354 : vector<8x128xf32>
    %cst_117 = arith.constant 1.000000e+00 : f32
    %356 = vector.broadcast %cst_117 : f32 to vector<8x128xf32>
    %357 = arith.addf %356, %355 : vector<8x128xf32>
    %358 = arith.divf %356, %357 : vector<8x128xf32>
    %359 = vector.extract_strided_slice %349 {offsets = [0, 128], sizes = [8, 128], strides = [1, 1]} : vector<8x384xf32> to vector<8x128xf32>
    %360 = vector.extract_strided_slice %350 {offsets = [0, 128], sizes = [8, 128], strides = [1, 1]} : vector<8x384xf32> to vector<8x128xf32>
    %361 = arith.addf %359, %360 : vector<8x128xf32>
    %362 = arith.negf %361 : vector<8x128xf32>
    %363 = math.exp %362 : vector<8x128xf32>
    %cst_118 = arith.constant 1.000000e+00 : f32
    %364 = vector.broadcast %cst_118 : f32 to vector<8x128xf32>
    %365 = arith.addf %364, %363 : vector<8x128xf32>
    %366 = arith.divf %364, %365 : vector<8x128xf32>
    %367 = vector.extract_strided_slice %349 {offsets = [0, 256], sizes = [8, 128], strides = [1, 1]} : vector<8x384xf32> to vector<8x128xf32>
    %368 = vector.extract_strided_slice %350 {offsets = [0, 256], sizes = [8, 128], strides = [1, 1]} : vector<8x384xf32> to vector<8x128xf32>
    %369 = arith.addf %368, %7 : vector<8x128xf32>
    %370 = arith.mulf %358, %369 : vector<8x128xf32>
    %371 = arith.addf %367, %370 : vector<8x128xf32>
    %372 = math.tanh %371 : vector<8x128xf32>
    %cst_119 = arith.constant 1.000000e+00 : f32
    %373 = vector.broadcast %cst_119 : f32 to vector<8x128xf32>
    %374 = arith.subf %373, %366 : vector<8x128xf32>
    %375 = arith.mulf %374, %372 : vector<8x128xf32>
    %376 = arith.mulf %366, %288 : vector<8x128xf32>
    %377 = arith.addf %375, %376 : vector<8x128xf32>
    %378 = vector.broadcast %301 : i32 to vector<8x128xi32>
    %379 = arith.cmpi sgt, %8, %378 : vector<8x128xi32>
    %380 = arith.select %379, %377, %288 : vector<8x128xi1>, vector<8x128xf32>
    %381 = arith.index_cast %301 : i32 to index
    %c0_120 = arith.constant 0 : index
    %c0_121 = arith.constant 0 : index
    %382 = vector.load %arg9[%381, %c0_120, %c0_121] : memref<8x8x128xf32, #tpu.memory_space<vmem>>, vector<1x8x128xf32>
    %383 = vector.shape_cast %382 : vector<1x8x128xf32> to vector<8x128xf32>
    %cst_122 = arith.constant 5.000000e-01 : f32
    %384 = vector.broadcast %cst_122 : f32 to vector<8x128xf32>
    %385 = arith.mulf %384, %377 : vector<8x128xf32>
    %cst_123 = arith.constant 0.000000e+00 : f32
    %386 = vector.broadcast %cst_123 : f32 to vector<8x128xf32>
    %387 = arith.select %379, %385, %386 : vector<8x128xi1>, vector<8x128xf32>
    %388 = arith.addf %383, %387 : vector<8x128xf32>
    %389 = arith.index_cast %301 : i32 to index
    %c0_124 = arith.constant 0 : index
    %c0_125 = arith.constant 0 : index
    %390 = vector.load %arg9[%389, %c0_124, %c0_125] : memref<8x8x128xf32, #tpu.memory_space<vmem>>, vector<1x8x128xf32>
    %391 = vector.shape_cast %390 : vector<1x8x128xf32> to vector<8x128xf32>
    %392 = vector.shape_cast %388 : vector<8x128xf32> to vector<1x8x128xf32>
    tpu.vector_store %arg9[%389, %c0_124, %c0_125], %392 {strides = array<i32>} : memref<8x8x128xf32, #tpu.memory_space<vmem>>, vector<1x8x128xf32>,
    %c4_i32 = arith.constant 4 : i32
    %c7_i32_126 = arith.constant 7 : i32
    %393 = arith.subi %c7_i32_126, %c4_i32 : i32
    %394 = arith.index_cast %c4_i32 : i32 to index
    %c0_127 = arith.constant 0 : index
    %c0_128 = arith.constant 0 : index
    %395 = vector.load %arg10[%394, %c0_127, %c0_128] : memref<8x8x384xf32, #tpu.memory_space<vmem>>, vector<1x8x384xf32>
    %396 = vector.shape_cast %395 : vector<1x8x384xf32> to vector<8x384xf32>
    %cst_129 = arith.constant dense<0.000000e+00> : vector<8x384xf32>
    %397 = tpu.matmul %332, %0, %cst_129 {dimension_numbers = #tpu.dot_dimension_numbers<[1], [0], [0], [1], [0, 0, 1, 1], [], []>} : vector<8x128xf32>, vector<128x384xf32>, vector<8x384xf32> -> vector<8x384xf32>
    %398 = vector.extract_strided_slice %396 {offsets = [0, 0], sizes = [8, 128], strides = [1, 1]} : vector<8x384xf32> to vector<8x128xf32>
    %399 = vector.extract_strided_slice %397 {offsets = [0, 0], sizes = [8, 128], strides = [1, 1]} : vector<8x384xf32> to vector<8x128xf32>
    %400 = arith.addf %398, %399 : vector<8x128xf32>
    %401 = arith.negf %400 : vector<8x128xf32>
    %402 = math.exp %401 : vector<8x128xf32>
    %cst_130 = arith.constant 1.000000e+00 : f32
    %403 = vector.broadcast %cst_130 : f32 to vector<8x128xf32>
    %404 = arith.addf %403, %402 : vector<8x128xf32>
    %405 = arith.divf %403, %404 : vector<8x128xf32>
    %406 = vector.extract_strided_slice %396 {offsets = [0, 128], sizes = [8, 128], strides = [1, 1]} : vector<8x384xf32> to vector<8x128xf32>
    %407 = vector.extract_strided_slice %397 {offsets = [0, 128], sizes = [8, 128], strides = [1, 1]} : vector<8x384xf32> to vector<8x128xf32>
    %408 = arith.addf %406, %407 : vector<8x128xf32>
    %409 = arith.negf %408 : vector<8x128xf32>
    %410 = math.exp %409 : vector<8x128xf32>
    %cst_131 = arith.constant 1.000000e+00 : f32
    %411 = vector.broadcast %cst_131 : f32 to vector<8x128xf32>
    %412 = arith.addf %411, %410 : vector<8x128xf32>
    %413 = arith.divf %411, %412 : vector<8x128xf32>
    %414 = vector.extract_strided_slice %396 {offsets = [0, 256], sizes = [8, 128], strides = [1, 1]} : vector<8x384xf32> to vector<8x128xf32>
    %415 = vector.extract_strided_slice %397 {offsets = [0, 256], sizes = [8, 128], strides = [1, 1]} : vector<8x384xf32> to vector<8x128xf32>
    %416 = arith.addf %415, %4 : vector<8x128xf32>
    %417 = arith.mulf %405, %416 : vector<8x128xf32>
    %418 = arith.addf %414, %417 : vector<8x128xf32>
    %419 = math.tanh %418 : vector<8x128xf32>
    %cst_132 = arith.constant 1.000000e+00 : f32
    %420 = vector.broadcast %cst_132 : f32 to vector<8x128xf32>
    %421 = arith.subf %420, %413 : vector<8x128xf32>
    %422 = arith.mulf %421, %419 : vector<8x128xf32>
    %423 = arith.mulf %413, %332 : vector<8x128xf32>
    %424 = arith.addf %422, %423 : vector<8x128xf32>
    %425 = vector.broadcast %c4_i32 : i32 to vector<8x128xi32>
    %426 = arith.cmpi sgt, %8, %425 : vector<8x128xi32>
    %427 = arith.index_cast %c4_i32 : i32 to index
    %c0_133 = arith.constant 0 : index
    %c0_134 = arith.constant 0 : index
    %428 = vector.load %arg9[%427, %c0_133, %c0_134] : memref<8x8x128xf32, #tpu.memory_space<vmem>>, vector<1x8x128xf32>
    %429 = vector.shape_cast %428 : vector<1x8x128xf32> to vector<8x128xf32>
    %cst_135 = arith.constant 5.000000e-01 : f32
    %430 = vector.broadcast %cst_135 : f32 to vector<8x128xf32>
    %431 = arith.mulf %430, %424 : vector<8x128xf32>
    %cst_136 = arith.constant 0.000000e+00 : f32
    %432 = vector.broadcast %cst_136 : f32 to vector<8x128xf32>
    %433 = arith.select %426, %431, %432 : vector<8x128xi1>, vector<8x128xf32>
    %434 = arith.addf %429, %433 : vector<8x128xf32>
    %435 = arith.index_cast %c4_i32 : i32 to index
    %c0_137 = arith.constant 0 : index
    %c0_138 = arith.constant 0 : index
    %436 = vector.load %arg9[%435, %c0_137, %c0_138] : memref<8x8x128xf32, #tpu.memory_space<vmem>>, vector<1x8x128xf32>
    %437 = vector.shape_cast %436 : vector<1x8x128xf32> to vector<8x128xf32>
    %438 = vector.shape_cast %434 : vector<8x128xf32> to vector<1x8x128xf32>
    tpu.vector_store %arg9[%435, %c0_137, %c0_138], %438 {strides = array<i32>} : memref<8x8x128xf32, #tpu.memory_space<vmem>>, vector<1x8x128xf32>,
    %439 = arith.index_cast %393 : i32 to index
    %c0_139 = arith.constant 0 : index
    %c0_140 = arith.constant 0 : index
    %440 = vector.load %arg11[%439, %c0_139, %c0_140] : memref<8x8x384xf32, #tpu.memory_space<vmem>>, vector<1x8x384xf32>
    %441 = vector.shape_cast %440 : vector<1x8x384xf32> to vector<8x384xf32>
    %cst_141 = arith.constant dense<0.000000e+00> : vector<8x384xf32>
    %442 = tpu.matmul %380, %1, %cst_141 {dimension_numbers = #tpu.dot_dimension_numbers<[1], [0], [0], [1], [0, 0, 1, 1], [], []>} : vector<8x128xf32>, vector<128x384xf32>, vector<8x384xf32> -> vector<8x384xf32>
    %443 = vector.extract_strided_slice %441 {offsets = [0, 0], sizes = [8, 128], strides = [1, 1]} : vector<8x384xf32> to vector<8x128xf32>
    %444 = vector.extract_strided_slice %442 {offsets = [0, 0], sizes = [8, 128], strides = [1, 1]} : vector<8x384xf32> to vector<8x128xf32>
    %445 = arith.addf %443, %444 : vector<8x128xf32>
    %446 = arith.negf %445 : vector<8x128xf32>
    %447 = math.exp %446 : vector<8x128xf32>
    %cst_142 = arith.constant 1.000000e+00 : f32
    %448 = vector.broadcast %cst_142 : f32 to vector<8x128xf32>
    %449 = arith.addf %448, %447 : vector<8x128xf32>
    %450 = arith.divf %448, %449 : vector<8x128xf32>
    %451 = vector.extract_strided_slice %441 {offsets = [0, 128], sizes = [8, 128], strides = [1, 1]} : vector<8x384xf32> to vector<8x128xf32>
    %452 = vector.extract_strided_slice %442 {offsets = [0, 128], sizes = [8, 128], strides = [1, 1]} : vector<8x384xf32> to vector<8x128xf32>
    %453 = arith.addf %451, %452 : vector<8x128xf32>
    %454 = arith.negf %453 : vector<8x128xf32>
    %455 = math.exp %454 : vector<8x128xf32>
    %cst_143 = arith.constant 1.000000e+00 : f32
    %456 = vector.broadcast %cst_143 : f32 to vector<8x128xf32>
    %457 = arith.addf %456, %455 : vector<8x128xf32>
    %458 = arith.divf %456, %457 : vector<8x128xf32>
    %459 = vector.extract_strided_slice %441 {offsets = [0, 256], sizes = [8, 128], strides = [1, 1]} : vector<8x384xf32> to vector<8x128xf32>
    %460 = vector.extract_strided_slice %442 {offsets = [0, 256], sizes = [8, 128], strides = [1, 1]} : vector<8x384xf32> to vector<8x128xf32>
    %461 = arith.addf %460, %7 : vector<8x128xf32>
    %462 = arith.mulf %450, %461 : vector<8x128xf32>
    %463 = arith.addf %459, %462 : vector<8x128xf32>
    %464 = math.tanh %463 : vector<8x128xf32>
    %cst_144 = arith.constant 1.000000e+00 : f32
    %465 = vector.broadcast %cst_144 : f32 to vector<8x128xf32>
    %466 = arith.subf %465, %458 : vector<8x128xf32>
    %467 = arith.mulf %466, %464 : vector<8x128xf32>
    %468 = arith.mulf %458, %380 : vector<8x128xf32>
    %469 = arith.addf %467, %468 : vector<8x128xf32>
    %470 = vector.broadcast %393 : i32 to vector<8x128xi32>
    %471 = arith.cmpi sgt, %8, %470 : vector<8x128xi32>
    %472 = arith.select %471, %469, %380 : vector<8x128xi1>, vector<8x128xf32>
    %473 = arith.index_cast %393 : i32 to index
    %c0_145 = arith.constant 0 : index
    %c0_146 = arith.constant 0 : index
    %474 = vector.load %arg9[%473, %c0_145, %c0_146] : memref<8x8x128xf32, #tpu.memory_space<vmem>>, vector<1x8x128xf32>
    %475 = vector.shape_cast %474 : vector<1x8x128xf32> to vector<8x128xf32>
    %cst_147 = arith.constant 5.000000e-01 : f32
    %476 = vector.broadcast %cst_147 : f32 to vector<8x128xf32>
    %477 = arith.mulf %476, %469 : vector<8x128xf32>
    %cst_148 = arith.constant 0.000000e+00 : f32
    %478 = vector.broadcast %cst_148 : f32 to vector<8x128xf32>
    %479 = arith.select %471, %477, %478 : vector<8x128xi1>, vector<8x128xf32>
    %480 = arith.addf %475, %479 : vector<8x128xf32>
    %481 = arith.index_cast %393 : i32 to index
    %c0_149 = arith.constant 0 : index
    %c0_150 = arith.constant 0 : index
    %482 = vector.load %arg9[%481, %c0_149, %c0_150] : memref<8x8x128xf32, #tpu.memory_space<vmem>>, vector<1x8x128xf32>
    %483 = vector.shape_cast %482 : vector<1x8x128xf32> to vector<8x128xf32>
    %484 = vector.shape_cast %480 : vector<8x128xf32> to vector<1x8x128xf32>
    tpu.vector_store %arg9[%481, %c0_149, %c0_150], %484 {strides = array<i32>} : memref<8x8x128xf32, #tpu.memory_space<vmem>>, vector<1x8x128xf32>,
    %c5_i32 = arith.constant 5 : i32
    %c7_i32_151 = arith.constant 7 : i32
    %485 = arith.subi %c7_i32_151, %c5_i32 : i32
    %486 = arith.index_cast %c5_i32 : i32 to index
    %c0_152 = arith.constant 0 : index
    %c0_153 = arith.constant 0 : index
    %487 = vector.load %arg10[%486, %c0_152, %c0_153] : memref<8x8x384xf32, #tpu.memory_space<vmem>>, vector<1x8x384xf32>
    %488 = vector.shape_cast %487 : vector<1x8x384xf32> to vector<8x384xf32>
    %cst_154 = arith.constant dense<0.000000e+00> : vector<8x384xf32>
    %489 = tpu.matmul %424, %0, %cst_154 {dimension_numbers = #tpu.dot_dimension_numbers<[1], [0], [0], [1], [0, 0, 1, 1], [], []>} : vector<8x128xf32>, vector<128x384xf32>, vector<8x384xf32> -> vector<8x384xf32>
    %490 = vector.extract_strided_slice %488 {offsets = [0, 0], sizes = [8, 128], strides = [1, 1]} : vector<8x384xf32> to vector<8x128xf32>
    %491 = vector.extract_strided_slice %489 {offsets = [0, 0], sizes = [8, 128], strides = [1, 1]} : vector<8x384xf32> to vector<8x128xf32>
    %492 = arith.addf %490, %491 : vector<8x128xf32>
    %493 = arith.negf %492 : vector<8x128xf32>
    %494 = math.exp %493 : vector<8x128xf32>
    %cst_155 = arith.constant 1.000000e+00 : f32
    %495 = vector.broadcast %cst_155 : f32 to vector<8x128xf32>
    %496 = arith.addf %495, %494 : vector<8x128xf32>
    %497 = arith.divf %495, %496 : vector<8x128xf32>
    %498 = vector.extract_strided_slice %488 {offsets = [0, 128], sizes = [8, 128], strides = [1, 1]} : vector<8x384xf32> to vector<8x128xf32>
    %499 = vector.extract_strided_slice %489 {offsets = [0, 128], sizes = [8, 128], strides = [1, 1]} : vector<8x384xf32> to vector<8x128xf32>
    %500 = arith.addf %498, %499 : vector<8x128xf32>
    %501 = arith.negf %500 : vector<8x128xf32>
    %502 = math.exp %501 : vector<8x128xf32>
    %cst_156 = arith.constant 1.000000e+00 : f32
    %503 = vector.broadcast %cst_156 : f32 to vector<8x128xf32>
    %504 = arith.addf %503, %502 : vector<8x128xf32>
    %505 = arith.divf %503, %504 : vector<8x128xf32>
    %506 = vector.extract_strided_slice %488 {offsets = [0, 256], sizes = [8, 128], strides = [1, 1]} : vector<8x384xf32> to vector<8x128xf32>
    %507 = vector.extract_strided_slice %489 {offsets = [0, 256], sizes = [8, 128], strides = [1, 1]} : vector<8x384xf32> to vector<8x128xf32>
    %508 = arith.addf %507, %4 : vector<8x128xf32>
    %509 = arith.mulf %497, %508 : vector<8x128xf32>
    %510 = arith.addf %506, %509 : vector<8x128xf32>
    %511 = math.tanh %510 : vector<8x128xf32>
    %cst_157 = arith.constant 1.000000e+00 : f32
    %512 = vector.broadcast %cst_157 : f32 to vector<8x128xf32>
    %513 = arith.subf %512, %505 : vector<8x128xf32>
    %514 = arith.mulf %513, %511 : vector<8x128xf32>
    %515 = arith.mulf %505, %424 : vector<8x128xf32>
    %516 = arith.addf %514, %515 : vector<8x128xf32>
    %517 = vector.broadcast %c5_i32 : i32 to vector<8x128xi32>
    %518 = arith.cmpi sgt, %8, %517 : vector<8x128xi32>
    %519 = arith.index_cast %c5_i32 : i32 to index
    %c0_158 = arith.constant 0 : index
    %c0_159 = arith.constant 0 : index
    %520 = vector.load %arg9[%519, %c0_158, %c0_159] : memref<8x8x128xf32, #tpu.memory_space<vmem>>, vector<1x8x128xf32>
    %521 = vector.shape_cast %520 : vector<1x8x128xf32> to vector<8x128xf32>
    %cst_160 = arith.constant 5.000000e-01 : f32
    %522 = vector.broadcast %cst_160 : f32 to vector<8x128xf32>
    %523 = arith.mulf %522, %516 : vector<8x128xf32>
    %cst_161 = arith.constant 0.000000e+00 : f32
    %524 = vector.broadcast %cst_161 : f32 to vector<8x128xf32>
    %525 = arith.select %518, %523, %524 : vector<8x128xi1>, vector<8x128xf32>
    %526 = arith.addf %521, %525 : vector<8x128xf32>
    %527 = arith.index_cast %c5_i32 : i32 to index
    %c0_162 = arith.constant 0 : index
    %c0_163 = arith.constant 0 : index
    %528 = vector.load %arg9[%527, %c0_162, %c0_163] : memref<8x8x128xf32, #tpu.memory_space<vmem>>, vector<1x8x128xf32>
    %529 = vector.shape_cast %528 : vector<1x8x128xf32> to vector<8x128xf32>
    %530 = vector.shape_cast %526 : vector<8x128xf32> to vector<1x8x128xf32>
    tpu.vector_store %arg9[%527, %c0_162, %c0_163], %530 {strides = array<i32>} : memref<8x8x128xf32, #tpu.memory_space<vmem>>, vector<1x8x128xf32>,
    %531 = arith.index_cast %485 : i32 to index
    %c0_164 = arith.constant 0 : index
    %c0_165 = arith.constant 0 : index
    %532 = vector.load %arg11[%531, %c0_164, %c0_165] : memref<8x8x384xf32, #tpu.memory_space<vmem>>, vector<1x8x384xf32>
    %533 = vector.shape_cast %532 : vector<1x8x384xf32> to vector<8x384xf32>
    %cst_166 = arith.constant dense<0.000000e+00> : vector<8x384xf32>
    %534 = tpu.matmul %472, %1, %cst_166 {dimension_numbers = #tpu.dot_dimension_numbers<[1], [0], [0], [1], [0, 0, 1, 1], [], []>} : vector<8x128xf32>, vector<128x384xf32>, vector<8x384xf32> -> vector<8x384xf32>
    %535 = vector.extract_strided_slice %533 {offsets = [0, 0], sizes = [8, 128], strides = [1, 1]} : vector<8x384xf32> to vector<8x128xf32>
    %536 = vector.extract_strided_slice %534 {offsets = [0, 0], sizes = [8, 128], strides = [1, 1]} : vector<8x384xf32> to vector<8x128xf32>
    %537 = arith.addf %535, %536 : vector<8x128xf32>
    %538 = arith.negf %537 : vector<8x128xf32>
    %539 = math.exp %538 : vector<8x128xf32>
    %cst_167 = arith.constant 1.000000e+00 : f32
    %540 = vector.broadcast %cst_167 : f32 to vector<8x128xf32>
    %541 = arith.addf %540, %539 : vector<8x128xf32>
    %542 = arith.divf %540, %541 : vector<8x128xf32>
    %543 = vector.extract_strided_slice %533 {offsets = [0, 128], sizes = [8, 128], strides = [1, 1]} : vector<8x384xf32> to vector<8x128xf32>
    %544 = vector.extract_strided_slice %534 {offsets = [0, 128], sizes = [8, 128], strides = [1, 1]} : vector<8x384xf32> to vector<8x128xf32>
    %545 = arith.addf %543, %544 : vector<8x128xf32>
    %546 = arith.negf %545 : vector<8x128xf32>
    %547 = math.exp %546 : vector<8x128xf32>
    %cst_168 = arith.constant 1.000000e+00 : f32
    %548 = vector.broadcast %cst_168 : f32 to vector<8x128xf32>
    %549 = arith.addf %548, %547 : vector<8x128xf32>
    %550 = arith.divf %548, %549 : vector<8x128xf32>
    %551 = vector.extract_strided_slice %533 {offsets = [0, 256], sizes = [8, 128], strides = [1, 1]} : vector<8x384xf32> to vector<8x128xf32>
    %552 = vector.extract_strided_slice %534 {offsets = [0, 256], sizes = [8, 128], strides = [1, 1]} : vector<8x384xf32> to vector<8x128xf32>
    %553 = arith.addf %552, %7 : vector<8x128xf32>
    %554 = arith.mulf %542, %553 : vector<8x128xf32>
    %555 = arith.addf %551, %554 : vector<8x128xf32>
    %556 = math.tanh %555 : vector<8x128xf32>
    %cst_169 = arith.constant 1.000000e+00 : f32
    %557 = vector.broadcast %cst_169 : f32 to vector<8x128xf32>
    %558 = arith.subf %557, %550 : vector<8x128xf32>
    %559 = arith.mulf %558, %556 : vector<8x128xf32>
    %560 = arith.mulf %550, %472 : vector<8x128xf32>
    %561 = arith.addf %559, %560 : vector<8x128xf32>
    %562 = vector.broadcast %485 : i32 to vector<8x128xi32>
    %563 = arith.cmpi sgt, %8, %562 : vector<8x128xi32>
    %564 = arith.select %563, %561, %472 : vector<8x128xi1>, vector<8x128xf32>
    %565 = arith.index_cast %485 : i32 to index
    %c0_170 = arith.constant 0 : index
    %c0_171 = arith.constant 0 : index
    %566 = vector.load %arg9[%565, %c0_170, %c0_171] : memref<8x8x128xf32, #tpu.memory_space<vmem>>, vector<1x8x128xf32>
    %567 = vector.shape_cast %566 : vector<1x8x128xf32> to vector<8x128xf32>
    %cst_172 = arith.constant 5.000000e-01 : f32
    %568 = vector.broadcast %cst_172 : f32 to vector<8x128xf32>
    %569 = arith.mulf %568, %561 : vector<8x128xf32>
    %cst_173 = arith.constant 0.000000e+00 : f32
    %570 = vector.broadcast %cst_173 : f32 to vector<8x128xf32>
    %571 = arith.select %563, %569, %570 : vector<8x128xi1>, vector<8x128xf32>
    %572 = arith.addf %567, %571 : vector<8x128xf32>
    %573 = arith.index_cast %485 : i32 to index
    %c0_174 = arith.constant 0 : index
    %c0_175 = arith.constant 0 : index
    %574 = vector.load %arg9[%573, %c0_174, %c0_175] : memref<8x8x128xf32, #tpu.memory_space<vmem>>, vector<1x8x128xf32>
    %575 = vector.shape_cast %574 : vector<1x8x128xf32> to vector<8x128xf32>
    %576 = vector.shape_cast %572 : vector<8x128xf32> to vector<1x8x128xf32>
    tpu.vector_store %arg9[%573, %c0_174, %c0_175], %576 {strides = array<i32>} : memref<8x8x128xf32, #tpu.memory_space<vmem>>, vector<1x8x128xf32>,
    %c6_i32 = arith.constant 6 : i32
    %c7_i32_176 = arith.constant 7 : i32
    %577 = arith.subi %c7_i32_176, %c6_i32 : i32
    %578 = arith.index_cast %c6_i32 : i32 to index
    %c0_177 = arith.constant 0 : index
    %c0_178 = arith.constant 0 : index
    %579 = vector.load %arg10[%578, %c0_177, %c0_178] : memref<8x8x384xf32, #tpu.memory_space<vmem>>, vector<1x8x384xf32>
    %580 = vector.shape_cast %579 : vector<1x8x384xf32> to vector<8x384xf32>
    %cst_179 = arith.constant dense<0.000000e+00> : vector<8x384xf32>
    %581 = tpu.matmul %516, %0, %cst_179 {dimension_numbers = #tpu.dot_dimension_numbers<[1], [0], [0], [1], [0, 0, 1, 1], [], []>} : vector<8x128xf32>, vector<128x384xf32>, vector<8x384xf32> -> vector<8x384xf32>
    %582 = vector.extract_strided_slice %580 {offsets = [0, 0], sizes = [8, 128], strides = [1, 1]} : vector<8x384xf32> to vector<8x128xf32>
    %583 = vector.extract_strided_slice %581 {offsets = [0, 0], sizes = [8, 128], strides = [1, 1]} : vector<8x384xf32> to vector<8x128xf32>
    %584 = arith.addf %582, %583 : vector<8x128xf32>
    %585 = arith.negf %584 : vector<8x128xf32>
    %586 = math.exp %585 : vector<8x128xf32>
    %cst_180 = arith.constant 1.000000e+00 : f32
    %587 = vector.broadcast %cst_180 : f32 to vector<8x128xf32>
    %588 = arith.addf %587, %586 : vector<8x128xf32>
    %589 = arith.divf %587, %588 : vector<8x128xf32>
    %590 = vector.extract_strided_slice %580 {offsets = [0, 128], sizes = [8, 128], strides = [1, 1]} : vector<8x384xf32> to vector<8x128xf32>
    %591 = vector.extract_strided_slice %581 {offsets = [0, 128], sizes = [8, 128], strides = [1, 1]} : vector<8x384xf32> to vector<8x128xf32>
    %592 = arith.addf %590, %591 : vector<8x128xf32>
    %593 = arith.negf %592 : vector<8x128xf32>
    %594 = math.exp %593 : vector<8x128xf32>
    %cst_181 = arith.constant 1.000000e+00 : f32
    %595 = vector.broadcast %cst_181 : f32 to vector<8x128xf32>
    %596 = arith.addf %595, %594 : vector<8x128xf32>
    %597 = arith.divf %595, %596 : vector<8x128xf32>
    %598 = vector.extract_strided_slice %580 {offsets = [0, 256], sizes = [8, 128], strides = [1, 1]} : vector<8x384xf32> to vector<8x128xf32>
    %599 = vector.extract_strided_slice %581 {offsets = [0, 256], sizes = [8, 128], strides = [1, 1]} : vector<8x384xf32> to vector<8x128xf32>
    %600 = arith.addf %599, %4 : vector<8x128xf32>
    %601 = arith.mulf %589, %600 : vector<8x128xf32>
    %602 = arith.addf %598, %601 : vector<8x128xf32>
    %603 = math.tanh %602 : vector<8x128xf32>
    %cst_182 = arith.constant 1.000000e+00 : f32
    %604 = vector.broadcast %cst_182 : f32 to vector<8x128xf32>
    %605 = arith.subf %604, %597 : vector<8x128xf32>
    %606 = arith.mulf %605, %603 : vector<8x128xf32>
    %607 = arith.mulf %597, %516 : vector<8x128xf32>
    %608 = arith.addf %606, %607 : vector<8x128xf32>
    %609 = vector.broadcast %c6_i32 : i32 to vector<8x128xi32>
    %610 = arith.cmpi sgt, %8, %609 : vector<8x128xi32>
    %611 = arith.index_cast %c6_i32 : i32 to index
    %c0_183 = arith.constant 0 : index
    %c0_184 = arith.constant 0 : index
    %612 = vector.load %arg9[%611, %c0_183, %c0_184] : memref<8x8x128xf32, #tpu.memory_space<vmem>>, vector<1x8x128xf32>
    %613 = vector.shape_cast %612 : vector<1x8x128xf32> to vector<8x128xf32>
    %cst_185 = arith.constant 5.000000e-01 : f32
    %614 = vector.broadcast %cst_185 : f32 to vector<8x128xf32>
    %615 = arith.mulf %614, %608 : vector<8x128xf32>
    %cst_186 = arith.constant 0.000000e+00 : f32
    %616 = vector.broadcast %cst_186 : f32 to vector<8x128xf32>
    %617 = arith.select %610, %615, %616 : vector<8x128xi1>, vector<8x128xf32>
    %618 = arith.addf %613, %617 : vector<8x128xf32>
    %619 = arith.index_cast %c6_i32 : i32 to index
    %c0_187 = arith.constant 0 : index
    %c0_188 = arith.constant 0 : index
    %620 = vector.load %arg9[%619, %c0_187, %c0_188] : memref<8x8x128xf32, #tpu.memory_space<vmem>>, vector<1x8x128xf32>
    %621 = vector.shape_cast %620 : vector<1x8x128xf32> to vector<8x128xf32>
    %622 = vector.shape_cast %618 : vector<8x128xf32> to vector<1x8x128xf32>
    tpu.vector_store %arg9[%619, %c0_187, %c0_188], %622 {strides = array<i32>} : memref<8x8x128xf32, #tpu.memory_space<vmem>>, vector<1x8x128xf32>,
    %623 = arith.index_cast %577 : i32 to index
    %c0_189 = arith.constant 0 : index
    %c0_190 = arith.constant 0 : index
    %624 = vector.load %arg11[%623, %c0_189, %c0_190] : memref<8x8x384xf32, #tpu.memory_space<vmem>>, vector<1x8x384xf32>
    %625 = vector.shape_cast %624 : vector<1x8x384xf32> to vector<8x384xf32>
    %cst_191 = arith.constant dense<0.000000e+00> : vector<8x384xf32>
    %626 = tpu.matmul %564, %1, %cst_191 {dimension_numbers = #tpu.dot_dimension_numbers<[1], [0], [0], [1], [0, 0, 1, 1], [], []>} : vector<8x128xf32>, vector<128x384xf32>, vector<8x384xf32> -> vector<8x384xf32>
    %627 = vector.extract_strided_slice %625 {offsets = [0, 0], sizes = [8, 128], strides = [1, 1]} : vector<8x384xf32> to vector<8x128xf32>
    %628 = vector.extract_strided_slice %626 {offsets = [0, 0], sizes = [8, 128], strides = [1, 1]} : vector<8x384xf32> to vector<8x128xf32>
    %629 = arith.addf %627, %628 : vector<8x128xf32>
    %630 = arith.negf %629 : vector<8x128xf32>
    %631 = math.exp %630 : vector<8x128xf32>
    %cst_192 = arith.constant 1.000000e+00 : f32
    %632 = vector.broadcast %cst_192 : f32 to vector<8x128xf32>
    %633 = arith.addf %632, %631 : vector<8x128xf32>
    %634 = arith.divf %632, %633 : vector<8x128xf32>
    %635 = vector.extract_strided_slice %625 {offsets = [0, 128], sizes = [8, 128], strides = [1, 1]} : vector<8x384xf32> to vector<8x128xf32>
    %636 = vector.extract_strided_slice %626 {offsets = [0, 128], sizes = [8, 128], strides = [1, 1]} : vector<8x384xf32> to vector<8x128xf32>
    %637 = arith.addf %635, %636 : vector<8x128xf32>
    %638 = arith.negf %637 : vector<8x128xf32>
    %639 = math.exp %638 : vector<8x128xf32>
    %cst_193 = arith.constant 1.000000e+00 : f32
    %640 = vector.broadcast %cst_193 : f32 to vector<8x128xf32>
    %641 = arith.addf %640, %639 : vector<8x128xf32>
    %642 = arith.divf %640, %641 : vector<8x128xf32>
    %643 = vector.extract_strided_slice %625 {offsets = [0, 256], sizes = [8, 128], strides = [1, 1]} : vector<8x384xf32> to vector<8x128xf32>
    %644 = vector.extract_strided_slice %626 {offsets = [0, 256], sizes = [8, 128], strides = [1, 1]} : vector<8x384xf32> to vector<8x128xf32>
    %645 = arith.addf %644, %7 : vector<8x128xf32>
    %646 = arith.mulf %634, %645 : vector<8x128xf32>
    %647 = arith.addf %643, %646 : vector<8x128xf32>
    %648 = math.tanh %647 : vector<8x128xf32>
    %cst_194 = arith.constant 1.000000e+00 : f32
    %649 = vector.broadcast %cst_194 : f32 to vector<8x128xf32>
    %650 = arith.subf %649, %642 : vector<8x128xf32>
    %651 = arith.mulf %650, %648 : vector<8x128xf32>
    %652 = arith.mulf %642, %564 : vector<8x128xf32>
    %653 = arith.addf %651, %652 : vector<8x128xf32>
    %654 = vector.broadcast %577 : i32 to vector<8x128xi32>
    %655 = arith.cmpi sgt, %8, %654 : vector<8x128xi32>
    %656 = arith.select %655, %653, %564 : vector<8x128xi1>, vector<8x128xf32>
    %657 = arith.index_cast %577 : i32 to index
    %c0_195 = arith.constant 0 : index
    %c0_196 = arith.constant 0 : index
    %658 = vector.load %arg9[%657, %c0_195, %c0_196] : memref<8x8x128xf32, #tpu.memory_space<vmem>>, vector<1x8x128xf32>
    %659 = vector.shape_cast %658 : vector<1x8x128xf32> to vector<8x128xf32>
    %cst_197 = arith.constant 5.000000e-01 : f32
    %660 = vector.broadcast %cst_197 : f32 to vector<8x128xf32>
    %661 = arith.mulf %660, %653 : vector<8x128xf32>
    %cst_198 = arith.constant 0.000000e+00 : f32
    %662 = vector.broadcast %cst_198 : f32 to vector<8x128xf32>
    %663 = arith.select %655, %661, %662 : vector<8x128xi1>, vector<8x128xf32>
    %664 = arith.addf %659, %663 : vector<8x128xf32>
    %665 = arith.index_cast %577 : i32 to index
    %c0_199 = arith.constant 0 : index
    %c0_200 = arith.constant 0 : index
    %666 = vector.load %arg9[%665, %c0_199, %c0_200] : memref<8x8x128xf32, #tpu.memory_space<vmem>>, vector<1x8x128xf32>
    %667 = vector.shape_cast %666 : vector<1x8x128xf32> to vector<8x128xf32>
    %668 = vector.shape_cast %664 : vector<8x128xf32> to vector<1x8x128xf32>
    tpu.vector_store %arg9[%665, %c0_199, %c0_200], %668 {strides = array<i32>} : memref<8x8x128xf32, #tpu.memory_space<vmem>>, vector<1x8x128xf32>,
    %c7_i32_201 = arith.constant 7 : i32
    %c7_i32_202 = arith.constant 7 : i32
    %669 = arith.subi %c7_i32_202, %c7_i32_201 : i32
    %670 = arith.index_cast %c7_i32_201 : i32 to index
    %c0_203 = arith.constant 0 : index
    %c0_204 = arith.constant 0 : index
    %671 = vector.load %arg10[%670, %c0_203, %c0_204] : memref<8x8x384xf32, #tpu.memory_space<vmem>>, vector<1x8x384xf32>
    %672 = vector.shape_cast %671 : vector<1x8x384xf32> to vector<8x384xf32>
    %cst_205 = arith.constant dense<0.000000e+00> : vector<8x384xf32>
    %673 = tpu.matmul %608, %0, %cst_205 {dimension_numbers = #tpu.dot_dimension_numbers<[1], [0], [0], [1], [0, 0, 1, 1], [], []>} : vector<8x128xf32>, vector<128x384xf32>, vector<8x384xf32> -> vector<8x384xf32>
    %674 = vector.extract_strided_slice %672 {offsets = [0, 0], sizes = [8, 128], strides = [1, 1]} : vector<8x384xf32> to vector<8x128xf32>
    %675 = vector.extract_strided_slice %673 {offsets = [0, 0], sizes = [8, 128], strides = [1, 1]} : vector<8x384xf32> to vector<8x128xf32>
    %676 = arith.addf %674, %675 : vector<8x128xf32>
    %677 = arith.negf %676 : vector<8x128xf32>
    %678 = math.exp %677 : vector<8x128xf32>
    %cst_206 = arith.constant 1.000000e+00 : f32
    %679 = vector.broadcast %cst_206 : f32 to vector<8x128xf32>
    %680 = arith.addf %679, %678 : vector<8x128xf32>
    %681 = arith.divf %679, %680 : vector<8x128xf32>
    %682 = vector.extract_strided_slice %672 {offsets = [0, 128], sizes = [8, 128], strides = [1, 1]} : vector<8x384xf32> to vector<8x128xf32>
    %683 = vector.extract_strided_slice %673 {offsets = [0, 128], sizes = [8, 128], strides = [1, 1]} : vector<8x384xf32> to vector<8x128xf32>
    %684 = arith.addf %682, %683 : vector<8x128xf32>
    %685 = arith.negf %684 : vector<8x128xf32>
    %686 = math.exp %685 : vector<8x128xf32>
    %cst_207 = arith.constant 1.000000e+00 : f32
    %687 = vector.broadcast %cst_207 : f32 to vector<8x128xf32>
    %688 = arith.addf %687, %686 : vector<8x128xf32>
    %689 = arith.divf %687, %688 : vector<8x128xf32>
    %690 = vector.extract_strided_slice %672 {offsets = [0, 256], sizes = [8, 128], strides = [1, 1]} : vector<8x384xf32> to vector<8x128xf32>
    %691 = vector.extract_strided_slice %673 {offsets = [0, 256], sizes = [8, 128], strides = [1, 1]} : vector<8x384xf32> to vector<8x128xf32>
    %692 = arith.addf %691, %4 : vector<8x128xf32>
    %693 = arith.mulf %681, %692 : vector<8x128xf32>
    %694 = arith.addf %690, %693 : vector<8x128xf32>
    %695 = math.tanh %694 : vector<8x128xf32>
    %cst_208 = arith.constant 1.000000e+00 : f32
    %696 = vector.broadcast %cst_208 : f32 to vector<8x128xf32>
    %697 = arith.subf %696, %689 : vector<8x128xf32>
    %698 = arith.mulf %697, %695 : vector<8x128xf32>
    %699 = arith.mulf %689, %608 : vector<8x128xf32>
    %700 = arith.addf %698, %699 : vector<8x128xf32>
    %701 = vector.broadcast %c7_i32_201 : i32 to vector<8x128xi32>
    %702 = arith.cmpi sgt, %8, %701 : vector<8x128xi32>
    %703 = arith.index_cast %c7_i32_201 : i32 to index
    %c0_209 = arith.constant 0 : index
    %c0_210 = arith.constant 0 : index
    %704 = vector.load %arg9[%703, %c0_209, %c0_210] : memref<8x8x128xf32, #tpu.memory_space<vmem>>, vector<1x8x128xf32>
    %705 = vector.shape_cast %704 : vector<1x8x128xf32> to vector<8x128xf32>
    %cst_211 = arith.constant 5.000000e-01 : f32
    %706 = vector.broadcast %cst_211 : f32 to vector<8x128xf32>
    %707 = arith.mulf %706, %700 : vector<8x128xf32>
    %cst_212 = arith.constant 0.000000e+00 : f32
    %708 = vector.broadcast %cst_212 : f32 to vector<8x128xf32>
    %709 = arith.select %702, %707, %708 : vector<8x128xi1>, vector<8x128xf32>
    %710 = arith.addf %705, %709 : vector<8x128xf32>
    %711 = arith.index_cast %c7_i32_201 : i32 to index
    %c0_213 = arith.constant 0 : index
    %c0_214 = arith.constant 0 : index
    %712 = vector.load %arg9[%711, %c0_213, %c0_214] : memref<8x8x128xf32, #tpu.memory_space<vmem>>, vector<1x8x128xf32>
    %713 = vector.shape_cast %712 : vector<1x8x128xf32> to vector<8x128xf32>
    %714 = vector.shape_cast %710 : vector<8x128xf32> to vector<1x8x128xf32>
    tpu.vector_store %arg9[%711, %c0_213, %c0_214], %714 {strides = array<i32>} : memref<8x8x128xf32, #tpu.memory_space<vmem>>, vector<1x8x128xf32>,
    %715 = arith.index_cast %669 : i32 to index
    %c0_215 = arith.constant 0 : index
    %c0_216 = arith.constant 0 : index
    %716 = vector.load %arg11[%715, %c0_215, %c0_216] : memref<8x8x384xf32, #tpu.memory_space<vmem>>, vector<1x8x384xf32>
    %717 = vector.shape_cast %716 : vector<1x8x384xf32> to vector<8x384xf32>
    %cst_217 = arith.constant dense<0.000000e+00> : vector<8x384xf32>
    %718 = tpu.matmul %656, %1, %cst_217 {dimension_numbers = #tpu.dot_dimension_numbers<[1], [0], [0], [1], [0, 0, 1, 1], [], []>} : vector<8x128xf32>, vector<128x384xf32>, vector<8x384xf32> -> vector<8x384xf32>
    %719 = vector.extract_strided_slice %717 {offsets = [0, 0], sizes = [8, 128], strides = [1, 1]} : vector<8x384xf32> to vector<8x128xf32>
    %720 = vector.extract_strided_slice %718 {offsets = [0, 0], sizes = [8, 128], strides = [1, 1]} : vector<8x384xf32> to vector<8x128xf32>
    %721 = arith.addf %719, %720 : vector<8x128xf32>
    %722 = arith.negf %721 : vector<8x128xf32>
    %723 = math.exp %722 : vector<8x128xf32>
    %cst_218 = arith.constant 1.000000e+00 : f32
    %724 = vector.broadcast %cst_218 : f32 to vector<8x128xf32>
    %725 = arith.addf %724, %723 : vector<8x128xf32>
    %726 = arith.divf %724, %725 : vector<8x128xf32>
    %727 = vector.extract_strided_slice %717 {offsets = [0, 128], sizes = [8, 128], strides = [1, 1]} : vector<8x384xf32> to vector<8x128xf32>
    %728 = vector.extract_strided_slice %718 {offsets = [0, 128], sizes = [8, 128], strides = [1, 1]} : vector<8x384xf32> to vector<8x128xf32>
    %729 = arith.addf %727, %728 : vector<8x128xf32>
    %730 = arith.negf %729 : vector<8x128xf32>
    %731 = math.exp %730 : vector<8x128xf32>
    %cst_219 = arith.constant 1.000000e+00 : f32
    %732 = vector.broadcast %cst_219 : f32 to vector<8x128xf32>
    %733 = arith.addf %732, %731 : vector<8x128xf32>
    %734 = arith.divf %732, %733 : vector<8x128xf32>
    %735 = vector.extract_strided_slice %717 {offsets = [0, 256], sizes = [8, 128], strides = [1, 1]} : vector<8x384xf32> to vector<8x128xf32>
    %736 = vector.extract_strided_slice %718 {offsets = [0, 256], sizes = [8, 128], strides = [1, 1]} : vector<8x384xf32> to vector<8x128xf32>
    %737 = arith.addf %736, %7 : vector<8x128xf32>
    %738 = arith.mulf %726, %737 : vector<8x128xf32>
    %739 = arith.addf %735, %738 : vector<8x128xf32>
    %740 = math.tanh %739 : vector<8x128xf32>
    %cst_220 = arith.constant 1.000000e+00 : f32
    %741 = vector.broadcast %cst_220 : f32 to vector<8x128xf32>
    %742 = arith.subf %741, %734 : vector<8x128xf32>
    %743 = arith.mulf %742, %740 : vector<8x128xf32>
    %744 = arith.mulf %734, %656 : vector<8x128xf32>
    %745 = arith.addf %743, %744 : vector<8x128xf32>
    %746 = vector.broadcast %669 : i32 to vector<8x128xi32>
    %747 = arith.cmpi sgt, %8, %746 : vector<8x128xi32>
    %748 = arith.select %747, %745, %656 : vector<8x128xi1>, vector<8x128xf32>
    %749 = arith.index_cast %669 : i32 to index
    %c0_221 = arith.constant 0 : index
    %c0_222 = arith.constant 0 : index
    %750 = vector.load %arg9[%749, %c0_221, %c0_222] : memref<8x8x128xf32, #tpu.memory_space<vmem>>, vector<1x8x128xf32>
    %751 = vector.shape_cast %750 : vector<1x8x128xf32> to vector<8x128xf32>
    %cst_223 = arith.constant 5.000000e-01 : f32
    %752 = vector.broadcast %cst_223 : f32 to vector<8x128xf32>
    %753 = arith.mulf %752, %745 : vector<8x128xf32>
    %cst_224 = arith.constant 0.000000e+00 : f32
    %754 = vector.broadcast %cst_224 : f32 to vector<8x128xf32>
    %755 = arith.select %747, %753, %754 : vector<8x128xi1>, vector<8x128xf32>
    %756 = arith.addf %751, %755 : vector<8x128xf32>
    %757 = arith.index_cast %669 : i32 to index
    %c0_225 = arith.constant 0 : index
    %c0_226 = arith.constant 0 : index
    %758 = vector.load %arg9[%757, %c0_225, %c0_226] : memref<8x8x128xf32, #tpu.memory_space<vmem>>, vector<1x8x128xf32>
    %759 = vector.shape_cast %758 : vector<1x8x128xf32> to vector<8x128xf32>
    %760 = vector.shape_cast %756 : vector<8x128xf32> to vector<1x8x128xf32>
    tpu.vector_store %arg9[%757, %c0_225, %c0_226], %760 {strides = array<i32>} : memref<8x8x128xf32, #tpu.memory_space<vmem>>, vector<1x8x128xf32>,
    %c8_i32 = arith.constant 8 : i32
    return
  }
  func.func @transform_0(%arg0: i32) -> (i32, i32) {
    %c0_i32 = arith.constant 0 : i32
    %c0_i32_0 = arith.constant 0 : i32
    return %arg0, %c0_i32 : i32, i32
  }
  func.func @transform_1(%arg0: i32) -> (i32, i32, i32) {
    %c0_i32 = arith.constant 0 : i32
    %c0_i32_0 = arith.constant 0 : i32
    %c0_i32_1 = arith.constant 0 : i32
    return %c0_i32, %arg0, %c0_i32_0 : i32, i32, i32
  }
  func.func @transform_2(%arg0: i32) -> (i32, i32) {
    %c0_i32 = arith.constant 0 : i32
    %c0_i32_0 = arith.constant 0 : i32
    %c0_i32_1 = arith.constant 0 : i32
    return %c0_i32, %c0_i32_0 : i32, i32
  }
  func.func @transform_3(%arg0: i32) -> (i32, i32) {
    %c0_i32 = arith.constant 0 : i32
    %c0_i32_0 = arith.constant 0 : i32
    %c0_i32_1 = arith.constant 0 : i32
    return %c0_i32, %c0_i32_0 : i32, i32
  }
  func.func @transform_4(%arg0: i32) -> (i32, i32) {
    %c0_i32 = arith.constant 0 : i32
    %c0_i32_0 = arith.constant 0 : i32
    %c0_i32_1 = arith.constant 0 : i32
    return %c0_i32, %c0_i32_0 : i32, i32
  }
  func.func @transform_5(%arg0: i32) -> (i32, i32) {
    %c0_i32 = arith.constant 0 : i32
    %c0_i32_0 = arith.constant 0 : i32
    %c0_i32_1 = arith.constant 0 : i32
    return %c0_i32, %c0_i32_0 : i32, i32
  }
  func.func @transform_6(%arg0: i32) -> (i32, i32) {
    %c0_i32 = arith.constant 0 : i32
    %c0_i32_0 = arith.constant 0 : i32
    %c0_i32_1 = arith.constant 0 : i32
    return %c0_i32, %c0_i32_0 : i32, i32
  }
  func.func @transform_7(%arg0: i32) -> (i32, i32) {
    %c0_i32 = arith.constant 0 : i32
    %c0_i32_0 = arith.constant 0 : i32
    %c0_i32_1 = arith.constant 0 : i32
    return %c0_i32, %c0_i32_0 : i32, i32
  }
  func.func @transform_8(%arg0: i32) -> (i32, i32, i32) {
    %c0_i32 = arith.constant 0 : i32
    %c0_i32_0 = arith.constant 0 : i32
    %c0_i32_1 = arith.constant 0 : i32
    return %c0_i32, %arg0, %c0_i32_0 : i32, i32, i32
  }
}

</mosaic_0001>

<bundles_post_ra>
// kernel: tpu_custom_call.1
= control target key start
LH: loop header
LB: loop body
LE: loop exit
PB: predicated region body
PF: predicated region fallthrough
CT: control target
= control target key end

     0   :  { %13 = vsyncpa [#allocation5], 0  ;;  %s6906_s0 = inlined_call_operand.hbm [shape: s32[8,128], index: 0, kind: input, shape index: {}]   ;;  %s6907_s1 = inlined_call_operand.hbm [shape: f32[8,8,32], index: 1, kind: input, shape index: {}]   ;;  %s6908_s2 = inlined_call_operand.hbm [shape: f32[32,768], index: 2, kind: input, shape index: {}]   ;;  %s6909_s3 = inlined_call_operand.vmem [shape: f32[1,768], index: 3, kind: input, shape index: {}]   ;;  %s6910_s4 = inlined_call_operand.hbm [shape: f32[128,384], index: 4, kind: input, shape index: {}]   ;;  %s6911_s5 = inlined_call_operand.vmem [shape: f32[1,128], index: 5, kind: input, shape index: {}]   ;;  %s6912_s6 = inlined_call_operand.hbm [shape: f32[128,384], index: 6, kind: input, shape index: {}]   ;;  %s6913_s7 = inlined_call_operand.vmem [shape: f32[1,128], index: 7, kind: input, shape index: {}]   ;;  %s6914_s8 = inlined_call_operand.hbm [shape: f32[8,8,128], index: 8, kind: output, shape index: {}]  }
   0x1   :  { %14 = vsyncpa [#allocation8], 0 }
   0x2   :  { %15 = vsyncpa [#allocation11], 0 }
   0x3   :  { %16 = vsyncpa [#allocation6], 0  ;;  %s5648_s27 = smov [#allocation7]   ;;  %s5508_s9 = scalar_lea.hbm %s6907_s1, 1024 }
   0x4   :  { %s32_s28 = sshll.u32 %s5648_s27, 4  ;;  %p5509_p0 = scmp.ne.s32.totalorder %s6907_s1, %s5508_s9  ;;  %s33_s28 = int_to_ptr.vmem [resolvable:$true] %s32_s28 }
   0x5   :  { %p5512_p1 = scmp.lt.u32.totalorder %s5508_s9, %s6907_s1 }
   0x7   :  { %p5514_p2 = pnand %p5512_p1, %p5509_p0 }
   0x9   :  { %5517 = shalt.err (!%p5514_p2)
}
   0xa   :  { %s5518_s14 = scalar_lea.vmem %s33_s28, 1024  ;;  %p5523_p4 = scmp.lt.s32.totalorder %s33_s28, %s33_s28 }
   0xb   :  { %p5519_p3 = scmp.ne.s32.totalorder %s33_s28, %s5518_s14  ;;  %p5524_p5 = scmp.lt.s32.totalorder %s5518_s14, %s5518_s14 }
   0xd   :  { %p5525_p6 = por %p5524_p5, %p5523_p4 }
   0xf   :  { %p5526_p7 = pnand %p5525_p6, %p5519_p3 }
  0x11   :  { %5529 = shalt.err (!%p5526_p7)
}
  0x12   :  { %s5649_s15 = smov 128   ;;  %s5650_s16 = smov 8  }
  0x13   :  { %38 = dma.hbm_to_vmem [thread:$0]  %s6907_s1, 1024, %s33_s28, [#allocation8], %s5649_s15, %s5649_s15, %s5650_s16  }
  0x14   :  { %s5651_s19 = smov [#allocation10]   ;;  %s5530_s23 = scalar_lea.hbm %s6910_s4, 6144 }
  0x15   :  { %s58_s20 = sshll.u32 %s5651_s19, 4  ;;  %p5531_p8 = scmp.ne.s32.totalorder %s6910_s4, %s5530_s23  ;;  %s59_s20 = int_to_ptr.vmem [resolvable:$true] %s58_s20 }
  0x16   :  { %p5534_p9 = scmp.lt.u32.totalorder %s5530_s23, %s6910_s4 }
  0x18   :  { %p5536_p10 = pnand %p5534_p9, %p5531_p8 }
  0x1a   :  { %5539 = shalt.err (!%p5536_p10)
}
  0x1b   :  { %s5540_s29 = scalar_lea.vmem %s59_s20, 6144  ;;  %p5545_p12 = scmp.lt.s32.totalorder %s59_s20, %s59_s20 }
  0x1c   :  { %p5541_p11 = scmp.ne.s32.totalorder %s59_s20, %s5540_s29  ;;  %p5546_p13 = scmp.lt.s32.totalorder %s5540_s29, %s5540_s29 }
  0x1e   :  { %p5547_p0 = por %p5546_p13, %p5545_p12 }
  0x20   :  { %p5548_p1 = pnand %p5547_p0, %p5541_p11 }
  0x22   :  { %5551 = shalt.err (!%p5548_p1)
}
  0x23   :  { %s5652_s1 = smov 384   ;;  %s5653_s28 = smov 24  }
  0x24   :  { %64 = dma.hbm_to_vmem [thread:$0]  %s6910_s4, 6144, %s59_s20, [#allocation11], %s5652_s1, %s5652_s1, %s5653_s28  }
  0x25   :  { %s5654_s10 = smov [#allocation4]   ;;  %s5655_s12 = smov [#allocation9]  }
  0x26   :  { %s23_s11 = sshll.u32 %s5654_s10, 4  ;;  %s44_s13 = sshll.u32 %s5655_s12, 4  ;;  %s24_s11 = int_to_ptr.vmem [resolvable:$true] %s23_s11  ;;  %s5738_s13 = int_to_ptr.vmem [resolvable:$true] %s44_s13 }
  0x27   :  { %s5552_s18 = scalar_lea.hbm %s6906_s0, 128 }
  0x28   :  { %p5553_p2 = scmp.ne.s32.totalorder %s6906_s0, %s5552_s18  ;;  %p5556_p3 = scmp.lt.u32.totalorder %s5552_s18, %s6906_s0 }
  0x2a   :  { %p5558_p4 = pnand %p5556_p3, %p5553_p2 }
  0x2c   :  { %5561 = shalt.err (!%p5558_p4)
}
  0x2d   :  { %s5562_s4 = scalar_lea.vmem %s24_s11, 128  ;;  %p5567_p6 = scmp.lt.s32.totalorder %s24_s11, %s24_s11 }
  0x2e   :  { %p5563_p5 = scmp.ne.s32.totalorder %s24_s11, %s5562_s4  ;;  %p5568_p7 = scmp.lt.s32.totalorder %s5562_s4, %s5562_s4 }
  0x30   :  { %p5569_p8 = por %p5568_p7, %p5567_p6 }
  0x32   :  { %p5570_p9 = pnand %p5569_p8, %p5563_p5 }
  0x34   :  { %5573 = shalt.err (!%p5570_p9)
}
  0x35   :  { %26 = dma.hbm_to_vmem [thread:$0]  %s6906_s0, 128, %s24_s11, [#allocation5]  }
  0x36   :  { %s5574_s27 = scalar_lea.hbm %s6908_s2, 3072 }
  0x37   :  { %p5575_p10 = scmp.ne.s32.totalorder %s6908_s2, %s5574_s27  ;;  %p5578_p11 = scmp.lt.u32.totalorder %s5574_s27, %s6908_s2 }
  0x39   :  { %p5580_p12 = pnand %p5578_p11, %p5575_p10 }
  0x3b   :  { %5583 = shalt.err (!%p5580_p12)
}
  0x3c   :  { %s5584_s12 = scalar_lea.vmem %s5738_s13, 3072  ;;  %p5589_p0 = scmp.lt.s32.totalorder %s5738_s13, %s5738_s13 }
  0x3d   :  { %p5585_p13 = scmp.ne.s32.totalorder %s5738_s13, %s5584_s12  ;;  %p5590_p1 = scmp.lt.s32.totalorder %s5584_s12, %s5584_s12 }
  0x3f   :  { %p5591_p2 = por %p5590_p1, %p5589_p0 }
  0x41   :  { %p5592_p3 = pnand %p5591_p2, %p5585_p13 }
  0x43   :  { %5595 = shalt.err (!%p5592_p3)
}
  0x44   :  { %s5656_s0 = smov 768   ;;  %s5657_s11 = smov 48  }
  0x45   :  { %50 = dma.hbm_to_vmem [thread:$0]  %s6908_s2, 3072, %s5738_s13, [#allocation8], %s5656_s0, %s5656_s0, %s5657_s11  }
  0x46   :  { %s5658_s18 = smov [#allocation12]   ;;  %s5596_s23 = scalar_lea.hbm %s6912_s6, 6144 }
  0x47   :  { %s72_s19 = sshll.u32 %s5658_s18, 4  ;;  %p5597_p4 = scmp.ne.s32.totalorder %s6912_s6, %s5596_s23  ;;  %s73_s19 = int_to_ptr.vmem [resolvable:$true] %s72_s19 }
  0x48   :  { %p5600_p5 = scmp.lt.u32.totalorder %s5596_s23, %s6912_s6 }
  0x4a   :  { %p5602_p6 = pnand %p5600_p5, %p5597_p4 }
  0x4c   :  { %5605 = shalt.err (!%p5602_p6)
}
  0x4d   :  { %s5606_s26 = scalar_lea.vmem %s73_s19, 6144  ;;  %p5611_p8 = scmp.lt.s32.totalorder %s73_s19, %s73_s19 }
  0x4e   :  { %p5607_p7 = scmp.ne.s32.totalorder %s73_s19, %s5606_s26  ;;  %p5612_p9 = scmp.lt.s32.totalorder %s5606_s26, %s5606_s26 }
  0x50   :  { %p5613_p10 = por %p5612_p9, %p5611_p8 }
  0x52   :  { %p5614_p11 = pnand %p5613_p10, %p5607_p7 }
  0x54   :  { %5617 = shalt.err (!%p5614_p11)
}
  0x55   :  { %78 = dma.hbm_to_vmem [thread:$0]  %s6912_s6, 6144, %s73_s19, [#allocation11], %s5652_s1, %s5652_s1, %s5653_s28  }
  0x56   :  { %5640 = dma.done.wait [#allocation5], 128  }
  0x57   :  { %5641 = vsyncadd [#allocation5], 4294967168 }
  0x58   :  { %5642 = dma.done.wait [#allocation8], 4096  }
  0x59   :  { %5643 = vsyncadd [#allocation8], 4294963200 }
  0x5a   :  { %5644 = dma.done.wait [#allocation11], 12288  }
  0x5b   :  { %5645 = vsyncadd [#allocation11], 4294955008  ;;  %v6915_v0 = vmov 0.0   ;;  %v216_v1 = vld [vmem:[#allocation9 + $0x8] sm:$0xff]  ;;  %v222_v2 = vld [vmem:[#allocation9 + $0x38] sm:$0xff]  ;;  %vm271_vm0 = vcmask 261120  }
  0x5c   :  { %360 = vmatprep.mubr.f32.mxu0 %v6915_v0  ;;  %384 = vmatprep.mubr.f32.mxu1 %v6915_v0  ;;  %v215_v3 = vld [vmem:[#allocation9] sm:$0xff]  ;;  %v4374_v4 = vpack.c.bf16 %v222_v2, %v216_v1  ;;  %v221_v5 = vld [vmem:[#allocation9 + $0x30] sm:$0xff]  ;;  %v228_v6 = vld [vmem:[#allocation9 + $0x68] sm:$0xff]  ;;  %v6917_v46 = vmov 0.0|0.0   ;;  %vm5661_vm1 = vmmov 0  }
  0x5d   :  { %v234_v7 = vld [vmem:[#allocation9 + $0x98] sm:$0xff]  ;;  %v4376_v8 = vpack.c.bf16 %v221_v5, %v215_v3  ;;  %v227_v10 = vld [vmem:[#allocation9 + $0x60] sm:$0xff]  ;;  %v233_v11 = vld [vmem:[#allocation9 + $0x90] sm:$0xff] }
  0x5e   :  { %v4378_v9 = vpack.c.bf16 %v234_v7, %v228_v6  ;;  %4375 = vmatprep.subr.bf16.mxu0 %v4374_v4  ;;  %5294 = vmatprep.subr.bf16.mxu1 %v4374_v4  ;;  %v218_v12 = vld [vmem:[#allocation9 + $0x18] sm:$0xff]  ;;  %v224_v13 = vld [vmem:[#allocation9 + $0x48] sm:$0xff]  ;;  %v4380_v14 = vpack.c.bf16 %v233_v11, %v227_v10  ;;  %v217_v17 = vld [vmem:[#allocation9 + $0x10] sm:$0xff] }
  0x5f   :  { %4377 = vmatpush1.bf16.msra.mxu0 %v4376_v8  ;;  %5296 = vmatpush1.bf16.msra.mxu1 %v4376_v8  ;;  %v220_v15 = vld [vmem:[#allocation9 + $0x28] sm:$0xff]  ;;  %v226_v16 = vld [vmem:[#allocation9 + $0x58] sm:$0xff]  ;;  %v4382_v18 = vpack.c.bf16 %v224_v13, %v218_v12  ;;  %v223_v20 = vld [vmem:[#allocation9 + $0x40] sm:$0xff] }
  0x60   :  { %4379 = vmatprep.subr.bf16.mxu0 %v4378_v9  ;;  %5295 = vmatprep.subr.bf16.mxu1 %v4378_v9  ;;  %v4390_v19 = vpack.c.bf16 %v226_v16, %v220_v15  ;;  %v219_v21 = vld [vmem:[#allocation9 + $0x20] sm:$0xff]  ;;  %v225_v22 = vld [vmem:[#allocation9 + $0x50] sm:$0xff]  ;;  %v230_v24 = vld [vmem:[#allocation9 + $0x78] sm:$0xff]  ;;  %v4384_v27 = vpack.c.bf16 %v223_v20, %v217_v17 }
  0x61   :  { %v5786_v23 = vld [vmem:[#allocation7] sm:$0xff]  ;;  %v236_v25 = vld [vmem:[#allocation9 + $0xa8] sm:$0xff]  ;;  %v4392_v28 = vpack.c.bf16 %v225_v22, %v219_v21  ;;  %v238_v30 = vld [vmem:[#allocation9 + $0xb8] sm:$0xff] }
  0x62   :  { %v5788_v26 = vld [vmem:[#allocation7 + $0x20] sm:$0xff]  ;;  %v232_v29 = vld [vmem:[#allocation9 + $0x88] sm:$0xff]  ;;  %v229_v31 = vld [vmem:[#allocation9 + $0x70] sm:$0xff]  ;;  %v4386_v32 = vpack.c.bf16 %v236_v25, %v230_v24 }
  0x63   :  { %4381 = vmatpush1.bf16.msra.mxu0 %v4380_v14  ;;  %5297 = vmatpush1.bf16.msra.mxu1 %v4380_v14  ;;  %v4394_v33 = vpack.c.bf16 %v238_v30, %v232_v29  ;;  %v235_v34 = vld [vmem:[#allocation9 + $0xa0] sm:$0xff]  ;;  %v237_v36 = vld [vmem:[#allocation9 + $0xb0] sm:$0xff]  ;;  %v97_v37 = vld [vmem:[#allocation10 + $0x8] sm:$0xff] }
  0x64   :  { %4383 = vmatprep.subr.bf16.mxu1 %v4382_v18  ;;  %4391 = vmatprep.subr.bf16.mxu0 %v4390_v19  ;;  %v231_v35 = vld [vmem:[#allocation9 + $0x80] sm:$0xff]  ;;  %v208_v39 = vld [vmem:[#allocation7 + $0x8] sm:$0xff]  ;;  %v4388_v41 = vpack.c.bf16 %v235_v34, %v229_v31  ;;  %v5805_v44 = vld [vmem:[#allocation7 + $0x10] sm:$0xff] }
  0x65   :  { %v100_v38 = vld [vmem:[#allocation10 + $0x20] sm:$0xff]  ;;  %v5794_v40 = vld [vmem:[#allocation7 + $0x28] sm:$0xff]  ;;  %v4396_v42 = vpack.c.bf16 %v237_v36, %v231_v35  ;;  %v5807_v45 = vld [vmem:[#allocation7 + $0x30] sm:$0xff] }
  0x66   :  { %3484 = vmatmul.mubr.msk.f32.vlgmr.msra.gmra.mrb[0].mxu0 %vm271_vm0, %v5786_v23  ;;  %3488 = vmatmul.mubr.msk.f32.vlgmr.msra.gmra.mrb[0].mxu1 %vm271_vm0, %v5788_v26  ;;  %v5798_v43 = vpack.c.bf16 %v100_v38, %v97_v37  ;;  %v5817_v47 = vld [vmem:[#allocation7 + $0x18] sm:$0xff]  ;;  %v98_v49 = vld [vmem:[#allocation10 + $0x10] sm:$0xff]  ;;  %v101_v50 = vld [vmem:[#allocation10 + $0x28] sm:$0xff] }
  0x67   :  { %4385 = vmatpush1.bf16.msra.mxu1 %v4384_v27  ;;  %4393 = vmatpush1.bf16.msra.mxu0 %v4392_v28  ;;  %v5819_v48 = vld [vmem:[#allocation7 + $0x38] sm:$0xff]  ;;  %v96_v51 = vld [vmem:[#allocation10] sm:$0xff]  ;;  %v106_v54 = vld [vmem:[#allocation10 + $0x50] sm:$0xff]  ;;  %v5827_v55 = vpack.c.bf16 %v101_v50, %v98_v49 }
  0x68   :  { %366 = vmatprep.mubr.f32.mxu0 %v6915_v0  ;;  %390 = vmatprep.mubr.f32.mxu1 %v6915_v0  ;;  %v99_v52 = vld [vmem:[#allocation10 + $0x18] sm:$0xff]  ;;  %v104_v57 = vld [vmem:[#allocation10 + $0x40] sm:$0xff]  ;;  %v102_v59 = vld [vmem:[#allocation10 + $0x30] sm:$0xff] }
  0x69   :  { %4387 = vmatprep.subr.bf16.mxu1 %v4386_v32  ;;  %4395 = vmatprep.subr.bf16.mxu0 %v4394_v33  ;;  %v103_v53 = vld [vmem:[#allocation10 + $0x38] sm:$0xff]  ;;  %v5829_v56 = vpack.c.bf16 %v99_v52, %v96_v51  ;;  %v105_v60 = vld [vmem:[#allocation10 + $0x48] sm:$0xff]  ;;  %v112_v63 = vld [vmem:[#allocation10 + $0x80] sm:$0xff] }
  0x6a   :  { %3485 = vmatmul.mubr.msk.f32.gmra.mrb[2].mxu0 %vm271_vm0, %v208_v39  ;;  %3489 = vmatmul.mubr.msk.f32.gmra.mrb[2].mxu1 %vm271_vm0, %v5794_v40  ;;  %v107_v58 = vld [vmem:[#allocation10 + $0x58] sm:$0xff]  ;;  %v5831_v61 = vpack.c.bf16 %v106_v54, %v103_v53  ;;  %v109_v62 = vld [vmem:[#allocation10 + $0x68] sm:$0xff]  ;;  %v5841_v2 = vpack.c.bf16 %v105_v60, %v102_v59  ;;  %v110_v3 = vld [vmem:[#allocation10 + $0x70] sm:$0xff] }
  0x6b   :  { %372 = vmatprep.mubr.f32.mxu0 %v6915_v0  ;;  %396 = vmatprep.mubr.f32.mxu1 %v6915_v0  ;;  %v5839_v1 = vpack.c.bf16 %v107_v58, %v104_v57  ;;  %v113_v4 = vld [vmem:[#allocation10 + $0x88] sm:$0xff]  ;;  %v108_v5 = vld [vmem:[#allocation10 + $0x60] sm:$0xff]  ;;  %v111_v6 = vld [vmem:[#allocation10 + $0x78] sm:$0xff]  ;;  %v5847_v7 = vpack.c.bf16 %v112_v63, %v109_v62 }
  0x6c   :  { %4389 = vmatpush1.bf16.msra.mxu1 %v4388_v41  ;;  %4397 = vmatpush1.bf16.msra.mxu0 %v4396_v42  ;;  %v115_v8 = vld [vmem:[#allocation10 + $0x98] sm:$0xff]  ;;  %v118_v9 = vld [vmem:[#allocation10 + $0xb0] sm:$0xff]  ;;  %v5853_v10 = vpack.c.bf16 %v113_v4, %v110_v3  ;;  %v5855_v11 = vpack.c.bf16 %v111_v6, %v108_v5  ;;  %v116_v12 = vld [vmem:[#allocation10 + $0xa0] sm:$0xff] }
  0x6d   :  { %4430 = vmatprep.subr.bf16.mxu1 %v6917_v46  ;;  %4399 = vmatprep.subr.bf16.mxu0 %v5798_v43  ;;  %v119_v13 = vld [vmem:[#allocation10 + $0xb8] sm:$0xff]  ;;  %v114_v14 = vld [vmem:[#allocation10 + $0x90] sm:$0xff]  ;;  %v117_v15 = vld [vmem:[#allocation10 + $0xa8] sm:$0xff]  ;;  %v5861_v16 = vpack.c.bf16 %v118_v9, %v115_v8 }
  0x6e   :  { %3486 = vmatmul.mubr.msk.f32.gmra.mrb[4].mxu0 %vm271_vm0, %v5805_v44  ;;  %3490 = vmatmul.mubr.msk.f32.gmra.mrb[4].mxu1 %vm271_vm0, %v5807_v45  ;;  %v121_v17 = vld [vmem:[#allocation10 + $0xc8] sm:$0xff]  ;;  %v124_v18 = vld [vmem:[#allocation10 + $0xe0] sm:$0xff]  ;;  %v5869_v19 = vpack.c.bf16 %v119_v13, %v116_v12  ;;  %v5871_v20 = vpack.c.bf16 %v117_v15, %v114_v14  ;;  %v122_v21 = vld [vmem:[#allocation10 + $0xd0] sm:$0xff] }
  0x6f   :  { %378 = vmatprep.mubr.f32.mxu0 %v6915_v0  ;;  %402 = vmatprep.mubr.f32.mxu1 %v6915_v0  ;;  %v125_v22 = vld [vmem:[#allocation10 + $0xe8] sm:$0xff]  ;;  %v123_v24 = vld [vmem:[#allocation10 + $0xd8] sm:$0xff]  ;;  %v5877_v25 = vpack.c.bf16 %v124_v18, %v121_v17  ;;  %v130_v28 = vld [vmem:[#allocation10 + $0x110] sm:$0xff] }
  0x70   :  { %v127_v27 = vld [vmem:[#allocation10 + $0xf8] sm:$0xff]  ;;  %v5885_v29 = vpack.c.bf16 %v125_v22, %v122_v21  ;;  %v128_v31 = vld [vmem:[#allocation10 + $0x100] sm:$0xff]  ;;  %v126_v33 = vld [vmem:[#allocation10 + $0xf0] sm:$0xff] }
  0x71   :  { %v131_v32 = vld [vmem:[#allocation10 + $0x118] sm:$0xff]  ;;  %v129_v34 = vld [vmem:[#allocation10 + $0x108] sm:$0xff]  ;;  %v5893_v35 = vpack.c.bf16 %v130_v28, %v127_v27  ;;  %v136_v37 = vld [vmem:[#allocation10 + $0x140] sm:$0xff] }
  0x72   :  { %3487 = vmatmul.mubr.msk.f32.gmra.mrb[6].mxu0 %vm271_vm0, %v5817_v47  ;;  %3491 = vmatmul.mubr.msk.f32.gmra.mrb[6].mxu1 %vm271_vm0, %v5819_v48  ;;  %6953 = vst [vmem:[#allocation18_spill] sm:$0xff] %v5885_v29  ;;  %v133_v36 = vld [vmem:[#allocation10 + $0x128] sm:$0xff]  ;;  %v5901_v38 = vpack.c.bf16 %v131_v32, %v128_v31  ;;  %v134_v41 = vld [vmem:[#allocation10 + $0x130] sm:$0xff]  ;;  %v139_v49 = vld [vmem:[#allocation10 + $0x158] sm:$0xff] }
  0x73   :  { %473 = vmatprep.mubr.f32.mxu1 %v6915_v0  ;;  %586 = vmatprep.mubr.f32.mxu0 %v6915_v0  ;;  %6954 = vst [vmem:[#allocation19_spill] sm:$0xff] %v5893_v35  ;;  %v137_v42 = vld [vmem:[#allocation10 + $0x148] sm:$0xff]  ;;  %v142_v50 = vld [vmem:[#allocation10 + $0x170] sm:$0xff]  ;;  %v140_v53 = vld [vmem:[#allocation10 + $0x160] sm:$0xff] }
  0x74   :  { %6955 = vst [vmem:[#allocation20_spill] sm:$0xff] %v5901_v38  ;;  %v5917_v51 = vpack.c.bf16 %v137_v42, %v134_v41  ;;  %v143_v54 = vld [vmem:[#allocation10 + $0x178] sm:$0xff]  ;;  %v138_v57 = vld [vmem:[#allocation10 + $0x150] sm:$0xff]  ;;  %v141_v58 = vld [vmem:[#allocation10 + $0x168] sm:$0xff] }
  0x75   :  { %v145_v59 = vld [vmem:[#allocation12 + $0x8] sm:$0xff]  ;;  %v148_v60 = vld [vmem:[#allocation12 + $0x20] sm:$0xff]  ;;  %v5933_v62 = vpack.c.bf16 %v143_v54, %v140_v53  ;;  %v5935_v63 = vpack.c.bf16 %v141_v58, %v138_v57  ;;  %v147_v4 = vld [vmem:[#allocation12 + $0x18] sm:$0xff] }
  0x76   :  { %3492 = vmatmul.mubr.msk.f32.vlgmr.msra.gmra.mrb[8].mxu1 %vm271_vm0, %v5786_v23  ;;  %3500 = vmatmul.mubr.msk.f32.vlgmr.msra.gmra.mrb[8].mxu0 %vm271_vm0, %v5786_v23  ;;  %v120_v23 = vld [vmem:[#allocation10 + $0xc0] sm:$0xff]  ;;  %6958 = vst [vmem:[#allocation23_spill] sm:$0xff] %v5917_v51  ;;  %v146_v5 = vld [vmem:[#allocation12 + $0x10] sm:$0xff]  ;;  %v149_v6 = vld [vmem:[#allocation12 + $0x28] sm:$0xff] }
  0x77   :  { %4432 = vmatpush3.bf16.msra.mxu1 %v5827_v55  ;;  %4401 = vmatpush1.bf16.msra.mxu0 %v5829_v56  ;;  %v5887_v30 = vpack.c.bf16 %v123_v24, %v120_v23  ;;  %6961 = vst [vmem:[#allocation26_spill] sm:$0xff] %v5933_v62  ;;  %6962 = vst [vmem:[#allocation27_spill] sm:$0xff] %v5935_v63  ;;  %v144_v3 = vld [vmem:[#allocation12] sm:$0xff]  ;;  %v151_v8 = vld [vmem:[#allocation12 + $0x38] sm:$0xff]  ;;  %v5951_v14 = vpack.c.bf16 %v149_v6, %v146_v5 }
  0x78   :  { %479 = vmatprep.mubr.f32.mxu1 %v6915_v0  ;;  %592 = vmatprep.mubr.f32.mxu0 %v6915_v0  ;;  %v154_v9 = vld [vmem:[#allocation12 + $0x50] sm:$0xff]  ;;  %v5949_v12 = vpack.c.bf16 %v147_v4, %v144_v3  ;;  %v153_v17 = vld [vmem:[#allocation12 + $0x48] sm:$0xff]  ;;  %v152_v18 = vld [vmem:[#allocation12 + $0x40] sm:$0xff] }
  0x79   :  { %4433 = vmatprep.subr.bf16.mxu1 %v6917_v46  ;;  %4403 = vmatprep.subr.bf16.mxu0 %v5831_v61  ;;  %v150_v13 = vld [vmem:[#allocation12 + $0x30] sm:$0xff]  ;;  %v5956_v15 = vpack.c.bf16 %v154_v9, %v151_v8  ;;  %v157_v21 = vld [vmem:[#allocation12 + $0x68] sm:$0xff]  ;;  %v160_v22 = vld [vmem:[#allocation12 + $0x80] sm:$0xff] }
  0x7a   :  { %3493 = vmatmul.mubr.msk.f32.gmra.mrb[10].mxu1 %vm271_vm0, %v208_v39  ;;  %3501 = vmatmul.mubr.msk.f32.gmra.mrb[10].mxu0 %vm271_vm0, %v208_v39  ;;  %v5903_v39 = vpack.c.bf16 %v129_v34, %v126_v33  ;;  %v5963_v23 = vpack.c.bf16 %v153_v17, %v150_v13  ;;  %v156_v24 = vld [vmem:[#allocation12 + $0x60] sm:$0xff]  ;;  %v5969_v28 = vpack.c.bf16 %v160_v22, %v157_v21  ;;  %v159_v31 = vld [vmem:[#allocation12 + $0x78] sm:$0xff]  ;;  %v158_v32 = vld [vmem:[#allocation12 + $0x70] sm:$0xff] }
  0x7b   :  { %4435 = vmatpush3.bf16.msra.mxu1 %v5839_v1  ;;  %4405 = vmatpush1.bf16.msra.mxu0 %v5841_v2  ;;  %v161_v33 = vld [vmem:[#allocation12 + $0x88] sm:$0xff]  ;;  %v163_v34 = vld [vmem:[#allocation12 + $0x98] sm:$0xff]  ;;  %v162_v41 = vld [vmem:[#allocation12 + $0x90] sm:$0xff] }
  0x7c   :  { %485 = vmatprep.mubr.f32.mxu1 %v6915_v0  ;;  %598 = vmatprep.mubr.f32.mxu0 %v6915_v0  ;;  %6956 = vst [vmem:[#allocation21_spill] sm:$0xff] %v5903_v39  ;;  %v5979_v42 = vpack.c.bf16 %v161_v33, %v158_v32  ;;  %v169_v53 = vld [vmem:[#allocation12 + $0xc8] sm:$0xff]  ;;  %v172_v54 = vld [vmem:[#allocation12 + $0xe0] sm:$0xff]  ;;  %v171_v3 = vld [vmem:[#allocation12 + $0xd8] sm:$0xff] }
  0x7d   :  { %4436 = vmatprep.subr.bf16.mxu1 %v6917_v46  ;;  %4407 = vmatprep.subr.bf16.mxu0 %v5847_v7  ;;  %v168_v58 = vld [vmem:[#allocation12 + $0xc0] sm:$0xff]  ;;  %v170_v4 = vld [vmem:[#allocation12 + $0xd0] sm:$0xff]  ;;  %v173_v5 = vld [vmem:[#allocation12 + $0xe8] sm:$0xff] }
  0x7e   :  { %3494 = vmatmul.mubr.msk.f32.gmra.mrb[12].mxu1 %vm271_vm0, %v5805_v44  ;;  %3502 = vmatmul.mubr.msk.f32.gmra.mrb[12].mxu0 %vm271_vm0, %v5805_v44  ;;  %v132_v44 = vld [vmem:[#allocation10 + $0x120] sm:$0xff]  ;;  %v175_v6 = vld [vmem:[#allocation12 + $0xf8] sm:$0xff]  ;;  %v178_v8 = vld [vmem:[#allocation12 + $0x110] sm:$0xff]  ;;  %v5996_v9 = vpack.c.bf16 %v171_v3, %v168_v58  ;;  %v5999_v17 = vpack.c.bf16 %v173_v5, %v170_v4 }
  0x7f   :  { %4438 = vmatpush3.bf16.msra.mxu1 %v5853_v10  ;;  %4409 = vmatpush1.bf16.msra.mxu0 %v5855_v11  ;;  %v174_v13 = vld [vmem:[#allocation12 + $0xf0] sm:$0xff]  ;;  %v176_v21 = vld [vmem:[#allocation12 + $0x100] sm:$0xff]  ;;  %v179_v22 = vld [vmem:[#allocation12 + $0x118] sm:$0xff] }
  0x80   :  { %491 = vmatprep.mubr.f32.mxu1 %v6915_v0  ;;  %604 = vmatprep.mubr.f32.mxu0 %v6915_v0  ;;  %v180_v33 = vld [vmem:[#allocation12 + $0x120] sm:$0xff]  ;;  %v186_v58 = vld [vmem:[#allocation12 + $0x150] sm:$0xff]  ;;  %v189_v5 = vld [vmem:[#allocation12 + $0x168] sm:$0xff] }
  0x81   :  { %4439 = vmatprep.subr.bf16.mxu1 %v6917_v46  ;;  %4411 = vmatprep.subr.bf16.mxu0 %v5861_v16 }
  0x82   :  { %3495 = vmatmul.mubr.msk.f32.gmra.mrb[14].mxu1 %vm271_vm0, %v5817_v47  ;;  %3503 = vmatmul.mubr.msk.f32.gmra.mrb[14].mxu0 %vm271_vm0, %v5817_v47  ;;  %v135_v47 = vld [vmem:[#allocation10 + $0x138] sm:$0xff] }
  0x83   :  { %4441 = vmatpush3.bf16.msra.mxu1 %v5869_v19  ;;  %4413 = vmatpush1.bf16.msra.mxu0 %v5871_v20  ;;  %v5919_v52 = vpack.c.bf16 %v135_v47, %v132_v44  ;;  %v165_v47 = vld [vmem:[#allocation12 + $0xa8] sm:$0xff] }
  0x84   :  { %497 = vmatprep.mubr.f32.mxu1 %v6915_v0  ;;  %610 = vmatprep.mubr.f32.mxu0 %v6915_v0  ;;  %v5986_v57 = vpack.c.bf16 %v165_v47, %v162_v41  ;;  %v183_v41 = vld [vmem:[#allocation12 + $0x138] sm:$0xff]  ;;  %v182_v47 = vld [vmem:[#allocation12 + $0x130] sm:$0xff] }
  0x85   :  { %4442 = vmatprep.subr.bf16.mxu1 %v6917_v46  ;;  %4415 = vmatprep.subr.bf16.mxu0 %v5877_v25  ;;  %6959 = vst [vmem:[#allocation24_spill] sm:$0xff] %v5919_v52 }
  0x86   :  { %3496 = vmatmul.mubr.msk.f32.gmra.mrb[16].mxu1 %vm271_vm0, %v5788_v26  ;;  %3504 = vmatmul.mubr.msk.f32.gmra.mrb[16].mxu0 %vm271_vm0, %v5788_v26  ;;  %v5909_v26 = vpack.c.bf16 %v136_v37, %v133_v36  ;;  %v166_v36 = vld [vmem:[#allocation12 + $0xb0] sm:$0xff]  ;;  %v5976_v37 = vpack.c.bf16 %v159_v31, %v156_v24  ;;  %v181_v24 = vld [vmem:[#allocation12 + $0x128] sm:$0xff]  ;;  %v184_v31 = vld [vmem:[#allocation12 + $0x140] sm:$0xff] }
  0x87   :  { %4444 = vmatpush3.bf16.msra.mxu1 %v5885_v29  ;;  %4417 = vmatpush1.bf16.msra.mxu0 %v5887_v30  ;;  %v5982_v44 = vpack.c.bf16 %v166_v36, %v163_v34  ;;  %v6009_v34 = vpack.c.bf16 %v179_v22, %v176_v21  ;;  %v6012_v36 = vpack.c.bf16 %v184_v31, %v181_v24  ;;  %v241_v24 = vlaneseq }
  0x88   :  { %503 = vmatprep.mubr.f32.mxu1 %v6915_v0  ;;  %616 = vmatprep.mubr.f32.mxu0 %v6915_v0  ;;  %6957 = vst [vmem:[#allocation22_spill] sm:$0xff] %v5909_v26 }
  0x89   :  { %4445 = vmatprep.subr.bf16.mxu1 %v6917_v46  ;;  %4419 = vmatprep.subr.bf16.mxu0 %v5893_v35 }
  0x8a   :  { %3497 = vmatmul.mubr.msk.f32.gmra.mrb[18].mxu1 %vm271_vm0, %v5794_v40  ;;  %3505 = vmatmul.mubr.msk.f32.gmra.mrb[18].mxu0 %vm271_vm0, %v5794_v40  ;;  %v5925_v40 = vpack.c.bf16 %v142_v50, %v139_v49  ;;  %v164_v49 = vld [vmem:[#allocation12 + $0xa0] sm:$0xff]  ;;  %v167_v50 = vld [vmem:[#allocation12 + $0xb8] sm:$0xff] }
  0x8b   :  { %4447 = vmatpush3.bf16.msra.mxu1 %v5901_v38  ;;  %4421 = vmatpush1.bf16.msra.mxu0 %v5903_v39 }
  0x8c   :  { %509 = vmatprep.mubr.f32.mxu1 %v6915_v0  ;;  %622 = vmatprep.mubr.f32.mxu0 %v6915_v0  ;;  %6960 = vst [vmem:[#allocation25_spill] sm:$0xff] %v5925_v40 }
  0x8d   :  { %4448 = vmatprep.subr.bf16.mxu1 %v6917_v46  ;;  %4423 = vmatprep.subr.bf16.mxu0 %v5909_v26 }
  0x8e   :  { %3498 = vmatmul.mubr.msk.f32.gmra.mrb[20].mxu1 %vm271_vm0, %v5807_v45  ;;  %3506 = vmatmul.mubr.msk.f32.gmra.mrb[20].mxu0 %vm271_vm0, %v5807_v45  ;;  %v5941_v45 = vpack.c.bf16 %v148_v60, %v145_v59  ;;  %v5989_v59 = vpack.c.bf16 %v167_v50, %v164_v49  ;;  %v5992_v60 = vpack.c.bf16 %v172_v54, %v169_v53  ;;  %v185_v49 = vld [vmem:[#allocation12 + $0x148] sm:$0xff]  ;;  %v187_v50 = vld [vmem:[#allocation12 + $0x158] sm:$0xff]  ;;  %v190_v53 = vld [vmem:[#allocation12 + $0x170] sm:$0xff] }
  0x8f   :  { %4450 = vmatpush3.bf16.msra.mxu1 %v5917_v51  ;;  %4425 = vmatpush1.bf16.msra.mxu0 %v5919_v52  ;;  %v6016_v54 = vpack.c.bf16 %v183_v41, %v180_v33  ;;  %v6019_v3 = vpack.c.bf16 %v185_v49, %v182_v47  ;;  %v6022_v4 = vpack.c.bf16 %v190_v53, %v187_v50  ;;  %v6082_v41 = vshrl.u32 %v241_v24, 7 }
  0x90   :  { %515 = vmatprep.mubr.f32.mxu1 %v6915_v0  ;;  %628 = vmatprep.mubr.f32.mxu0 %v6915_v0  ;;  %6963 = vst [vmem:[#allocation28_spill] sm:$0xff] %v5941_v45 }
  0x91   :  { %4451 = vmatprep.subr.bf16.mxu1 %v6917_v46  ;;  %4427 = vmatprep.subr.bf16.mxu0 %v5925_v40  ;;  %v259_v50 = vsub.s32 4, %v6082_v41  ;;  %v255_v53 = vsub.s32 3, %v6082_v41 }
  0x92   :  { %3499 = vmatmul.mubr.msk.f32.gmra.mrb[22].mxu1 %vm271_vm0, %v5819_v48  ;;  %3507 = vmatmul.mubr.msk.f32.gmra.mrb[22].mxu0 %vm271_vm0, %v5819_v48  ;;  %v155_v48 = vld [vmem:[#allocation12 + $0x58] sm:$0xff] }
  0x93   :  { %4453 = vmatpush3.bf16.msra.mxu1 %v5933_v62  ;;  %4429 = vmatpush1.bf16.msra.mxu0 %v5935_v63  ;;  %v5966_v27 = vpack.c.bf16 %v155_v48, %v152_v18  ;;  %v6002_v18 = vpack.c.bf16 %v178_v8, %v175_v6  ;;  %v177_v48 = vld [vmem:[#allocation12 + $0x108] sm:$0xff]  ;;  %v188_v6 = vld [vmem:[#allocation12 + $0x160] sm:$0xff]  ;;  %v191_v8 = vld [vmem:[#allocation12 + $0x178] sm:$0xff] }
  0x94   :  { %758 = vmatprep.mubr.f32.mxu0 %v6915_v0  ;;  %3846 = vmatprep.mubr.msk.f32.mxu1 %vm5661_vm1, %v6915_v0  ;;  %v6006_v32 = vpack.c.bf16 %v177_v48, %v174_v13  ;;  %v6026_v13 = vpack.c.bf16 %v189_v5, %v186_v58  ;;  %v6029_v48 = vpack.c.bf16 %v191_v8, %v188_v6  ;;  %v263_v58 = vsub.s32 5, %v6082_v41  ;;  %v6094_v5 = vld [vmem:[%s6909_s3] sm:$0x3f] }
  0x95   :  { %4455 = vmatprep.subr.bf16.mxu1 %v5941_v45  ;;  %4486 = vmatprep.subr.bf16.mxu0 %v6917_v46  ;;  %v6101_v24 = vrot.slane %v6094_v5, %v259_v50 }
  0x96   :  { %759 = vmatmul.mubr.f32.vlgmr.msra.gmra.mrb[0].mxu0 %v6915_v0  ;;  %3847 = vmatmul.mubr.f32.vlgmr.msra.gmra.mrb[24].mxu1 %v6915_v0 }
  0x97   :  { %4457 = vmatpush1.bf16.msra.mxu1 %v5949_v12  ;;  %4488 = vmatpush3.bf16.msra.mxu0 %v5951_v14 }
  0x98   :  { %4459 = vmatprep.subr.bf16.mxu1 %v5956_v15  ;;  %4489 = vmatprep.subr.bf16.mxu0 %v6917_v46 }
  0x99   :  { %931 = vmatprep.mubr.f32.mxu1 %v6915_v0  ;;  %3881 = vmatprep.mubr.msk.f32.mxu0 %vm5661_vm1, %v6915_v0 }
  0x9b   :  { %4461 = vmatpush1.bf16.msra.mxu1 %v5963_v23  ;;  %4491 = vmatpush3.bf16.msra.mxu0 %v5966_v27 }
  0x9c   :  { %4463 = vmatprep.subr.bf16.mxu1 %v5969_v28  ;;  %4492 = vmatprep.subr.bf16.mxu0 %v6917_v46 }
  0x9f   :  { %4465 = vmatpush1.bf16.msra.mxu1 %v5976_v37  ;;  %4494 = vmatpush3.bf16.msra.mxu0 %v5979_v42 }
  0xa0   :  { %4467 = vmatprep.subr.bf16.mxu1 %v5982_v44  ;;  %4495 = vmatprep.subr.bf16.mxu0 %v6917_v46 }
  0xa3   :  { %4469 = vmatpush1.bf16.msra.mxu1 %v5986_v57  ;;  %4497 = vmatpush3.bf16.msra.mxu0 %v5989_v59 }
  0xa4   :  { %4471 = vmatprep.subr.bf16.mxu1 %v5992_v60  ;;  %4498 = vmatprep.subr.bf16.mxu0 %v6917_v46 }
  0xa7   :  { %4473 = vmatpush1.bf16.msra.mxu1 %v5996_v9  ;;  %4500 = vmatpush3.bf16.msra.mxu0 %v5999_v17 }
  0xa8   :  { %4475 = vmatprep.subr.bf16.mxu1 %v6002_v18  ;;  %4501 = vmatprep.subr.bf16.mxu0 %v6917_v46 }
  0xab   :  { %4477 = vmatpush1.bf16.msra.mxu1 %v6006_v32  ;;  %4503 = vmatpush3.bf16.msra.mxu0 %v6009_v34 }
  0xac   :  { %4479 = vmatprep.subr.bf16.mxu1 %v6012_v36  ;;  %4504 = vmatprep.subr.bf16.mxu0 %v6917_v46 }
  0xaf   :  { %4481 = vmatpush1.bf16.msra.mxu1 %v6016_v54  ;;  %4506 = vmatpush3.bf16.msra.mxu0 %v6019_v3 }
  0xb0   :  { %4483 = vmatprep.subr.bf16.mxu1 %v6022_v4  ;;  %4507 = vmatprep.subr.bf16.mxu0 %v6917_v46 }
  0xb3   :  { %4485 = vmatpush1.bf16.msra.mxu1 %v6026_v13  ;;  %4509 = vmatpush3.bf16.msra.mxu0 %v6029_v48 }
  0xb4   :  { %4511 = vmatprep.subr.bf16.mxu0 %v5798_v43  ;;  %4542 = vmatprep.subr.bf16.mxu1 %v6917_v46 }
  0xb6   :  { %932 = vmatmul.mubr.f32.vlgmr.msra.gmra.mrb[26].mxu1 %v6915_v0  ;;  %3882 = vmatmul.mubr.f32.vlgmr.msra.gmra.mrb[24].mxu0 %v6915_v0 }
  0xb7   :  { %4513 = vmatpush1.bf16.msra.mxu0 %v5829_v56  ;;  %4544 = vmatpush3.bf16.msra.mxu1 %v5827_v55 }
  0xb8   :  { %4515 = vmatprep.subr.bf16.mxu0 %v5831_v61  ;;  %4545 = vmatprep.subr.bf16.mxu1 %v6917_v46 }
  0xb9   :  { %1106 = vmatprep.mubr.f32.mxu0 %v6915_v0  ;;  %3916 = vmatprep.mubr.msk.f32.mxu1 %vm5661_vm1, %v6915_v0  ;;  %v6104_v0 = vrot.slane %v6094_v5, %v255_v53 }
  0xbb   :  { %4517 = vmatpush1.bf16.msra.mxu0 %v5841_v2  ;;  %4547 = vmatpush3.bf16.msra.mxu1 %v5839_v1 }
  0xbc   :  { %4519 = vmatprep.subr.bf16.mxu0 %v5847_v7  ;;  %4548 = vmatprep.subr.bf16.mxu1 %v6917_v46 }
  0xbf   :  { %4521 = vmatpush1.bf16.msra.mxu0 %v5855_v11  ;;  %4550 = vmatpush3.bf16.msra.mxu1 %v5853_v10 }
  0xc0   :  { %4523 = vmatprep.subr.bf16.mxu0 %v5861_v16  ;;  %4551 = vmatprep.subr.bf16.mxu1 %v6917_v46 }
  0xc3   :  { %4525 = vmatpush1.bf16.msra.mxu0 %v5871_v20  ;;  %4553 = vmatpush3.bf16.msra.mxu1 %v5869_v19 }
  0xc4   :  { %4527 = vmatprep.subr.bf16.mxu0 %v5877_v25  ;;  %4554 = vmatprep.subr.bf16.mxu1 %v6917_v46 }
  0xc7   :  { %4529 = vmatpush1.bf16.msra.mxu0 %v5887_v30  ;;  %4556 = vmatpush3.bf16.msra.mxu1 %v5885_v29 }
  0xc8   :  { %4531 = vmatprep.subr.bf16.mxu0 %v5893_v35  ;;  %4557 = vmatprep.subr.bf16.mxu1 %v6917_v46 }
  0xcb   :  { %4533 = vmatpush1.bf16.msra.mxu0 %v5903_v39  ;;  %4559 = vmatpush3.bf16.msra.mxu1 %v5901_v38  ;;  %v6214_v38 = vld [vmem:[%s6911_s5] ss:$0 sm:$0xff] }
  0xcc   :  { %4535 = vmatprep.subr.bf16.mxu0 %v5909_v26  ;;  %4560 = vmatprep.subr.bf16.mxu1 %v6917_v46  ;;  %7002 = vst [vmem:[#allocation67_spill] sm:$0xff] %v6214_v38 }
  0xcf   :  { %4537 = vmatpush1.bf16.msra.mxu0 %v5919_v52  ;;  %4562 = vmatpush3.bf16.msra.mxu1 %v5917_v51 }
  0xd0   :  { %4539 = vmatprep.subr.bf16.mxu0 %v5925_v40  ;;  %4563 = vmatprep.subr.bf16.mxu1 %v6917_v46 }
  0xd3   :  { %4541 = vmatpush1.bf16.msra.mxu0 %v5935_v63  ;;  %4565 = vmatpush3.bf16.msra.mxu1 %v5933_v62 }
  0xd4   :  { %4567 = vmatprep.subr.bf16.mxu1 %v5941_v45  ;;  %4598 = vmatprep.subr.bf16.mxu0 %v6917_v46  ;;  %v6107_v46 = vrot.slane %v6094_v5, %v263_v58 }
 0x139   :  { %v6074_v21 = vpop.f32.mrb[0].mxu1 }
 0x13a   :  { %6964 = vst [vmem:[#allocation29_spill] sm:$0xff] %v6074_v21  ;;  %v6076_v22 = vpop.f32.mrb[1].mxu1 }
 0x13b   :  { %6965 = vst [vmem:[#allocation30_spill] sm:$0xff] %v6076_v22 }
 0x13d   :  { %v6078_v31 = vpop.f32.mrb[2].mxu1 }
 0x13e   :  { %6966 = vst [vmem:[#allocation31_spill] sm:$0xff] %v6078_v31  ;;  %v6080_v33 = vpop.f32.mrb[3].mxu1 }
 0x13f   :  { %6967 = vst [vmem:[#allocation32_spill] sm:$0xff] %v6080_v33 }
 0x141   :  { %v6084_v47 = vpop.f32.mrb[4].mxu1 }
 0x142   :  { %6968 = vst [vmem:[#allocation33_spill] sm:$0xff] %v6084_v47  ;;  %v6086_v49 = vpop.f32.mrb[5].mxu1 }
 0x143   :  { %6969 = vst [vmem:[#allocation34_spill] sm:$0xff] %v6086_v49  ;;  %v251_v49 = vsub.s32 2, %v6082_v41 }
 0x145   :  { %v6096_v6 = vpop.f32.mrb[6].mxu1  ;;  %v6122_v53 = vrot.slane %v6094_v5, %v251_v49 }
 0x146   :  { %6970 = vst [vmem:[#allocation35_spill] sm:$0xff] %v6096_v6  ;;  %v6098_v8 = vpop.f32.mrb[7].mxu1 }
 0x147   :  { %6971 = vst [vmem:[#allocation36_spill] sm:$0xff] %v6098_v8 }
 0x149   :  { %v6110_v47 = vpop.f32.mrb[8].mxu1  ;;  %v588_v33 = vpop.f32.mrb[8].mxu0 }
 0x14a   :  { %v6113_v31 = vadd.f32 %v588_v33, %v6101_v24  ;;  %v477_v6 = vpop.f32.mrb[9].mxu1  ;;  %v590_v22 = vpop.f32.mrb[9].mxu0 }
 0x14b   :  { %v6116_v8 = vadd.f32 %v477_v6, %v6104_v0  ;;  %v6119_v50 = vadd.f32 %v590_v22, %v6107_v46 }
 0x14c   :  { %6972 = vst [vmem:[#allocation37_spill] sm:$0xff] %v6113_v31 }
 0x14d   :  { %6973 = vst [vmem:[#allocation38_spill] sm:$0xff] %v6116_v8  ;;  %6974 = vst [vmem:[#allocation39_spill] sm:$0xff] %v6119_v50  ;;  %v481_v58 = vpop.f32.mrb[10].mxu1  ;;  %v594_v21 = vpop.f32.mrb[10].mxu0 }
 0x14e   :  { %v6125_v45 = vadd.f32 %v481_v58, %v6122_v53  ;;  %v6128_v62 = vadd.f32 %v594_v21, %v6101_v24  ;;  %v483_v33 = vpop.f32.mrb[11].mxu1  ;;  %v596_v31 = vpop.f32.mrb[11].mxu0 }
 0x14f   :  { %v6131_v63 = vadd.f32 %v483_v33, %v6104_v0  ;;  %v6134_v6 = vadd.f32 %v596_v31, %v6107_v46 }
 0x150   :  { %6975 = vst [vmem:[#allocation40_spill] sm:$0xff] %v6125_v45  ;;  %6976 = vst [vmem:[#allocation41_spill] sm:$0xff] %v6128_v62 }
 0x151   :  { %6977 = vst [vmem:[#allocation42_spill] sm:$0xff] %v6131_v63  ;;  %6978 = vst [vmem:[#allocation43_spill] sm:$0xff] %v6134_v6  ;;  %v487_v22 = vpop.f32.mrb[12].mxu1  ;;  %v600_v50 = vpop.f32.mrb[12].mxu0 }
 0x152   :  { %v6137_v49 = vadd.f32 %v487_v22, %v6122_v53  ;;  %v6140_v8 = vadd.f32 %v600_v50, %v6101_v24  ;;  %v489_v58 = vpop.f32.mrb[13].mxu1  ;;  %v602_v45 = vpop.f32.mrb[13].mxu0 }
 0x153   :  { %v6143_v21 = vadd.f32 %v489_v58, %v6104_v0  ;;  %v6146_v62 = vadd.f32 %v602_v45, %v6107_v46 }
 0x154   :  { %6979 = vst [vmem:[#allocation44_spill] sm:$0xff] %v6137_v49  ;;  %6980 = vst [vmem:[#allocation45_spill] sm:$0xff] %v6140_v8 }
 0x155   :  { %6981 = vst [vmem:[#allocation46_spill] sm:$0xff] %v6143_v21  ;;  %6982 = vst [vmem:[#allocation47_spill] sm:$0xff] %v6146_v62  ;;  %v493_v33 = vpop.f32.mrb[14].mxu1  ;;  %v606_v63 = vpop.f32.mrb[14].mxu0 }
 0x156   :  { %v6149_v31 = vadd.f32 %v493_v33, %v6122_v53  ;;  %v6152_v6 = vadd.f32 %v606_v63, %v6101_v24  ;;  %v495_v22 = vpop.f32.mrb[15].mxu1  ;;  %v608_v49 = vpop.f32.mrb[15].mxu0 }
 0x157   :  { %v6155_v50 = vadd.f32 %v495_v22, %v6104_v0  ;;  %v6158_v8 = vadd.f32 %v608_v49, %v6107_v46 }
 0x158   :  { %6983 = vst [vmem:[#allocation48_spill] sm:$0xff] %v6149_v31  ;;  %6984 = vst [vmem:[#allocation49_spill] sm:$0xff] %v6152_v6 }
 0x159   :  { %6985 = vst [vmem:[#allocation50_spill] sm:$0xff] %v6155_v50  ;;  %6986 = vst [vmem:[#allocation51_spill] sm:$0xff] %v6158_v8  ;;  %v499_v58 = vpop.f32.mrb[16].mxu1  ;;  %v612_v21 = vpop.f32.mrb[16].mxu0 }
 0x15a   :  { %v6161_v45 = vadd.f32 %v499_v58, %v6122_v53  ;;  %v6164_v62 = vadd.f32 %v612_v21, %v6101_v24  ;;  %v501_v33 = vpop.f32.mrb[17].mxu1  ;;  %v614_v31 = vpop.f32.mrb[17].mxu0 }
 0x15b   :  { %v6167_v63 = vadd.f32 %v501_v33, %v6104_v0  ;;  %v6170_v6 = vadd.f32 %v614_v31, %v6107_v46 }
 0x15c   :  { %6987 = vst [vmem:[#allocation52_spill] sm:$0xff] %v6161_v45  ;;  %6988 = vst [vmem:[#allocation53_spill] sm:$0xff] %v6164_v62 }
 0x15d   :  { %6989 = vst [vmem:[#allocation54_spill] sm:$0xff] %v6167_v63  ;;  %6990 = vst [vmem:[#allocation55_spill] sm:$0xff] %v6170_v6  ;;  %v505_v22 = vpop.f32.mrb[18].mxu1  ;;  %v618_v50 = vpop.f32.mrb[18].mxu0 }
 0x15e   :  { %v6173_v49 = vadd.f32 %v505_v22, %v6122_v53  ;;  %v6176_v8 = vadd.f32 %v618_v50, %v6101_v24  ;;  %v507_v58 = vpop.f32.mrb[19].mxu1  ;;  %v620_v45 = vpop.f32.mrb[19].mxu0 }
 0x15f   :  { %v6179_v21 = vadd.f32 %v507_v58, %v6104_v0  ;;  %v6182_v62 = vadd.f32 %v620_v45, %v6107_v46  ;;  %v243_v58 = vsub.s32 0, %v6082_v41 }
 0x160   :  { %6991 = vst [vmem:[#allocation56_spill] sm:$0xff] %v6173_v49  ;;  %6992 = vst [vmem:[#allocation57_spill] sm:$0xff] %v6176_v8 }
 0x161   :  { %6993 = vst [vmem:[#allocation58_spill] sm:$0xff] %v6179_v21  ;;  %6994 = vst [vmem:[#allocation59_spill] sm:$0xff] %v6182_v62  ;;  %v511_v33 = vpop.f32.mrb[20].mxu1  ;;  %v624_v63 = vpop.f32.mrb[20].mxu0 }
 0x162   :  { %v6185_v31 = vadd.f32 %v511_v33, %v6122_v53  ;;  %v6188_v6 = vadd.f32 %v624_v63, %v6101_v24  ;;  %v513_v22 = vpop.f32.mrb[21].mxu1  ;;  %v626_v49 = vpop.f32.mrb[21].mxu0  ;;  %v247_v63 = vsub.s32 1, %v6082_v41 }
 0x163   :  { %v6191_v50 = vadd.f32 %v513_v22, %v6104_v0  ;;  %v6194_v8 = vadd.f32 %v626_v49, %v6107_v46 }
 0x164   :  { %6995 = vst [vmem:[#allocation60_spill] sm:$0xff] %v6185_v31  ;;  %6996 = vst [vmem:[#allocation61_spill] sm:$0xff] %v6188_v6  ;;  %v6204_v6 = vrot.slane %v6094_v5, %v243_v58  ;;  %v6208_v51 = vrot.slane %v6094_v5, %v247_v63  ;;  %v476_v63 = vadd.f32 %v6110_v47, %v6122_v53 }
 0x165   :  { %6997 = vst [vmem:[#allocation62_spill] sm:$0xff] %v6191_v50  ;;  %6998 = vst [vmem:[#allocation63_spill] sm:$0xff] %v6194_v8  ;;  %v517_v45 = vpop.f32.mrb[22].mxu1  ;;  %v630_v62 = vpop.f32.mrb[22].mxu0 }
 0x166   :  { %v6198_v21 = vadd.f32 %v517_v45, %v6122_v53  ;;  %v519_v33 = vpop.f32.mrb[23].mxu1  ;;  %v6200_v31 = vpop.f32.mrb[23].mxu0  ;;  %7000 = vst [vmem:[#allocation65_spill] sm:$0xff] %v6204_v6  ;;  %7001 = vst [vmem:[#allocation66_spill] sm:$0xff] %v6208_v51  ;;  %v6221_v53 = vld [vmem:[#allocation4] sm:$0xff] }
 0x167   :  { %vm857_vm2 = vcmp.gt.s32.totalorder %v6221_v53, 0  ;;  %vm1030_vm3 = vcmp.gt.s32.totalorder %v6221_v53, 7  ;;  %vm1379_vm4 = vcmp.gt.s32.totalorder %v6221_v53, 6  ;;  %vm1728_vm5 = vcmp.gt.s32.totalorder %v6221_v53, 5 }
 0x168   :  { %6999 = vst [vmem:[#allocation64_spill] sm:$0xff] %v6198_v21  ;;  %vm2077_vm6 = vcmp.gt.s32.totalorder %v6221_v53, 4 }
 0x169   :  { %v760_v22 = vpop.f32.mrb[0].mxu0  ;;  %v831_v50 = vpop.f32.mrb[24].mxu1 }
 0x16a   :  { %v5298_v49 = vadd.f32 %v760_v22, %v6204_v6  ;;  %v762_v8 = vpop.f32.mrb[1].mxu0  ;;  %v3848_v40 = vpop.f32.mrb[25].mxu1 }
 0x16b   :  { %v5299_v45 = vadd.f32 %v762_v8, %v6208_v51  ;;  %v849_v40 = vadd.f32 %v6214_v38, %v831_v50 }
 0x16c   :  { %v3508_v52 = vmul.f32 -1.442695, %v5298_v49 }
 0x16d   :  { %v3509_v21 = vmul.f32 -1.442695, %v5299_v45 }
 0x16e   :  { %5345 = vpow2.f32 %v3508_v52  ;;  %v520_v52 = vadd.f32 %v519_v33, %v6104_v0 }
 0x16f   :  { %5347 = vpow2.f32 %v3509_v21 }
 0x178   :  { %v5346_v26 = vpop.eup %5345 }
 0x179   :  { %v839_v41 = vadd.f32 1.0, %v5346_v26  ;;  %v5348_v58 = vpop.eup %5347  ;;  %v631_v26 = vadd.f32 %v630_v62, %v6101_v24 }
 0x17a   :  { %v846_v22 = vadd.f32 1.0, %v5348_v58 }
 0x17b   :  { %5349 = vrcp.f32 %v839_v41 }
 0x17c   :  { %5351 = vrcp.f32 %v846_v22 }
 0x185   :  { %v5350_v5 = vpop.eup %5349 }
 0x186   :  { %v850_v8 = vmul.f32 %v5350_v5, %v849_v40  ;;  %v5352_v50 = vpop.eup %5351  ;;  %v6245_v40 = vld [vmem:[%s6913_s7] ss:$0 sm:$0xff] }
 0x187   :  { %v853_v35 = vsub.f32 1.0, %v5352_v50  ;;  %v855_v33 = vmul.f32 0.0, %v5352_v50 }
 0x188   :  { %v851_v21 = vadd.f32 %v850_v8, %v476_v63 }
 0x189   :  { %v933_v49 = vpop.f32.mrb[26].mxu1  ;;  %v1004_v45 = vpop.f32.mrb[24].mxu0 }
 0x18a   :  { %5353 = vtanh.f32 %v851_v21  ;;  %v1008_v41 = vadd.f32 %v933_v49, %v520_v52  ;;  %v935_v51 = vpop.f32.mrb[27].mxu1  ;;  %v3883_v6 = vpop.f32.mrb[25].mxu0  ;;  %v1022_v63 = vadd.f32 %v6245_v40, %v1004_v45  ;;  %v633_v52 = vadd.f32 %v6200_v31, %v6107_v46 }
 0x18b   :  { %v1015_v58 = vadd.f32 %v935_v51, %v631_v26 }
 0x18c   :  { %v3510_v39 = vmul.f32 -1.442695, %v1008_v41 }
 0x18d   :  { %v3511_v38 = vmul.f32 -1.442695, %v1015_v58 }
 0x18e   :  { %5355 = vpow2.f32 %v3510_v39  ;;  %v7004_v39 = vmov 0.0  }
 0x18f   :  { %5357 = vpow2.f32 %v3511_v38  ;;  %v7003_v38 = vmov 0.0|0.0  }
 0x194   :  { %v5354_v47 = vpop.eup %5353 }
 0x195   :  { %v854_v0 = vmul.f32 %v5354_v47, %v853_v35 }
 0x197   :  { %v6223_v22 = vadd.f32 %v855_v33, %v854_v0  ;;  %v7005_v0 = vld [vmem:[#allocation19_spill] sm:$0xff]  ;;  %v7006_v33 = vld [vmem:[#allocation21_spill] sm:$0xff] }
 0x198   :  { %v5356_v62 = vpop.eup %5355 }
 0x199   :  { %v1012_v24 = vadd.f32 1.0, %v5356_v62  ;;  %v859_v6 = vmul.f32 0.5, %v6223_v22  ;;  %1107 = vmatmul.mubr.f32.vlgmr.msra.gmra.mrb[2].mxu0 %v6223_v22  ;;  %3917 = vmatmul.mubr.f32.vlgmr.msra.gmra.mrb[28].mxu1 %v6223_v22  ;;  %v5358_v51 = vpop.eup %5357  ;;  %v7007_v62 = vld [vmem:[#allocation20_spill] sm:$0xff] }
 0x19a   :  { %4569 = vmatpush1.bf16.msra.mxu1 %v5949_v12  ;;  %4600 = vmatpush3.bf16.msra.mxu0 %v5951_v14  ;;  %v1019_v5 = vadd.f32 1.0, %v5358_v51  ;;  %v7011_v51 = vld [vmem:[#allocation25_spill] sm:$0xff] }
 0x19b   :  { %5359 = vrcp.f32 %v1012_v24  ;;  %v860_v35 = vsel %vm857_vm2, %v859_v6, 0.0  ;;  %4571 = vmatprep.subr.bf16.mxu1 %v5956_v15  ;;  %4601 = vmatprep.subr.bf16.mxu0 %v7003_v38  ;;  %v7008_v24 = vld [vmem:[#allocation22_spill] sm:$0xff]  ;;  %v7009_v6 = vld [vmem:[#allocation24_spill] sm:$0xff] }
 0x19c   :  { %1280 = vmatprep.mubr.f32.mxu1 %v7004_v39  ;;  %3951 = vmatprep.mubr.msk.f32.mxu0 %vm5661_vm1, %v7004_v39  ;;  %862 = vst [vmem:[#allocation13] sm:$0xff] %v860_v35  ;;  %5361 = vrcp.f32 %v1019_v5  ;;  %v7010_v35 = vld [vmem:[#allocation23_spill] sm:$0xff] }
 0x19d   :  { %v7012_v5 = vld [vmem:[#allocation27_spill] sm:$0xff] }
 0x19e   :  { %4573 = vmatpush1.bf16.msra.mxu1 %v5963_v23  ;;  %4603 = vmatpush3.bf16.msra.mxu0 %v5966_v27 }
 0x19f   :  { %4575 = vmatprep.subr.bf16.mxu1 %v5969_v28  ;;  %4604 = vmatprep.subr.bf16.mxu0 %v7003_v38 }
 0x1a2   :  { %4577 = vmatpush1.bf16.msra.mxu1 %v5976_v37  ;;  %4606 = vmatpush3.bf16.msra.mxu0 %v5979_v42 }
 0x1a3   :  { %4579 = vmatprep.subr.bf16.mxu1 %v5982_v44  ;;  %4607 = vmatprep.subr.bf16.mxu0 %v7003_v38 }
 0x1a5   :  { %v5360_v8 = vpop.eup %5359 }
 0x1a6   :  { %v1023_v21 = vmul.f32 %v5360_v8, %v1022_v63  ;;  %4581 = vmatpush1.bf16.msra.mxu1 %v5986_v57  ;;  %4609 = vmatpush3.bf16.msra.mxu0 %v5989_v59  ;;  %v5362_v46 = vpop.eup %5361  ;;  %v7013_v63 = vld [vmem:[#allocation26_spill] sm:$0xff]  ;;  %v7014_v8 = vld [vmem:[#allocation28_spill] sm:$0xff] }
 0x1a7   :  { %4583 = vmatprep.subr.bf16.mxu1 %v5992_v60  ;;  %4610 = vmatprep.subr.bf16.mxu0 %v7003_v38  ;;  %v1026_v31 = vsub.f32 1.0, %v5362_v46  ;;  %v1028_v41 = vmul.f32 0.0, %v5362_v46 }
 0x1a8   :  { %v1024_v26 = vadd.f32 %v1023_v21, %v633_v52 }
 0x1aa   :  { %5363 = vtanh.f32 %v1024_v26  ;;  %4585 = vmatpush1.bf16.msra.mxu1 %v5996_v9  ;;  %4612 = vmatpush3.bf16.msra.mxu0 %v5999_v17  ;;  %v7015_v26 = vld [vmem:[#allocation65_spill] sm:$0xff] }
 0x1ab   :  { %4587 = vmatprep.subr.bf16.mxu1 %v6002_v18  ;;  %4613 = vmatprep.subr.bf16.mxu0 %v7003_v38 }
 0x1ae   :  { %4589 = vmatpush1.bf16.msra.mxu1 %v6006_v32  ;;  %4615 = vmatpush3.bf16.msra.mxu0 %v6009_v34 }
 0x1af   :  { %4591 = vmatprep.subr.bf16.mxu1 %v6012_v36  ;;  %4616 = vmatprep.subr.bf16.mxu0 %v7003_v38 }
 0x1b2   :  { %4593 = vmatpush1.bf16.msra.mxu1 %v6016_v54  ;;  %4618 = vmatpush3.bf16.msra.mxu0 %v6019_v3 }
 0x1b3   :  { %4595 = vmatprep.subr.bf16.mxu1 %v6022_v4  ;;  %4619 = vmatprep.subr.bf16.mxu0 %v7003_v38 }
 0x1b4   :  { %v5364_v49 = vpop.eup %5363 }
 0x1b5   :  { %v1027_v45 = vmul.f32 %v5364_v49, %v1026_v31 }
 0x1b6   :  { %4597 = vmatpush1.bf16.msra.mxu1 %v6026_v13  ;;  %4621 = vmatpush3.bf16.msra.mxu0 %v6029_v48 }
 0x1b7   :  { %v6273_v58 = vadd.f32 %v1028_v41, %v1027_v45  ;;  %4623 = vmatprep.subr.bf16.mxu0 %v5798_v43  ;;  %4654 = vmatprep.subr.bf16.mxu1 %v7003_v38  ;;  %v7016_v41 = vld [vmem:[#allocation66_spill] sm:$0xff] }
 0x1b9   :  { %v1034_v50 = vmul.f32 0.5, %v6273_v58  ;;  %3514 = vmatmul.mubr.msk.f32.vlgmr.msra.gmra.mrb[30].mxu1 %vm1030_vm3, %v6273_v58  ;;  %3952 = vmatmul.mubr.msk.f32.vlgmr.msra.gmra.mrb[26].mxu0 %vm1030_vm3, %v6273_v58 }
 0x1ba   :  { %4625 = vmatpush1.bf16.msra.mxu0 %v5829_v56  ;;  %4656 = vmatpush3.bf16.msra.mxu1 %v5827_v55 }
 0x1bb   :  { %v1035_v47 = vsel %vm1030_vm3, %v1034_v50, 0.0  ;;  %4627 = vmatprep.subr.bf16.mxu0 %v5831_v61  ;;  %4657 = vmatprep.subr.bf16.mxu1 %v7003_v38 }
 0x1bc   :  { %1455 = vmatprep.mubr.f32.mxu0 %v7004_v39  ;;  %3986 = vmatprep.mubr.msk.f32.mxu1 %vm5661_vm1, %v7004_v39  ;;  %1037 = vst [vmem:[#allocation13 + $0x38] sm:$0xff] %v1035_v47 }
 0x1be   :  { %4629 = vmatpush1.bf16.msra.mxu0 %v5841_v2  ;;  %4659 = vmatpush3.bf16.msra.mxu1 %v5839_v1 }
 0x1bf   :  { %4631 = vmatprep.subr.bf16.mxu0 %v5847_v7  ;;  %4660 = vmatprep.subr.bf16.mxu1 %v7003_v38 }
 0x1c2   :  { %4633 = vmatpush1.bf16.msra.mxu0 %v5855_v11  ;;  %4662 = vmatpush3.bf16.msra.mxu1 %v5853_v10 }
 0x1c3   :  { %4635 = vmatprep.subr.bf16.mxu0 %v5861_v16  ;;  %4663 = vmatprep.subr.bf16.mxu1 %v7003_v38 }
 0x1c6   :  { %4637 = vmatpush1.bf16.msra.mxu0 %v5871_v20  ;;  %4665 = vmatpush3.bf16.msra.mxu1 %v5869_v19 }
 0x1c7   :  { %4639 = vmatprep.subr.bf16.mxu0 %v5877_v25  ;;  %4666 = vmatprep.subr.bf16.mxu1 %v7003_v38 }
 0x1ca   :  { %4641 = vmatpush1.bf16.msra.mxu0 %v5887_v30  ;;  %4668 = vmatpush3.bf16.msra.mxu1 %v5885_v29 }
 0x1cb   :  { %4643 = vmatprep.subr.bf16.mxu0 %v7005_v0  ;;  %4669 = vmatprep.subr.bf16.mxu1 %v7003_v38 }
 0x1ce   :  { %4645 = vmatpush1.bf16.msra.mxu0 %v7006_v33  ;;  %4671 = vmatpush3.bf16.msra.mxu1 %v7007_v62  ;;  %v7018_v33 = vld [vmem:[#allocation40_spill] sm:$0xff] }
 0x1cf   :  { %4647 = vmatprep.subr.bf16.mxu0 %v7008_v24  ;;  %4672 = vmatprep.subr.bf16.mxu1 %v7003_v38 }
 0x1d2   :  { %4649 = vmatpush1.bf16.msra.mxu0 %v7009_v6  ;;  %4674 = vmatpush3.bf16.msra.mxu1 %v7010_v35 }
 0x1d3   :  { %4651 = vmatprep.subr.bf16.mxu0 %v7011_v51  ;;  %4675 = vmatprep.subr.bf16.mxu1 %v7003_v38 }
 0x1d6   :  { %4653 = vmatpush1.bf16.msra.mxu0 %v7012_v5  ;;  %4677 = vmatpush3.bf16.msra.mxu1 %v7013_v63 }
 0x1d7   :  { %4679 = vmatprep.subr.bf16.mxu1 %v7014_v8  ;;  %4710 = vmatprep.subr.bf16.mxu0 %v7003_v38  ;;  %v7017_v8 = vld [vmem:[#allocation67_spill] sm:$0xff] }
 0x26c   :  { %v1108_v52 = vpop.f32.mrb[2].mxu0  ;;  %v1179_v21 = vpop.f32.mrb[28].mxu1 }
 0x26d   :  { %v5300_v46 = vadd.f32 %v1108_v52, %v7015_v26  ;;  %v1110_v31 = vpop.f32.mrb[3].mxu0  ;;  %v3918_v49 = vpop.f32.mrb[29].mxu1  ;;  %v1197_v6 = vadd.f32 %v7017_v8, %v1179_v21 }
 0x26e   :  { %v5301_v50 = vadd.f32 %v1110_v31, %v7016_v41 }
 0x26f   :  { %v3512_v45 = vmul.f32 -1.442695, %v5300_v46  ;;  %v7019_v46 = vld [vmem:[#allocation62_spill] sm:$0xff] }
 0x270   :  { %v3513_v47 = vmul.f32 -1.442695, %v5301_v50 }
 0x271   :  { %5365 = vpow2.f32 %v3512_v45 }
 0x272   :  { %5367 = vpow2.f32 %v3513_v47  ;;  %v7020_v47 = vld [vmem:[#allocation61_spill] sm:$0xff] }
 0x27b   :  { %v5366_v51 = vpop.eup %5365 }
 0x27c   :  { %v1187_v5 = vadd.f32 1.0, %v5366_v51  ;;  %v5368_v63 = vpop.eup %5367 }
 0x27d   :  { %v1194_v35 = vadd.f32 1.0, %v5368_v63 }
 0x27e   :  { %5369 = vrcp.f32 %v1187_v5 }
 0x27f   :  { %5371 = vrcp.f32 %v1194_v35 }
 0x288   :  { %v5370_v24 = vpop.eup %5369 }
 0x289   :  { %v1198_v62 = vmul.f32 %v5370_v24, %v1197_v6  ;;  %v5372_v63 = vpop.eup %5371 }
 0x28a   :  { %v1201_v21 = vsub.f32 1.0, %v5372_v63  ;;  %v1203_v6 = vmul.f32 %v5372_v63, %v6223_v22 }
 0x28b   :  { %v1199_v52 = vadd.f32 %v1198_v62, %v7018_v33 }
 0x28c   :  { %v1282_v26 = vpop.f32.mrb[30].mxu1  ;;  %v1353_v49 = vpop.f32.mrb[26].mxu0 }
 0x28d   :  { %5373 = vtanh.f32 %v1199_v52  ;;  %v1357_v31 = vadd.f32 %v1282_v26, %v7019_v46  ;;  %v1284_v45 = vpop.f32.mrb[31].mxu1  ;;  %v3953_v50 = vpop.f32.mrb[27].mxu0  ;;  %v1371_v22 = vadd.f32 %v6245_v40, %v1353_v49 }
 0x28e   :  { %v1364_v41 = vadd.f32 %v1284_v45, %v7020_v47  ;;  %v7022_v50 = vld [vmem:[#allocation63_spill] sm:$0xff] }
 0x28f   :  { %v3516_v51 = vmul.f32 -1.442695, %v1357_v31  ;;  %v1031_v31 = vsel %vm1030_vm3, %v6273_v58, 0.0 }
 0x290   :  { %v3517_v5 = vmul.f32 -1.442695, %v1364_v41 }
 0x291   :  { %5375 = vpow2.f32 %v3516_v51 }
 0x292   :  { %5377 = vpow2.f32 %v3517_v5 }
 0x297   :  { %v5374_v8 = vpop.eup %5373 }
 0x298   :  { %v1202_v24 = vmul.f32 %v5374_v8, %v1201_v21 }
 0x29a   :  { %v6328_v33 = vadd.f32 %v1203_v6, %v1202_v24  ;;  %v7023_v6 = vld [vmem:[#allocation21_spill] sm:$0xff] }
 0x29b   :  { %v5376_v62 = vpop.eup %5375 }
 0x29c   :  { %7021 = vst [vmem:[#allocation40_spill] sm:$0xff] %v6328_v33  ;;  %v5378_v35 = vpop.eup %5377  ;;  %v1361_v52 = vadd.f32 1.0, %v5376_v62  ;;  %1456 = vmatmul.mubr.f32.vlgmr.msra.gmra.mrb[4].mxu0 %v6328_v33  ;;  %3987 = vmatmul.mubr.f32.vlgmr.msra.gmra.mrb[32].mxu1 %v6328_v33  ;;  %v7024_v62 = vld [vmem:[#allocation20_spill] sm:$0xff] }
 0x29d   :  { %v1368_v26 = vadd.f32 1.0, %v5378_v35  ;;  %4681 = vmatpush1.bf16.msra.mxu1 %v5949_v12  ;;  %4712 = vmatpush3.bf16.msra.mxu0 %v5951_v14  ;;  %v7025_v35 = vld [vmem:[#allocation22_spill] sm:$0xff] }
 0x29e   :  { %5379 = vrcp.f32 %v1361_v52  ;;  %4683 = vmatprep.subr.bf16.mxu1 %v5956_v15  ;;  %4713 = vmatprep.subr.bf16.mxu0 %v7003_v38  ;;  %v7026_v52 = vld [vmem:[#allocation24_spill] sm:$0xff] }
 0x29f   :  { %5381 = vrcp.f32 %v1368_v26  ;;  %1629 = vmatprep.mubr.f32.mxu1 %v7004_v39  ;;  %4021 = vmatprep.mubr.msk.f32.mxu0 %vm5661_vm1, %v7004_v39  ;;  %v7027_v26 = vld [vmem:[#allocation23_spill] sm:$0xff] }
 0x2a1   :  { %4685 = vmatpush1.bf16.msra.mxu1 %v5963_v23  ;;  %4715 = vmatpush3.bf16.msra.mxu0 %v5966_v27 }
 0x2a2   :  { %4687 = vmatprep.subr.bf16.mxu1 %v5969_v28  ;;  %4716 = vmatprep.subr.bf16.mxu0 %v7003_v38 }
 0x2a5   :  { %4689 = vmatpush1.bf16.msra.mxu1 %v5976_v37  ;;  %4718 = vmatpush3.bf16.msra.mxu0 %v5979_v42 }
 0x2a6   :  { %4691 = vmatprep.subr.bf16.mxu1 %v5982_v44  ;;  %4719 = vmatprep.subr.bf16.mxu0 %v7003_v38 }
 0x2a8   :  { %v5380_v8 = vpop.eup %5379 }
 0x2a9   :  { %v5382_v41 = vpop.eup %5381  ;;  %v1372_v46 = vmul.f32 %v5380_v8, %v1371_v22  ;;  %4693 = vmatpush1.bf16.msra.mxu1 %v5986_v57  ;;  %4721 = vmatpush3.bf16.msra.mxu0 %v5989_v59  ;;  %v7028_v22 = vld [vmem:[#allocation25_spill] sm:$0xff]  ;;  %v7029_v8 = vld [vmem:[#allocation27_spill] sm:$0xff] }
 0x2aa   :  { %4695 = vmatprep.subr.bf16.mxu1 %v5992_v60  ;;  %4722 = vmatprep.subr.bf16.mxu0 %v7003_v38  ;;  %v1377_v45 = vmul.f32 %v5382_v41, %v1031_v31  ;;  %v1375_v58 = vsub.f32 1.0, %v5382_v41  ;;  %v7030_v41 = vld [vmem:[#allocation26_spill] sm:$0xff] }
 0x2ab   :  { %v1373_v47 = vadd.f32 %v1372_v46, %v7022_v50  ;;  %v7031_v46 = vld [vmem:[#allocation28_spill] sm:$0xff]  ;;  %v7032_v50 = vld [vmem:[#allocation65_spill] sm:$0xff] }
 0x2ad   :  { %5383 = vtanh.f32 %v1373_v47  ;;  %4697 = vmatpush1.bf16.msra.mxu1 %v5996_v9  ;;  %4724 = vmatpush3.bf16.msra.mxu0 %v5999_v17 }
 0x2ae   :  { %4699 = vmatprep.subr.bf16.mxu1 %v6002_v18  ;;  %4725 = vmatprep.subr.bf16.mxu0 %v7003_v38 }
 0x2b1   :  { %4701 = vmatpush1.bf16.msra.mxu1 %v6006_v32  ;;  %4727 = vmatpush3.bf16.msra.mxu0 %v6009_v34 }
 0x2b2   :  { %4703 = vmatprep.subr.bf16.mxu1 %v6012_v36  ;;  %4728 = vmatprep.subr.bf16.mxu0 %v7003_v38 }
 0x2b5   :  { %4705 = vmatpush1.bf16.msra.mxu1 %v6016_v54  ;;  %4730 = vmatpush3.bf16.msra.mxu0 %v6019_v3 }
 0x2b6   :  { %4707 = vmatprep.subr.bf16.mxu1 %v6022_v4  ;;  %4731 = vmatprep.subr.bf16.mxu0 %v7003_v38 }
 0x2b7   :  { %v5384_v49 = vpop.eup %5383 }
 0x2b8   :  { %v1376_v51 = vmul.f32 %v5384_v49, %v1375_v58 }
 0x2b9   :  { %4709 = vmatpush1.bf16.msra.mxu1 %v6026_v13  ;;  %4733 = vmatpush3.bf16.msra.mxu0 %v6029_v48 }
 0x2ba   :  { %v1378_v5 = vadd.f32 %v1377_v45, %v1376_v51  ;;  %4735 = vmatprep.subr.bf16.mxu0 %v5798_v43  ;;  %4766 = vmatprep.subr.bf16.mxu1 %v7003_v38 }
 0x2bc   :  { %v6375_v63 = vsel %vm1379_vm4, %v1378_v5, %v1031_v31  ;;  %v1383_v21 = vmul.f32 0.5, %v1378_v5  ;;  %v7033_v5 = vld [vmem:[#allocation66_spill] sm:$0xff] }
 0x2bd   :  { %1630 = vmatmul.mubr.f32.vlgmr.msra.gmra.mrb[34].mxu1 %v6375_v63  ;;  %4022 = vmatmul.mubr.f32.vlgmr.msra.gmra.mrb[28].mxu0 %v6375_v63 }
 0x2be   :  { %v1384_v24 = vsel %vm1379_vm4, %v1383_v21, 0.0  ;;  %4737 = vmatpush1.bf16.msra.mxu0 %v5829_v56  ;;  %4768 = vmatpush3.bf16.msra.mxu1 %v5827_v55 }
 0x2bf   :  { %4739 = vmatprep.subr.bf16.mxu0 %v5831_v61  ;;  %4769 = vmatprep.subr.bf16.mxu1 %v7003_v38  ;;  %1386 = vst [vmem:[#allocation13 + $0x30] sm:$0xff] %v1384_v24 }
 0x2c0   :  { %1804 = vmatprep.mubr.f32.mxu0 %v7004_v39  ;;  %4056 = vmatprep.mubr.msk.f32.mxu1 %vm5661_vm1, %v7004_v39 }
 0x2c2   :  { %4741 = vmatpush1.bf16.msra.mxu0 %v5841_v2  ;;  %4771 = vmatpush3.bf16.msra.mxu1 %v5839_v1 }
 0x2c3   :  { %4743 = vmatprep.subr.bf16.mxu0 %v5847_v7  ;;  %4772 = vmatprep.subr.bf16.mxu1 %v7003_v38 }
 0x2c6   :  { %4745 = vmatpush1.bf16.msra.mxu0 %v5855_v11  ;;  %4774 = vmatpush3.bf16.msra.mxu1 %v5853_v10 }
 0x2c7   :  { %4747 = vmatprep.subr.bf16.mxu0 %v5861_v16  ;;  %4775 = vmatprep.subr.bf16.mxu1 %v7003_v38 }
 0x2ca   :  { %4749 = vmatpush1.bf16.msra.mxu0 %v5871_v20  ;;  %4777 = vmatpush3.bf16.msra.mxu1 %v5869_v19 }
 0x2cb   :  { %4751 = vmatprep.subr.bf16.mxu0 %v5877_v25  ;;  %4778 = vmatprep.subr.bf16.mxu1 %v7003_v38 }
 0x2ce   :  { %4753 = vmatpush1.bf16.msra.mxu0 %v5887_v30  ;;  %4780 = vmatpush3.bf16.msra.mxu1 %v5885_v29 }
 0x2cf   :  { %4755 = vmatprep.subr.bf16.mxu0 %v7005_v0  ;;  %4781 = vmatprep.subr.bf16.mxu1 %v7003_v38 }
 0x2d2   :  { %4757 = vmatpush1.bf16.msra.mxu0 %v7023_v6  ;;  %4783 = vmatpush3.bf16.msra.mxu1 %v7024_v62  ;;  %v7035_v6 = vld [vmem:[#allocation44_spill] sm:$0xff] }
 0x2d3   :  { %4759 = vmatprep.subr.bf16.mxu0 %v7025_v35  ;;  %4784 = vmatprep.subr.bf16.mxu1 %v7003_v38 }
 0x2d6   :  { %4761 = vmatpush1.bf16.msra.mxu0 %v7026_v52  ;;  %4786 = vmatpush3.bf16.msra.mxu1 %v7027_v26 }
 0x2d7   :  { %4763 = vmatprep.subr.bf16.mxu0 %v7028_v22  ;;  %4787 = vmatprep.subr.bf16.mxu1 %v7003_v38 }
 0x2da   :  { %4765 = vmatpush1.bf16.msra.mxu0 %v7029_v8  ;;  %4789 = vmatpush3.bf16.msra.mxu1 %v7030_v41 }
 0x2db   :  { %4791 = vmatprep.subr.bf16.mxu1 %v7031_v46  ;;  %4822 = vmatprep.subr.bf16.mxu0 %v7003_v38  ;;  %v7034_v46 = vld [vmem:[#allocation67_spill] sm:$0xff] }
 0x36f   :  { %v1457_v31 = vpop.f32.mrb[4].mxu0  ;;  %v1528_v45 = vpop.f32.mrb[32].mxu1 }
 0x370   :  { %v5302_v47 = vadd.f32 %v1457_v31, %v7032_v50  ;;  %v1459_v58 = vpop.f32.mrb[5].mxu0  ;;  %v3988_v49 = vpop.f32.mrb[33].mxu1  ;;  %v1546_v52 = vadd.f32 %v7034_v46, %v1528_v45  ;;  %v7036_v50 = vld [vmem:[#allocation58_spill] sm:$0xff] }
 0x371   :  { %v5303_v21 = vadd.f32 %v1459_v58, %v7033_v5 }
 0x372   :  { %v3518_v51 = vmul.f32 -1.442695, %v5302_v47 }
 0x373   :  { %v3519_v24 = vmul.f32 -1.442695, %v5303_v21 }
 0x374   :  { %5385 = vpow2.f32 %v3518_v51 }
 0x375   :  { %5387 = vpow2.f32 %v3519_v24  ;;  %v7037_v24 = vld [vmem:[#allocation57_spill] sm:$0xff] }
 0x37e   :  { %v5386_v22 = vpop.eup %5385 }
 0x37f   :  { %v1536_v8 = vadd.f32 1.0, %v5386_v22  ;;  %v5388_v41 = vpop.eup %5387 }
 0x380   :  { %v1543_v26 = vadd.f32 1.0, %v5388_v41 }
 0x381   :  { %5389 = vrcp.f32 %v1536_v8 }
 0x382   :  { %5391 = vrcp.f32 %v1543_v26 }
 0x38b   :  { %v5390_v35 = vpop.eup %5389 }
 0x38c   :  { %v1547_v62 = vmul.f32 %v5390_v35, %v1546_v52  ;;  %v5392_v8 = vpop.eup %5391 }
 0x38d   :  { %v1550_v0 = vsub.f32 1.0, %v5392_v8  ;;  %v1552_v35 = vmul.f32 %v5392_v8, %v6328_v33 }
 0x38e   :  { %v1548_v31 = vadd.f32 %v1547_v62, %v7035_v6 }
 0x390   :  { %5393 = vtanh.f32 %v1548_v31  ;;  %v1631_v49 = vpop.f32.mrb[34].mxu1  ;;  %v1702_v47 = vpop.f32.mrb[28].mxu0  ;;  %v7039_v31 = vld [vmem:[#allocation59_spill] sm:$0xff] }
 0x391   :  { %v1706_v58 = vadd.f32 %v1631_v49, %v7036_v50  ;;  %v1633_v51 = vpop.f32.mrb[35].mxu1  ;;  %v4023_v21 = vpop.f32.mrb[29].mxu0 }
 0x392   :  { %v1713_v5 = vadd.f32 %v1633_v51, %v7037_v24 }
 0x393   :  { %v3520_v22 = vmul.f32 -1.442695, %v1706_v58 }
 0x394   :  { %v3521_v41 = vmul.f32 -1.442695, %v1713_v5 }
 0x395   :  { %5395 = vpow2.f32 %v3520_v22 }
 0x396   :  { %5397 = vpow2.f32 %v3521_v41  ;;  %v7042_v41 = vld [vmem:[#allocation21_spill] sm:$0xff] }
 0x39a   :  { %v5394_v45 = vpop.eup %5393 }
 0x39b   :  { %v1551_v46 = vmul.f32 %v5394_v45, %v1550_v0  ;;  %v7043_v45 = vld [vmem:[#allocation20_spill] sm:$0xff] }
 0x39d   :  { %v6423_v6 = vadd.f32 %v1552_v35, %v1551_v46  ;;  %v1720_v46 = vadd.f32 %v6245_v40, %v1702_v47  ;;  %v7044_v35 = vld [vmem:[#allocation22_spill] sm:$0xff] }
 0x39f   :  { %7038 = vst [vmem:[#allocation62_spill] sm:$0xff] %v6423_v6  ;;  %v5396_v62 = vpop.eup %5395  ;;  %1805 = vmatmul.mubr.f32.vlgmr.msra.gmra.mrb[6].mxu0 %v6423_v6  ;;  %4057 = vmatmul.mubr.f32.vlgmr.msra.gmra.mrb[36].mxu1 %v6423_v6 }
 0x3a0   :  { %v1710_v52 = vadd.f32 1.0, %v5396_v62  ;;  %4793 = vmatpush1.bf16.msra.mxu1 %v5949_v12  ;;  %4824 = vmatpush3.bf16.msra.mxu0 %v5951_v14  ;;  %v5398_v0 = vpop.eup %5397  ;;  %v7045_v62 = vld [vmem:[#allocation24_spill] sm:$0xff] }
 0x3a1   :  { %4795 = vmatprep.subr.bf16.mxu1 %v5956_v15  ;;  %4825 = vmatprep.subr.bf16.mxu0 %v7003_v38  ;;  %v1717_v26 = vadd.f32 1.0, %v5398_v0  ;;  %v7047_v0 = vld [vmem:[#allocation25_spill] sm:$0xff] }
 0x3a2   :  { %5399 = vrcp.f32 %v1710_v52  ;;  %1978 = vmatprep.mubr.f32.mxu1 %v7004_v39  ;;  %4091 = vmatprep.mubr.msk.f32.mxu0 %vm5661_vm1, %v7004_v39  ;;  %v7046_v52 = vld [vmem:[#allocation23_spill] sm:$0xff] }
 0x3a3   :  { %5401 = vrcp.f32 %v1717_v26  ;;  %v7048_v26 = vld [vmem:[#allocation27_spill] sm:$0xff] }
 0x3a4   :  { %4797 = vmatpush1.bf16.msra.mxu1 %v5963_v23  ;;  %4827 = vmatpush3.bf16.msra.mxu0 %v5966_v27 }
 0x3a5   :  { %4799 = vmatprep.subr.bf16.mxu1 %v5969_v28  ;;  %4828 = vmatprep.subr.bf16.mxu0 %v7003_v38 }
 0x3a8   :  { %4801 = vmatpush1.bf16.msra.mxu1 %v5976_v37  ;;  %4830 = vmatpush3.bf16.msra.mxu0 %v5979_v42 }
 0x3a9   :  { %4803 = vmatprep.subr.bf16.mxu1 %v5982_v44  ;;  %4831 = vmatprep.subr.bf16.mxu0 %v7003_v38 }
 0x3ac   :  { %v5400_v50 = vpop.eup %5399  ;;  %4805 = vmatpush1.bf16.msra.mxu1 %v5986_v57  ;;  %4833 = vmatpush3.bf16.msra.mxu0 %v5989_v59 }
 0x3ad   :  { %v1721_v5 = vmul.f32 %v5400_v50, %v1720_v46  ;;  %4807 = vmatprep.subr.bf16.mxu1 %v5992_v60  ;;  %4834 = vmatprep.subr.bf16.mxu0 %v7003_v38  ;;  %v5402_v47 = vpop.eup %5401  ;;  %v7049_v46 = vld [vmem:[#allocation26_spill] sm:$0xff]  ;;  %v7050_v50 = vld [vmem:[#allocation28_spill] sm:$0xff] }
 0x3ae   :  { %v1724_v58 = vsub.f32 1.0, %v5402_v47  ;;  %v1726_v24 = vmul.f32 %v5402_v47, %v6375_v63 }
 0x3af   :  { %v1722_v49 = vadd.f32 %v1721_v5, %v7039_v31 }
 0x3b0   :  { %4809 = vmatpush1.bf16.msra.mxu1 %v5996_v9  ;;  %4836 = vmatpush3.bf16.msra.mxu0 %v5999_v17 }
 0x3b1   :  { %5403 = vtanh.f32 %v1722_v49  ;;  %4811 = vmatprep.subr.bf16.mxu1 %v6002_v18  ;;  %4837 = vmatprep.subr.bf16.mxu0 %v7003_v38  ;;  %v7051_v49 = vld [vmem:[#allocation65_spill] sm:$0xff] }
 0x3b4   :  { %4813 = vmatpush1.bf16.msra.mxu1 %v6006_v32  ;;  %4839 = vmatpush3.bf16.msra.mxu0 %v6009_v34 }
 0x3b5   :  { %4815 = vmatprep.subr.bf16.mxu1 %v6012_v36  ;;  %4840 = vmatprep.subr.bf16.mxu0 %v7003_v38 }
 0x3b8   :  { %4817 = vmatpush1.bf16.msra.mxu1 %v6016_v54  ;;  %4842 = vmatpush3.bf16.msra.mxu0 %v6019_v3 }
 0x3b9   :  { %4819 = vmatprep.subr.bf16.mxu1 %v6022_v4  ;;  %4843 = vmatprep.subr.bf16.mxu0 %v7003_v38 }
 0x3bb   :  { %v5404_v51 = vpop.eup %5403 }
 0x3bc   :  { %4821 = vmatpush1.bf16.msra.mxu1 %v6026_v13  ;;  %4845 = vmatpush3.bf16.msra.mxu0 %v6029_v48  ;;  %v1725_v21 = vmul.f32 %v5404_v51, %v1724_v58 }
 0x3bd   :  { %4847 = vmatprep.subr.bf16.mxu0 %v5798_v43  ;;  %4878 = vmatprep.subr.bf16.mxu1 %v7003_v38 }
 0x3be   :  { %v6466_v22 = vadd.f32 %v1726_v24, %v1725_v21  ;;  %v7052_v24 = vld [vmem:[#allocation66_spill] sm:$0xff] }
 0x3c0   :  { %7040 = vst [vmem:[#allocation61_spill] sm:$0xff] %v6466_v22  ;;  %v6472_v8 = vsel %vm1728_vm5, %v6466_v22, %v6375_v63  ;;  %v7041_v63 = vld [vmem:[#allocation19_spill] sm:$0xff] }
 0x3c1   :  { %1979 = vmatmul.mubr.f32.vlgmr.msra.gmra.mrb[38].mxu1 %v6472_v8  ;;  %4092 = vmatmul.mubr.f32.vlgmr.msra.gmra.mrb[30].mxu0 %v6472_v8 }
 0x3c2   :  { %4849 = vmatpush1.bf16.msra.mxu0 %v5829_v56  ;;  %4880 = vmatpush3.bf16.msra.mxu1 %v5827_v55 }
 0x3c3   :  { %4851 = vmatprep.subr.bf16.mxu0 %v5831_v61  ;;  %4881 = vmatprep.subr.bf16.mxu1 %v7003_v38 }
 0x3c4   :  { %2153 = vmatprep.mubr.f32.mxu0 %v7004_v39  ;;  %4126 = vmatprep.mubr.msk.f32.mxu1 %vm5661_vm1, %v7004_v39 }
 0x3c6   :  { %4853 = vmatpush1.bf16.msra.mxu0 %v5841_v2  ;;  %4883 = vmatpush3.bf16.msra.mxu1 %v5839_v1 }
 0x3c7   :  { %4855 = vmatprep.subr.bf16.mxu0 %v5847_v7  ;;  %4884 = vmatprep.subr.bf16.mxu1 %v7003_v38 }
 0x3ca   :  { %4857 = vmatpush1.bf16.msra.mxu0 %v5855_v11  ;;  %4886 = vmatpush3.bf16.msra.mxu1 %v5853_v10 }
 0x3cb   :  { %4859 = vmatprep.subr.bf16.mxu0 %v5861_v16  ;;  %4887 = vmatprep.subr.bf16.mxu1 %v7003_v38 }
 0x3ce   :  { %4861 = vmatpush1.bf16.msra.mxu0 %v5871_v20  ;;  %4889 = vmatpush3.bf16.msra.mxu1 %v5869_v19 }
 0x3cf   :  { %4863 = vmatprep.subr.bf16.mxu0 %v5877_v25  ;;  %4890 = vmatprep.subr.bf16.mxu1 %v7003_v38 }
 0x3d2   :  { %4865 = vmatpush1.bf16.msra.mxu0 %v5887_v30  ;;  %4892 = vmatpush3.bf16.msra.mxu1 %v5885_v29 }
 0x3d3   :  { %4867 = vmatprep.subr.bf16.mxu0 %v7041_v63  ;;  %4893 = vmatprep.subr.bf16.mxu1 %v7003_v38 }
 0x3d6   :  { %4869 = vmatpush1.bf16.msra.mxu0 %v7042_v41  ;;  %4895 = vmatpush3.bf16.msra.mxu1 %v7043_v45  ;;  %v7054_v41 = vld [vmem:[#allocation48_spill] sm:$0xff] }
 0x3d7   :  { %4871 = vmatprep.subr.bf16.mxu0 %v7044_v35  ;;  %4896 = vmatprep.subr.bf16.mxu1 %v7003_v38 }
 0x3da   :  { %4873 = vmatpush1.bf16.msra.mxu0 %v7045_v62  ;;  %4898 = vmatpush3.bf16.msra.mxu1 %v7046_v52 }
 0x3db   :  { %4875 = vmatprep.subr.bf16.mxu0 %v7047_v0  ;;  %4899 = vmatprep.subr.bf16.mxu1 %v7003_v38 }
 0x3de   :  { %4877 = vmatpush1.bf16.msra.mxu0 %v7048_v26  ;;  %4901 = vmatpush3.bf16.msra.mxu1 %v7049_v46 }
 0x3df   :  { %4903 = vmatprep.subr.bf16.mxu1 %v7050_v50  ;;  %4934 = vmatprep.subr.bf16.mxu0 %v7003_v38  ;;  %v7053_v50 = vld [vmem:[#allocation67_spill] sm:$0xff] }
 0x472   :  { %v1806_v5 = vpop.f32.mrb[6].mxu0  ;;  %v1877_v31 = vpop.f32.mrb[36].mxu1 }
 0x473   :  { %v5304_v47 = vadd.f32 %v1806_v5, %v7051_v49  ;;  %v1808_v58 = vpop.f32.mrb[7].mxu0  ;;  %v4058_v51 = vpop.f32.mrb[37].mxu1  ;;  %v1895_v62 = vadd.f32 %v7053_v50, %v1877_v31  ;;  %v7055_v49 = vld [vmem:[#allocation54_spill] sm:$0xff] }
 0x474   :  { %v5305_v33 = vadd.f32 %v1808_v58, %v7052_v24 }
 0x475   :  { %v3522_v21 = vmul.f32 -1.442695, %v5304_v47 }
 0x476   :  { %v3523_v22 = vmul.f32 -1.442695, %v5305_v33 }
 0x477   :  { %5405 = vpow2.f32 %v3522_v21 }
 0x478   :  { %5407 = vpow2.f32 %v3523_v22  ;;  %v7056_v22 = vld [vmem:[#allocation53_spill] sm:$0xff] }
 0x481   :  { %v5406_v0 = vpop.eup %5405 }
 0x482   :  { %v1885_v26 = vadd.f32 1.0, %v5406_v0  ;;  %v5408_v46 = vpop.eup %5407 }
 0x483   :  { %v1892_v52 = vadd.f32 1.0, %v5408_v46 }
 0x484   :  { %5409 = vrcp.f32 %v1885_v26 }
 0x485   :  { %5411 = vrcp.f32 %v1892_v52 }
 0x48e   :  { %v5410_v35 = vpop.eup %5409 }
 0x48f   :  { %v1896_v45 = vmul.f32 %v5410_v35, %v1895_v62  ;;  %v5412_v26 = vpop.eup %5411 }
 0x490   :  { %v1899_v63 = vsub.f32 1.0, %v5412_v26  ;;  %v1901_v35 = vmul.f32 %v5412_v26, %v6423_v6 }
 0x491   :  { %v1897_v5 = vadd.f32 %v1896_v45, %v7054_v41 }
 0x493   :  { %5413 = vtanh.f32 %v1897_v5 }
 0x494   :  { %v1980_v51 = vpop.f32.mrb[38].mxu1  ;;  %v2051_v47 = vpop.f32.mrb[30].mxu0 }
 0x495   :  { %v2055_v58 = vadd.f32 %v1980_v51, %v7055_v49  ;;  %v1982_v21 = vpop.f32.mrb[39].mxu1  ;;  %v4093_v33 = vpop.f32.mrb[31].mxu0  ;;  %v2069_v49 = vadd.f32 %v6245_v40, %v2051_v47  ;;  %v7057_v51 = vld [vmem:[#allocation55_spill] sm:$0xff] }
 0x496   :  { %v2062_v24 = vadd.f32 %v1982_v21, %v7056_v22 }
 0x497   :  { %v3524_v0 = vmul.f32 -1.442695, %v2055_v58 }
 0x498   :  { %v3525_v46 = vmul.f32 -1.442695, %v2062_v24 }
 0x499   :  { %5415 = vpow2.f32 %v3524_v0 }
 0x49a   :  { %5417 = vpow2.f32 %v3525_v46  ;;  %v7059_v46 = vld [vmem:[#allocation21_spill] sm:$0xff] }
 0x49d   :  { %v5414_v50 = vpop.eup %5413 }
 0x49e   :  { %v1900_v31 = vmul.f32 %v5414_v50, %v1899_v63  ;;  %v7060_v50 = vld [vmem:[#allocation20_spill] sm:$0xff] }
 0x4a0   :  { %v6518_v41 = vadd.f32 %v1901_v35, %v1900_v31  ;;  %v7061_v31 = vld [vmem:[#allocation22_spill] sm:$0xff]  ;;  %v7062_v35 = vld [vmem:[#allocation24_spill] sm:$0xff] }
 0x4a2   :  { %2154 = vmatmul.mubr.f32.vlgmr.msra.gmra.mrb[32].mxu0 %v6518_v41  ;;  %4127 = vmatmul.mubr.f32.vlgmr.msra.gmra.mrb[40].mxu1 %v6518_v41 }
 0x4a3   :  { %v5416_v45 = vpop.eup %5415  ;;  %4905 = vmatpush1.bf16.msra.mxu1 %v5949_v12  ;;  %4936 = vmatpush3.bf16.msra.mxu0 %v5951_v14 }
 0x4a4   :  { %v2059_v62 = vadd.f32 1.0, %v5416_v45  ;;  %4907 = vmatprep.subr.bf16.mxu1 %v5956_v15  ;;  %4937 = vmatprep.subr.bf16.mxu0 %v7003_v38  ;;  %v5418_v63 = vpop.eup %5417  ;;  %v7063_v45 = vld [vmem:[#allocation23_spill] sm:$0xff] }
 0x4a5   :  { %2325 = vmatprep.mubr.f32.mxu1 %v7004_v39  ;;  %4161 = vmatprep.mubr.msk.f32.mxu0 %vm5661_vm1, %v7004_v39  ;;  %v2066_v52 = vadd.f32 1.0, %v5418_v63  ;;  %v7065_v63 = vld [vmem:[#allocation27_spill] sm:$0xff] }
 0x4a6   :  { %5419 = vrcp.f32 %v2059_v62  ;;  %v7064_v62 = vld [vmem:[#allocation25_spill] sm:$0xff] }
 0x4a7   :  { %4909 = vmatpush1.bf16.msra.mxu1 %v5963_v23  ;;  %4939 = vmatpush3.bf16.msra.mxu0 %v5966_v27  ;;  %5421 = vrcp.f32 %v2066_v52  ;;  %v7066_v52 = vld [vmem:[#allocation26_spill] sm:$0xff] }
 0x4a8   :  { %4911 = vmatprep.subr.bf16.mxu1 %v5969_v28  ;;  %4940 = vmatprep.subr.bf16.mxu0 %v7003_v38 }
 0x4ab   :  { %4913 = vmatpush1.bf16.msra.mxu1 %v5976_v37  ;;  %4942 = vmatpush3.bf16.msra.mxu0 %v5979_v42 }
 0x4ac   :  { %4915 = vmatprep.subr.bf16.mxu1 %v5982_v44  ;;  %4943 = vmatprep.subr.bf16.mxu0 %v7003_v38 }
 0x4af   :  { %4917 = vmatpush1.bf16.msra.mxu1 %v5986_v57  ;;  %4945 = vmatpush3.bf16.msra.mxu0 %v5989_v59 }
 0x4b0   :  { %v5420_v24 = vpop.eup %5419  ;;  %4919 = vmatprep.subr.bf16.mxu1 %v5992_v60  ;;  %4946 = vmatprep.subr.bf16.mxu0 %v7003_v38 }
 0x4b1   :  { %v2070_v5 = vmul.f32 %v5420_v24, %v2069_v49  ;;  %v5422_v40 = vpop.eup %5421  ;;  %v7067_v49 = vld [vmem:[#allocation28_spill] sm:$0xff]  ;;  %v7068_v24 = vld [vmem:[#allocation65_spill] sm:$0xff] }
 0x4b2   :  { %v2073_v47 = vsub.f32 1.0, %v5422_v40  ;;  %v2075_v22 = vmul.f32 %v5422_v40, %v6472_v8  ;;  %v7071_v40 = vld [vmem:[#allocation30_spill] sm:$0xff] }
 0x4b3   :  { %v2071_v58 = vadd.f32 %v2070_v5, %v7057_v51  ;;  %4921 = vmatpush1.bf16.msra.mxu1 %v5996_v9  ;;  %4948 = vmatpush3.bf16.msra.mxu0 %v5999_v17  ;;  %v7069_v5 = vld [vmem:[#allocation29_spill] sm:$0xff] }
 0x4b4   :  { %4923 = vmatprep.subr.bf16.mxu1 %v6002_v18  ;;  %4949 = vmatprep.subr.bf16.mxu0 %v7003_v38  ;;  %v387_v51 = vadd.f32 %v7069_v5, %v7068_v24  ;;  %v6613_v5 = vld [vmem:[%s6911_s5] ss:$0 sm:$0xff] }
 0x4b5   :  { %5423 = vtanh.f32 %v2071_v58  ;;  %v7070_v58 = vld [vmem:[#allocation66_spill] sm:$0xff]  ;;  %7072 = vst [vmem:[#allocation63_spill] sm:$0xff] %v6613_v5 }
 0x4b7   :  { %4925 = vmatpush1.bf16.msra.mxu1 %v6006_v32  ;;  %4951 = vmatpush3.bf16.msra.mxu0 %v6009_v34 }
 0x4b8   :  { %4927 = vmatprep.subr.bf16.mxu1 %v6012_v36  ;;  %4952 = vmatprep.subr.bf16.mxu0 %v7003_v38 }
 0x4bb   :  { %4929 = vmatpush1.bf16.msra.mxu1 %v6016_v54  ;;  %4954 = vmatpush3.bf16.msra.mxu0 %v6019_v3 }
 0x4bc   :  { %4931 = vmatprep.subr.bf16.mxu1 %v6022_v4  ;;  %4955 = vmatprep.subr.bf16.mxu0 %v7003_v38 }
 0x4bf   :  { %v5424_v21 = vpop.eup %5423  ;;  %4933 = vmatpush1.bf16.msra.mxu1 %v6026_v13  ;;  %4957 = vmatpush3.bf16.msra.mxu0 %v6029_v48 }
 0x4c0   :  { %v2074_v33 = vmul.f32 %v5424_v21, %v2073_v47  ;;  %4959 = vmatprep.subr.bf16.mxu0 %v5798_v43  ;;  %4990 = vmatprep.subr.bf16.mxu1 %v7003_v38  ;;  %v389_v47 = vadd.f32 %v7071_v40, %v7070_v58 }
 0x4c2   :  { %v6561_v0 = vadd.f32 %v2075_v22, %v2074_v33 }
 0x4c4   :  { %v6567_v26 = vsel %vm2077_vm6, %v6561_v0, %v6472_v8  ;;  %v7058_v8 = vld [vmem:[#allocation19_spill] sm:$0xff] }
 0x4c5   :  { %2326 = vmatmul.mubr.f32.vlgmr.msra.gmra.mrb[42].mxu1 %v6567_v26  ;;  %4162 = vmatmul.mubr.f32.vlgmr.msra.gmra.mrb[34].mxu0 %v6567_v26 }
 0x4c6   :  { %4961 = vmatpush1.bf16.msra.mxu0 %v5829_v56  ;;  %4992 = vmatpush3.bf16.msra.mxu1 %v5827_v55 }
 0x4c7   :  { %4963 = vmatprep.subr.bf16.mxu0 %v5831_v61  ;;  %4993 = vmatprep.subr.bf16.mxu1 %v7003_v38 }
 0x4c8   :  { %2498 = vmatprep.mubr.f32.mxu0 %v7004_v39  ;;  %4196 = vmatprep.mubr.msk.f32.mxu1 %vm5661_vm1, %v7004_v39 }
 0x4ca   :  { %4965 = vmatpush1.bf16.msra.mxu0 %v5841_v2  ;;  %4995 = vmatpush3.bf16.msra.mxu1 %v5839_v1 }
 0x4cb   :  { %4967 = vmatprep.subr.bf16.mxu0 %v5847_v7  ;;  %4996 = vmatprep.subr.bf16.mxu1 %v7003_v38 }
 0x4ce   :  { %4969 = vmatpush1.bf16.msra.mxu0 %v5855_v11  ;;  %4998 = vmatpush3.bf16.msra.mxu1 %v5853_v10 }
 0x4cf   :  { %4971 = vmatprep.subr.bf16.mxu0 %v5861_v16  ;;  %4999 = vmatprep.subr.bf16.mxu1 %v7003_v38 }
 0x4d2   :  { %4973 = vmatpush1.bf16.msra.mxu0 %v5871_v20  ;;  %5001 = vmatpush3.bf16.msra.mxu1 %v5869_v19 }
 0x4d3   :  { %4975 = vmatprep.subr.bf16.mxu0 %v5877_v25  ;;  %5002 = vmatprep.subr.bf16.mxu1 %v7003_v38 }
 0x4d6   :  { %4977 = vmatpush1.bf16.msra.mxu0 %v5887_v30  ;;  %5004 = vmatpush3.bf16.msra.mxu1 %v5885_v29 }
 0x4d7   :  { %4979 = vmatprep.subr.bf16.mxu0 %v7058_v8  ;;  %5005 = vmatprep.subr.bf16.mxu1 %v7003_v38 }
 0x4da   :  { %4981 = vmatpush1.bf16.msra.mxu0 %v7059_v46  ;;  %5007 = vmatpush3.bf16.msra.mxu1 %v7060_v50  ;;  %v2081_v46 = vmul.f32 0.5, %v6561_v0 }
 0x4db   :  { %4983 = vmatprep.subr.bf16.mxu0 %v7061_v31  ;;  %5008 = vmatprep.subr.bf16.mxu1 %v7003_v38 }
 0x4de   :  { %4985 = vmatpush1.bf16.msra.mxu0 %v7062_v35  ;;  %5010 = vmatpush3.bf16.msra.mxu1 %v7063_v45 }
 0x4df   :  { %4987 = vmatprep.subr.bf16.mxu0 %v7064_v62  ;;  %5011 = vmatprep.subr.bf16.mxu1 %v7003_v38 }
 0x4e2   :  { %4989 = vmatpush1.bf16.msra.mxu0 %v7065_v63  ;;  %5013 = vmatpush3.bf16.msra.mxu1 %v7066_v52 }
 0x4e3   :  { %5015 = vmatprep.subr.bf16.mxu1 %v7067_v49  ;;  %5046 = vmatprep.subr.bf16.mxu0 %v7003_v38 }
 0x575   :  { %v2155_v21 = vpop.f32.mrb[32].mxu0  ;;  %v2226_v33 = vpop.f32.mrb[40].mxu1 }
 0x576   :  { %v2230_v22 = vadd.f32 %v2155_v21, %v387_v51  ;;  %v2157_v6 = vpop.f32.mrb[33].mxu0  ;;  %v4128_v62 = vpop.f32.mrb[41].mxu1  ;;  %v2244_v40 = vadd.f32 %v6613_v5, %v2226_v33 }
 0x577   :  { %v2237_v45 = vadd.f32 %v2157_v6, %v389_v47  ;;  %v7073_v6 = vld [vmem:[#allocation52_spill] sm:$0xff] }
 0x578   :  { %v3526_v35 = vmul.f32 -1.442695, %v2230_v22 }
 0x579   :  { %v3527_v63 = vmul.f32 -1.442695, %v2237_v45 }
 0x57a   :  { %5425 = vpow2.f32 %v3526_v35 }
 0x57b   :  { %5427 = vpow2.f32 %v3527_v63  ;;  %v7074_v63 = vld [vmem:[#allocation50_spill] sm:$0xff] }
 0x584   :  { %v5426_v52 = vpop.eup %5425 }
 0x585   :  { %v2234_v49 = vadd.f32 1.0, %v5426_v52  ;;  %v5428_v31 = vpop.eup %5427 }
 0x586   :  { %v2241_v50 = vadd.f32 1.0, %v5428_v31  ;;  %v7075_v31 = vld [vmem:[#allocation49_spill] sm:$0xff] }
 0x587   :  { %5429 = vrcp.f32 %v2234_v49 }
 0x588   :  { %5431 = vrcp.f32 %v2241_v50 }
 0x591   :  { %v5430_v51 = vpop.eup %5429 }
 0x592   :  { %v2245_v21 = vmul.f32 %v5430_v51, %v2244_v40  ;;  %v5432_v24 = vpop.eup %5431 }
 0x593   :  { %v2248_v33 = vsub.f32 1.0, %v5432_v24  ;;  %v2250_v51 = vmul.f32 %v5432_v24, %v6518_v41 }
 0x594   :  { %v2246_v62 = vadd.f32 %v2245_v21, %v7073_v6  ;;  %v2082_v21 = vsel %vm2077_vm6, %v2081_v46, 0.0 }
 0x596   :  { %5433 = vtanh.f32 %v2246_v62 }
 0x598   :  { %v2327_v35 = vpop.f32.mrb[42].mxu1  ;;  %v2398_v45 = vpop.f32.mrb[34].mxu0 }
 0x599   :  { %v2402_v52 = vadd.f32 %v2327_v35, %v7074_v63  ;;  %v2329_v49 = vpop.f32.mrb[43].mxu1  ;;  %v4163_v47 = vpop.f32.mrb[35].mxu0  ;;  %v6650_v63 = vld [vmem:[%s6913_s7] ss:$0 sm:$0xff]  ;;  %s5662_s7 = smov [#allocation13]  }
 0x59a   :  { %v2409_v22 = vadd.f32 %v2329_v49, %v7075_v31  ;;  %v7076_v31 = vld [vmem:[#allocation51_spill] sm:$0xff]  ;;  %s3468_s12 = sshll.u32 %s5662_s7, 4  ;;  %s3469_s12 = int_to_ptr.vmem [resolvable:$true] %s3468_s12 }
 0x59b   :  { %v3528_v58 = vmul.f32 -1.442695, %v2402_v52  ;;  %v2416_v52 = vadd.f32 %v6650_v63, %v2398_v45  ;;  %s5618_s0 = scalar_lea.vmem %s3469_s12, 1024  ;;  %p5623_p13 = scmp.lt.s32.totalorder %s3469_s12, %s3469_s12 }
 0x59c   :  { %v3529_v40 = vmul.f32 -1.442695, %v2409_v22  ;;  %p5619_p12 = scmp.ne.s32.totalorder %s3469_s12, %s5618_s0  ;;  %p5624_p0 = scmp.lt.s32.totalorder %s5618_s0, %s5618_s0 }
 0x59d   :  { %5435 = vpow2.f32 %v3528_v58 }
 0x59e   :  { %5437 = vpow2.f32 %v3529_v40  ;;  %p5625_p1 = por %p5624_p0, %p5623_p13 }
 0x5a0   :  { %v5434_v5 = vpop.eup %5433  ;;  %p5626_p2 = pnand %p5625_p1, %p5619_p12 }
 0x5a1   :  { %v2249_v50 = vmul.f32 %v5434_v5, %v2248_v33  ;;  %v1906_v33 = vmul.f32 0.5, %v6518_v41 }
 0x5a3   :  { %v6623_v6 = vadd.f32 %v2250_v51, %v2249_v50  ;;  %v6671_v51 = vld [vmem:[#allocation4] sm:$0xff] }
 0x5a4   :  { %vm1903_vm7 = vcmp.gt.s32.totalorder %v6671_v51, 3  ;;  %vm1554_vm8 = vcmp.gt.s32.totalorder %v6671_v51, 2  ;;  %vm1205_vm9 = vcmp.gt.s32.totalorder %v6671_v51, 1 }
 0x5a5   :  { %v2253_v62 = vmul.f32 0.5, %v6623_v6  ;;  %2499 = vmatmul.mubr.f32.vlgmr.msra.gmra.mrb[36].mxu0 %v6623_v6  ;;  %4197 = vmatmul.mubr.f32.vlgmr.msra.gmra.mrb[44].mxu1 %v6623_v6 }
 0x5a6   :  { %5017 = vmatpush1.bf16.msra.mxu1 %v5949_v12  ;;  %5048 = vmatpush3.bf16.msra.mxu0 %v5951_v14 }
 0x5a7   :  { %v5436_v0 = vpop.eup %5435  ;;  %v2254_v24 = vsel %vm2077_vm6, %v2253_v62, 0.0  ;;  %5019 = vmatprep.subr.bf16.mxu1 %v5956_v15  ;;  %5049 = vmatprep.subr.bf16.mxu0 %v7003_v38 }
 0x5a8   :  { %v2406_v46 = vadd.f32 1.0, %v5436_v0  ;;  %v2255_v58 = vadd.f32 %v2254_v24, %v2082_v21  ;;  %2670 = vmatprep.mubr.f32.mxu1 %v7004_v39  ;;  %4231 = vmatprep.mubr.msk.f32.mxu0 %vm5661_vm1, %v7004_v39  ;;  %v5438_v5 = vpop.eup %5437  ;;  %v1907_v0 = vsel %vm1903_vm7, %v1906_v33, 0.0  ;;  %v7085_v33 = vld [vmem:[#allocation28_spill] sm:$0xff] }
 0x5a9   :  { %v2413_v35 = vadd.f32 1.0, %v5438_v5 }
 0x5aa   :  { %5439 = vrcp.f32 %v2406_v46  ;;  %2256 = vst [vmem:[#allocation13 + $0x20] sm:$0xff] %v2255_v58  ;;  %5021 = vmatpush1.bf16.msra.mxu1 %v5963_v23  ;;  %5051 = vmatpush3.bf16.msra.mxu0 %v5966_v27 }
 0x5ab   :  { %5023 = vmatprep.subr.bf16.mxu1 %v5969_v28  ;;  %5052 = vmatprep.subr.bf16.mxu0 %v7003_v38  ;;  %5441 = vrcp.f32 %v2413_v35  ;;  %v7078_v35 = vld [vmem:[#allocation20_spill] sm:$0xff] }
 0x5ae   :  { %5025 = vmatpush1.bf16.msra.mxu1 %v5976_v37  ;;  %5054 = vmatpush3.bf16.msra.mxu0 %v5979_v42 }
 0x5af   :  { %5027 = vmatprep.subr.bf16.mxu1 %v5982_v44  ;;  %5055 = vmatprep.subr.bf16.mxu0 %v7003_v38 }
 0x5b2   :  { %5029 = vmatpush1.bf16.msra.mxu1 %v5986_v57  ;;  %5057 = vmatpush3.bf16.msra.mxu0 %v5989_v59 }
 0x5b3   :  { %5031 = vmatprep.subr.bf16.mxu1 %v5992_v60  ;;  %5058 = vmatprep.subr.bf16.mxu0 %v7003_v38 }
 0x5b4   :  { %v5440_v49 = vpop.eup %5439 }
 0x5b5   :  { %v2417_v47 = vmul.f32 %v5440_v49, %v2416_v52  ;;  %v5442_v45 = vpop.eup %5441  ;;  %v7079_v52 = vld [vmem:[#allocation22_spill] sm:$0xff]  ;;  %v7080_v49 = vld [vmem:[#allocation24_spill] sm:$0xff] }
 0x5b6   :  { %5033 = vmatpush1.bf16.msra.mxu1 %v5996_v9  ;;  %5060 = vmatpush3.bf16.msra.mxu0 %v5999_v17  ;;  %v2420_v40 = vsub.f32 1.0, %v5442_v45  ;;  %v2422_v62 = vmul.f32 %v5442_v45, %v6567_v26  ;;  %v7084_v45 = vld [vmem:[#allocation26_spill] sm:$0xff] }
 0x5b7   :  { %v2418_v22 = vadd.f32 %v2417_v47, %v7076_v31  ;;  %5035 = vmatprep.subr.bf16.mxu1 %v6002_v18  ;;  %5061 = vmatprep.subr.bf16.mxu0 %v7003_v38  ;;  %v7081_v47 = vld [vmem:[#allocation23_spill] sm:$0xff]  ;;  %v7082_v31 = vld [vmem:[#allocation25_spill] sm:$0xff] }
 0x5b9   :  { %5443 = vtanh.f32 %v2418_v22  ;;  %v7083_v22 = vld [vmem:[#allocation27_spill] sm:$0xff] }
 0x5ba   :  { %5037 = vmatpush1.bf16.msra.mxu1 %v6006_v32  ;;  %5063 = vmatpush3.bf16.msra.mxu0 %v6009_v34 }
 0x5bb   :  { %5039 = vmatprep.subr.bf16.mxu1 %v6012_v36  ;;  %5064 = vmatprep.subr.bf16.mxu0 %v7003_v38 }
 0x5be   :  { %5041 = vmatpush1.bf16.msra.mxu1 %v6016_v54  ;;  %5066 = vmatpush3.bf16.msra.mxu0 %v6019_v3 }
 0x5bf   :  { %5043 = vmatprep.subr.bf16.mxu1 %v6022_v4  ;;  %5067 = vmatprep.subr.bf16.mxu0 %v7003_v38 }
 0x5c2   :  { %5045 = vmatpush1.bf16.msra.mxu1 %v6026_v13  ;;  %5069 = vmatpush3.bf16.msra.mxu0 %v6029_v48 }
 0x5c3   :  { %v5444_v50 = vpop.eup %5443  ;;  %5071 = vmatprep.subr.bf16.mxu0 %v5798_v43  ;;  %5102 = vmatprep.subr.bf16.mxu1 %v7003_v38 }
 0x5c4   :  { %v2421_v21 = vmul.f32 %v5444_v50, %v2420_v40  ;;  %v7086_v40 = vld [vmem:[#allocation65_spill] sm:$0xff]  ;;  %v7087_v50 = vld [vmem:[#allocation31_spill] sm:$0xff] }
 0x5c6   :  { %v2423_v24 = vadd.f32 %v2422_v62, %v2421_v21  ;;  %v393_v21 = vadd.f32 %v7087_v50, %v7086_v40  ;;  %v7088_v62 = vld [vmem:[#allocation66_spill] sm:$0xff] }
 0x5c8   :  { %v6678_v46 = vsel %vm1903_vm7, %v2423_v24, %v6567_v26  ;;  %v2426_v58 = vmul.f32 0.5, %v2423_v24  ;;  %v7077_v26 = vld [vmem:[#allocation21_spill] sm:$0xff] }
 0x5c9   :  { %2671 = vmatmul.mubr.f32.vlgmr.msra.gmra.mrb[46].mxu1 %v6678_v46  ;;  %4232 = vmatmul.mubr.f32.vlgmr.msra.gmra.mrb[38].mxu0 %v6678_v46 }
 0x5ca   :  { %v2427_v41 = vsel %vm1903_vm7, %v2426_v58, 0.0  ;;  %5073 = vmatpush1.bf16.msra.mxu0 %v5829_v56  ;;  %5104 = vmatpush3.bf16.msra.mxu1 %v5827_v55 }
 0x5cb   :  { %v2428_v5 = vadd.f32 %v2427_v41, %v1907_v0  ;;  %5075 = vmatprep.subr.bf16.mxu0 %v5831_v61  ;;  %5105 = vmatprep.subr.bf16.mxu1 %v7003_v38  ;;  %v7089_v0 = vld [vmem:[#allocation32_spill] sm:$0xff] }
 0x5cc   :  { %2843 = vmatprep.mubr.f32.mxu0 %v7004_v39  ;;  %4266 = vmatprep.mubr.msk.f32.mxu1 %vm5661_vm1, %v7004_v39  ;;  %v395_v24 = vadd.f32 %v7089_v0, %v7088_v62  ;;  %v7091_v0 = vld [vmem:[#allocation56_spill] sm:$0xff] }
 0x5cd   :  { %2429 = vst [vmem:[#allocation13 + $0x18] sm:$0xff] %v2428_v5 }
 0x5ce   :  { %5077 = vmatpush1.bf16.msra.mxu0 %v5841_v2  ;;  %5107 = vmatpush3.bf16.msra.mxu1 %v5839_v1 }
 0x5cf   :  { %5079 = vmatprep.subr.bf16.mxu0 %v5847_v7  ;;  %5108 = vmatprep.subr.bf16.mxu1 %v7003_v38 }
 0x5d2   :  { %5081 = vmatpush1.bf16.msra.mxu0 %v5855_v11  ;;  %5110 = vmatpush3.bf16.msra.mxu1 %v5853_v10 }
 0x5d3   :  { %5083 = vmatprep.subr.bf16.mxu0 %v5861_v16  ;;  %5111 = vmatprep.subr.bf16.mxu1 %v7003_v38 }
 0x5d6   :  { %5085 = vmatpush1.bf16.msra.mxu0 %v5871_v20  ;;  %5113 = vmatpush3.bf16.msra.mxu1 %v5869_v19 }
 0x5d7   :  { %5087 = vmatprep.subr.bf16.mxu0 %v5877_v25  ;;  %5114 = vmatprep.subr.bf16.mxu1 %v7003_v38 }
 0x5da   :  { %5089 = vmatpush1.bf16.msra.mxu0 %v5887_v30  ;;  %5116 = vmatpush3.bf16.msra.mxu1 %v5885_v29 }
 0x5db   :  { %5091 = vmatprep.subr.bf16.mxu0 %v7058_v8  ;;  %5117 = vmatprep.subr.bf16.mxu1 %v7003_v38  ;;  %v7090_v8 = vld [vmem:[#allocation63_spill] sm:$0xff] }
 0x5de   :  { %5093 = vmatpush1.bf16.msra.mxu0 %v7077_v26  ;;  %5119 = vmatpush3.bf16.msra.mxu1 %v7078_v35 }
 0x5df   :  { %5095 = vmatprep.subr.bf16.mxu0 %v7079_v52  ;;  %5120 = vmatprep.subr.bf16.mxu1 %v7003_v38 }
 0x5e2   :  { %5097 = vmatpush1.bf16.msra.mxu0 %v7080_v49  ;;  %5122 = vmatpush3.bf16.msra.mxu1 %v7081_v47 }
 0x5e3   :  { %5099 = vmatprep.subr.bf16.mxu0 %v7082_v31  ;;  %5123 = vmatprep.subr.bf16.mxu1 %v7003_v38 }
 0x5e6   :  { %5101 = vmatpush1.bf16.msra.mxu0 %v7083_v22  ;;  %5125 = vmatpush3.bf16.msra.mxu1 %v7084_v45 }
 0x5e7   :  { %5127 = vmatprep.subr.bf16.mxu1 %v7085_v33  ;;  %5158 = vmatprep.subr.bf16.mxu0 %v7003_v38 }
 0x678   :  { %v2500_v58 = vpop.f32.mrb[36].mxu0  ;;  %v2571_v41 = vpop.f32.mrb[44].mxu1 }
 0x679   :  { %v2575_v5 = vadd.f32 %v2500_v58, %v393_v21  ;;  %v2502_v31 = vpop.f32.mrb[37].mxu0  ;;  %v4198_v47 = vpop.f32.mrb[45].mxu1  ;;  %v2589_v50 = vadd.f32 %v7090_v8, %v2571_v41 }
 0x67a   :  { %v2582_v49 = vadd.f32 %v2502_v31, %v395_v24  ;;  %v7092_v31 = vld [vmem:[#allocation46_spill] sm:$0xff] }
 0x67b   :  { %v3530_v52 = vmul.f32 -1.442695, %v2575_v5 }
 0x67c   :  { %v3531_v22 = vmul.f32 -1.442695, %v2582_v49 }
 0x67d   :  { %5445 = vpow2.f32 %v3530_v52 }
 0x67e   :  { %5447 = vpow2.f32 %v3531_v22  ;;  %v7093_v22 = vld [vmem:[#allocation45_spill] sm:$0xff] }
 0x687   :  { %v5446_v45 = vpop.eup %5445 }
 0x688   :  { %v2579_v33 = vadd.f32 1.0, %v5446_v45  ;;  %v5448_v35 = vpop.eup %5447 }
 0x689   :  { %v2586_v26 = vadd.f32 1.0, %v5448_v35  ;;  %v7094_v35 = vld [vmem:[#allocation61_spill] sm:$0xff] }
 0x68a   :  { %5449 = vrcp.f32 %v2579_v33  ;;  %v1732_v5 = vmul.f32 0.5, %v7094_v35  ;;  %v7096_v35 = vld [vmem:[#allocation62_spill] sm:$0xff] }
 0x68b   :  { %5451 = vrcp.f32 %v2586_v26 }
 0x694   :  { %v5450_v40 = vpop.eup %5449 }
 0x695   :  { %v2590_v29 = vmul.f32 %v5450_v40, %v2589_v50  ;;  %v5452_v45 = vpop.eup %5451 }
 0x696   :  { %v2593_v41 = vsub.f32 1.0, %v5452_v45 }
 0x697   :  { %v2591_v62 = vadd.f32 %v2590_v29, %v7091_v0  ;;  %v2595_v29 = vmul.f32 %v5452_v45, %v6623_v6  ;;  %v7095_v45 = vld [vmem:[#allocation47_spill] sm:$0xff] }
 0x699   :  { %5453 = vtanh.f32 %v2591_v62  ;;  %v1733_v62 = vsel %vm1728_vm5, %v1732_v5, 0.0  ;;  %v1557_v5 = vmul.f32 0.5, %v7096_v35 }
 0x69c   :  { %v2672_v21 = vpop.f32.mrb[46].mxu1  ;;  %v2743_v47 = vpop.f32.mrb[38].mxu0 }
 0x69d   :  { %v2747_v24 = vadd.f32 %v2672_v21, %v7092_v31  ;;  %v2674_v52 = vpop.f32.mrb[47].mxu1  ;;  %v4233_v49 = vpop.f32.mrb[39].mxu0 }
 0x69e   :  { %v2754_v58 = vadd.f32 %v2674_v52, %v7093_v22  ;;  %v2761_v49 = vadd.f32 %v6650_v63, %v2743_v47 }
 0x69f   :  { %v3532_v33 = vmul.f32 -1.442695, %v2747_v24 }
 0x6a0   :  { %v3533_v40 = vmul.f32 -1.442695, %v2754_v58 }
 0x6a1   :  { %5455 = vpow2.f32 %v3532_v33 }
 0x6a2   :  { %5457 = vpow2.f32 %v3533_v40 }
 0x6a3   :  { %v5454_v8 = vpop.eup %5453 }
 0x6a4   :  { %v2594_v26 = vmul.f32 %v5454_v8, %v2593_v41 }
 0x6a6   :  { %v6729_v50 = vadd.f32 %v2595_v29, %v2594_v26 }
 0x6a8   :  { %v2598_v0 = vmul.f32 0.5, %v6729_v50  ;;  %2844 = vmatmul.mubr.f32.vlgmr.msra.gmra.mrb[40].mxu0 %v6729_v50  ;;  %4267 = vmatmul.mubr.f32.vlgmr.msra.gmra.mrb[48].mxu1 %v6729_v50 }
 0x6a9   :  { %5129 = vmatpush1.bf16.msra.mxu1 %v5949_v12  ;;  %5160 = vmatpush3.bf16.msra.mxu0 %v5951_v14 }
 0x6aa   :  { %v2599_v8 = vsel %vm1728_vm5, %v2598_v0, 0.0  ;;  %5131 = vmatprep.subr.bf16.mxu1 %v5956_v15  ;;  %5161 = vmatprep.subr.bf16.mxu0 %v7003_v38 }
 0x6ab   :  { %v5456_v6 = vpop.eup %5455  ;;  %v2600_v21 = vadd.f32 %v2599_v8, %v1733_v62  ;;  %3015 = vmatprep.mubr.f32.mxu1 %v7004_v39  ;;  %4301 = vmatprep.mubr.msk.f32.mxu0 %vm5661_vm1, %v7004_v39  ;;  %v1558_v62 = vsel %vm1554_vm8, %v1557_v5, 0.0 }
 0x6ac   :  { %v2751_v31 = vadd.f32 1.0, %v5456_v6  ;;  %v5458_v24 = vpop.eup %5457 }
 0x6ad   :  { %2601 = vst [vmem:[#allocation13 + $0x28] sm:$0xff] %v2600_v21  ;;  %5133 = vmatpush1.bf16.msra.mxu1 %v5963_v23  ;;  %5163 = vmatpush3.bf16.msra.mxu0 %v5966_v27  ;;  %v2758_v52 = vadd.f32 1.0, %v5458_v24  ;;  %v7111_v24 = vld [vmem:[#allocation34_spill] sm:$0xff] }
 0x6ae   :  { %5459 = vrcp.f32 %v2751_v31  ;;  %5135 = vmatprep.subr.bf16.mxu1 %v5969_v28  ;;  %5164 = vmatprep.subr.bf16.mxu0 %v7003_v38  ;;  %v7110_v31 = vld [vmem:[#allocation66_spill] sm:$0xff] }
 0x6af   :  { %5461 = vrcp.f32 %v2758_v52  ;;  %v401_v52 = vadd.f32 %v7111_v24, %v7110_v31 }
 0x6b1   :  { %5137 = vmatpush1.bf16.msra.mxu1 %v5976_v37  ;;  %5166 = vmatpush3.bf16.msra.mxu0 %v5979_v42 }
 0x6b2   :  { %5139 = vmatprep.subr.bf16.mxu1 %v5982_v44  ;;  %5167 = vmatprep.subr.bf16.mxu0 %v7003_v38 }
 0x6b5   :  { %5141 = vmatpush1.bf16.msra.mxu1 %v5986_v57  ;;  %5169 = vmatpush3.bf16.msra.mxu0 %v5989_v59 }
 0x6b6   :  { %5143 = vmatprep.subr.bf16.mxu1 %v5992_v60  ;;  %5170 = vmatprep.subr.bf16.mxu0 %v7003_v38 }
 0x6b8   :  { %v5460_v22 = vpop.eup %5459 }
 0x6b9   :  { %v2762_v58 = vmul.f32 %v5460_v22, %v2761_v49  ;;  %5145 = vmatpush1.bf16.msra.mxu1 %v5996_v9  ;;  %5172 = vmatpush3.bf16.msra.mxu0 %v5999_v17  ;;  %v5462_v47 = vpop.eup %5461 }
 0x6ba   :  { %5147 = vmatprep.subr.bf16.mxu1 %v6002_v18  ;;  %5173 = vmatprep.subr.bf16.mxu0 %v7003_v38  ;;  %v2765_v41 = vsub.f32 1.0, %v5462_v47  ;;  %v2767_v29 = vmul.f32 %v5462_v47, %v6678_v46 }
 0x6bb   :  { %v2763_v33 = vadd.f32 %v2762_v58, %v7095_v45 }
 0x6bd   :  { %5463 = vtanh.f32 %v2763_v33  ;;  %5149 = vmatpush1.bf16.msra.mxu1 %v6006_v32  ;;  %5175 = vmatpush3.bf16.msra.mxu0 %v6009_v34 }
 0x6be   :  { %5151 = vmatprep.subr.bf16.mxu1 %v6012_v36  ;;  %5176 = vmatprep.subr.bf16.mxu0 %v7003_v38 }
 0x6c1   :  { %5153 = vmatpush1.bf16.msra.mxu1 %v6016_v54  ;;  %5178 = vmatpush3.bf16.msra.mxu0 %v6019_v3 }
 0x6c2   :  { %5155 = vmatprep.subr.bf16.mxu1 %v6022_v4  ;;  %5179 = vmatprep.subr.bf16.mxu0 %v7003_v38 }
 0x6c5   :  { %5157 = vmatpush1.bf16.msra.mxu1 %v6026_v13  ;;  %5181 = vmatpush3.bf16.msra.mxu0 %v6029_v48 }
 0x6c6   :  { %5183 = vmatprep.subr.bf16.mxu0 %v5798_v43  ;;  %5214 = vmatprep.subr.bf16.mxu1 %v7003_v38 }
 0x6c7   :  { %v5464_v40 = vpop.eup %5463 }
 0x6c8   :  { %v2766_v26 = vmul.f32 %v5464_v40, %v2765_v41 }
 0x6ca   :  { %v2768_v0 = vadd.f32 %v2767_v29, %v2766_v26 }
 0x6cc   :  { %v6777_v8 = vsel %vm1554_vm8, %v2768_v0, %v6678_v46  ;;  %v2771_v6 = vmul.f32 0.5, %v2768_v0 }
 0x6cd   :  { %3016 = vmatmul.mubr.f32.vlgmr.msra.gmra.mrb[50].mxu1 %v6777_v8  ;;  %4302 = vmatmul.mubr.f32.vlgmr.msra.gmra.mrb[42].mxu0 %v6777_v8 }
 0x6ce   :  { %v2772_v21 = vsel %vm1554_vm8, %v2771_v6, 0.0  ;;  %5185 = vmatpush1.bf16.msra.mxu0 %v5829_v56  ;;  %5216 = vmatpush3.bf16.msra.mxu1 %v5827_v55  ;;  %v7097_v55 = vld [vmem:[#allocation18_spill] sm:$0xff]  ;;  %v7098_v56 = vld [vmem:[#allocation19_spill] sm:$0xff] }
 0x6cf   :  { %v2773_v43 = vadd.f32 %v2772_v21, %v1558_v62  ;;  %5187 = vmatprep.subr.bf16.mxu0 %v5831_v61  ;;  %5217 = vmatprep.subr.bf16.mxu1 %v7003_v38  ;;  %v7099_v61 = vld [vmem:[#allocation21_spill] sm:$0xff]  ;;  %v7112_v62 = vld [vmem:[#allocation63_spill] sm:$0xff] }
 0x6d0   :  { %3188 = vmatprep.mubr.f32.mxu0 %v7004_v39  ;;  %4336 = vmatprep.mubr.msk.f32.mxu1 %vm5661_vm1, %v7004_v39 }
 0x6d1   :  { %2774 = vst [vmem:[#allocation13 + $0x10] sm:$0xff] %v2773_v43  ;;  %v7113_v43 = vld [vmem:[#allocation60_spill] sm:$0xff] }
 0x6d2   :  { %5189 = vmatpush1.bf16.msra.mxu0 %v5841_v2  ;;  %5219 = vmatpush3.bf16.msra.mxu1 %v5839_v1  ;;  %v7100_v1 = vld [vmem:[#allocation20_spill] sm:$0xff]  ;;  %v7101_v2 = vld [vmem:[#allocation22_spill] sm:$0xff] }
 0x6d3   :  { %5191 = vmatprep.subr.bf16.mxu0 %v5847_v7  ;;  %5220 = vmatprep.subr.bf16.mxu1 %v7003_v38  ;;  %v7102_v7 = vld [vmem:[#allocation24_spill] sm:$0xff] }
 0x6d6   :  { %5193 = vmatpush1.bf16.msra.mxu0 %v5855_v11  ;;  %5222 = vmatpush3.bf16.msra.mxu1 %v5853_v10  ;;  %v7103_v10 = vld [vmem:[#allocation23_spill] sm:$0xff]  ;;  %v7104_v11 = vld [vmem:[#allocation25_spill] sm:$0xff] }
 0x6d7   :  { %5195 = vmatprep.subr.bf16.mxu0 %v5861_v16  ;;  %5223 = vmatprep.subr.bf16.mxu1 %v7003_v38  ;;  %v7105_v16 = vld [vmem:[#allocation27_spill] sm:$0xff] }
 0x6da   :  { %5197 = vmatpush1.bf16.msra.mxu0 %v5871_v20  ;;  %5225 = vmatpush3.bf16.msra.mxu1 %v5869_v19  ;;  %v7106_v19 = vld [vmem:[#allocation26_spill] sm:$0xff]  ;;  %v7107_v20 = vld [vmem:[#allocation28_spill] sm:$0xff] }
 0x6db   :  { %5199 = vmatprep.subr.bf16.mxu0 %v5877_v25  ;;  %5226 = vmatprep.subr.bf16.mxu1 %v7003_v38  ;;  %v7108_v25 = vld [vmem:[#allocation65_spill] sm:$0xff] }
 0x6de   :  { %5201 = vmatpush1.bf16.msra.mxu0 %v5887_v30  ;;  %5228 = vmatpush3.bf16.msra.mxu1 %v7097_v55  ;;  %v7109_v30 = vld [vmem:[#allocation33_spill] sm:$0xff] }
 0x6df   :  { %5203 = vmatprep.subr.bf16.mxu0 %v7098_v56  ;;  %5229 = vmatprep.subr.bf16.mxu1 %v7003_v38  ;;  %v399_v46 = vadd.f32 %v7109_v30, %v7108_v25 }
 0x6e2   :  { %5205 = vmatpush1.bf16.msra.mxu0 %v7099_v61  ;;  %5231 = vmatpush3.bf16.msra.mxu1 %v7100_v1  ;;  %v7114_v1 = vld [vmem:[#allocation42_spill] sm:$0xff] }
 0x6e3   :  { %5207 = vmatprep.subr.bf16.mxu0 %v7101_v2  ;;  %5232 = vmatprep.subr.bf16.mxu1 %v7003_v38 }
 0x6e6   :  { %5209 = vmatpush1.bf16.msra.mxu0 %v7102_v7  ;;  %5234 = vmatpush3.bf16.msra.mxu1 %v7103_v10 }
 0x6e7   :  { %5211 = vmatprep.subr.bf16.mxu0 %v7104_v11  ;;  %5235 = vmatprep.subr.bf16.mxu1 %v7003_v38 }
 0x6ea   :  { %5213 = vmatpush1.bf16.msra.mxu0 %v7105_v16  ;;  %5237 = vmatpush3.bf16.msra.mxu1 %v7106_v19  ;;  %v7115_v16 = vld [vmem:[#allocation41_spill] sm:$0xff] }
 0x6eb   :  { %5239 = vmatprep.subr.bf16.mxu1 %v7107_v20  ;;  %5270 = vmatprep.subr.bf16.mxu0 %v7003_v38 }
 0x77b   :  { %v2845_v49 = vpop.f32.mrb[40].mxu0  ;;  %v2916_v22 = vpop.f32.mrb[48].mxu1 }
 0x77c   :  { %v2920_v58 = vadd.f32 %v2845_v49, %v399_v46  ;;  %v2847_v45 = vpop.f32.mrb[41].mxu0  ;;  %v4268_v33 = vpop.f32.mrb[49].mxu1  ;;  %v2934_v0 = vadd.f32 %v7112_v62, %v2916_v22 }
 0x77d   :  { %v2927_v47 = vadd.f32 %v2847_v45, %v401_v52  ;;  %v2942_v45 = vld [vmem:[#allocation13 + $0x30] sm:$0xff] }
 0x77e   :  { %v3534_v35 = vmul.f32 -1.442695, %v2920_v58 }
 0x77f   :  { %v3535_v5 = vmul.f32 -1.442695, %v2927_v47 }
 0x780   :  { %5465 = vpow2.f32 %v3534_v35 }
 0x781   :  { %5467 = vpow2.f32 %v3535_v5 }
 0x78a   :  { %v5466_v41 = vpop.eup %5465 }
 0x78b   :  { %v2924_v40 = vadd.f32 1.0, %v5466_v41  ;;  %v5468_v26 = vpop.eup %5467 }
 0x78c   :  { %v2931_v29 = vadd.f32 1.0, %v5468_v26 }
 0x78d   :  { %5469 = vrcp.f32 %v2924_v40 }
 0x78e   :  { %5471 = vrcp.f32 %v2931_v29 }
 0x797   :  { %v5470_v6 = vpop.eup %5469 }
 0x798   :  { %v2935_v21 = vmul.f32 %v5470_v6, %v2934_v0  ;;  %v5472_v11 = vpop.eup %5471 }
 0x799   :  { %v2938_v30 = vsub.f32 1.0, %v5472_v11  ;;  %v2940_v52 = vmul.f32 %v5472_v11, %v6729_v50 }
 0x79a   :  { %v2936_v55 = vadd.f32 %v2935_v21, %v7113_v43 }
 0x79c   :  { %5473 = vtanh.f32 %v2936_v55 }
 0x7a0   :  { %v3017_v56 = vpop.f32.mrb[50].mxu1  ;;  %v3088_v61 = vpop.f32.mrb[42].mxu0 }
 0x7a1   :  { %v3092_v2 = vadd.f32 %v3017_v56, %v7114_v1  ;;  %v3019_v7 = vpop.f32.mrb[51].mxu1  ;;  %v4303_v10 = vpop.f32.mrb[43].mxu0 }
 0x7a2   :  { %v3099_v19 = vadd.f32 %v3019_v7, %v7115_v16  ;;  %v7121_v10 = vld [vmem:[#allocation38_spill] sm:$0xff] }
 0x7a3   :  { %v3536_v20 = vmul.f32 -1.442695, %v3092_v2 }
 0x7a4   :  { %v3537_v49 = vmul.f32 -1.442695, %v3099_v19 }
 0x7a5   :  { %5475 = vpow2.f32 %v3536_v20  ;;  %v7122_v20 = vld [vmem:[#allocation37_spill] sm:$0xff] }
 0x7a6   :  { %v5474_v46 = vpop.eup %5473  ;;  %5477 = vpow2.f32 %v3537_v49 }
 0x7a7   :  { %v2939_v24 = vmul.f32 %v5474_v46, %v2938_v30 }
 0x7a9   :  { %v6825_v22 = vadd.f32 %v2940_v52, %v2939_v24 }
 0x7ab   :  { %v2943_v58 = vmul.f32 0.5, %v6825_v22  ;;  %3189 = vmatmul.mubr.f32.vlgmr.msra.gmra.mrb[44].mxu0 %v6825_v22  ;;  %4337 = vmatmul.mubr.f32.vlgmr.msra.gmra.mrb[52].mxu1 %v6825_v22 }
 0x7ac   :  { %5241 = vmatpush1.bf16.msra.mxu1 %v5949_v12  ;;  %5272 = vmatpush3.bf16.msra.mxu0 %v5951_v14 }
 0x7ad   :  { %v2944_v33 = vsel %vm1379_vm4, %v2943_v58, 0.0  ;;  %5243 = vmatprep.subr.bf16.mxu1 %v5956_v15  ;;  %5273 = vmatprep.subr.bf16.mxu0 %v7003_v38  ;;  %v3106_v15 = vadd.f32 %v6650_v63, %v3088_v61 }
 0x7ae   :  { %v2945_v50 = vadd.f32 %v2944_v33, %v2942_v45  ;;  %3359 = vmatprep.mubr.f32.mxu1 %v7004_v39  ;;  %4371 = vmatprep.mubr.msk.f32.mxu0 %vm5661_vm1, %v7004_v39 }
 0x7af   :  { %v5476_v47 = vpop.eup %5475 }
 0x7b0   :  { %v3096_v35 = vadd.f32 1.0, %v5476_v47  ;;  %2946 = vst [vmem:[#allocation13 + $0x30] sm:$0xff] %v2945_v50  ;;  %5245 = vmatpush1.bf16.msra.mxu1 %v5963_v23  ;;  %5275 = vmatpush3.bf16.msra.mxu0 %v5966_v27  ;;  %v5478_v12 = vpop.eup %5477  ;;  %v3287_v50 = vld [vmem:[#allocation13 + $0x38] sm:$0xff] }
 0x7b1   :  { %5247 = vmatprep.subr.bf16.mxu1 %v5969_v28  ;;  %5276 = vmatprep.subr.bf16.mxu0 %v7003_v38  ;;  %v3103_v14 = vadd.f32 1.0, %v5478_v12  ;;  %v7116_v28 = vld [vmem:[#allocation43_spill] sm:$0xff] }
 0x7b2   :  { %5479 = vrcp.f32 %v3096_v35 }
 0x7b3   :  { %5481 = vrcp.f32 %v3103_v14 }
 0x7b4   :  { %5249 = vmatpush1.bf16.msra.mxu1 %v5976_v37  ;;  %5278 = vmatpush3.bf16.msra.mxu0 %v5979_v42 }
 0x7b5   :  { %5251 = vmatprep.subr.bf16.mxu1 %v5982_v44  ;;  %5279 = vmatprep.subr.bf16.mxu0 %v7003_v38  ;;  %v7117_v44 = vld [vmem:[#allocation40_spill] sm:$0xff] }
 0x7b8   :  { %5253 = vmatpush1.bf16.msra.mxu1 %v5986_v57  ;;  %5281 = vmatpush3.bf16.msra.mxu0 %v5989_v59  ;;  %v1208_v57 = vmul.f32 0.5, %v7117_v44 }
 0x7b9   :  { %5255 = vmatprep.subr.bf16.mxu1 %v5992_v60  ;;  %5282 = vmatprep.subr.bf16.mxu0 %v7003_v38 }
 0x7bc   :  { %v5480_v23 = vpop.eup %5479  ;;  %5257 = vmatpush1.bf16.msra.mxu1 %v5996_v9  ;;  %5284 = vmatpush3.bf16.msra.mxu0 %v5999_v17 }
 0x7bd   :  { %v3107_v27 = vmul.f32 %v5480_v23, %v3106_v15  ;;  %5259 = vmatprep.subr.bf16.mxu1 %v6002_v18  ;;  %5285 = vmatprep.subr.bf16.mxu0 %v7003_v38  ;;  %v5482_v42 = vpop.eup %5481  ;;  %v1209_v18 = vsel %vm1205_vm9, %v1208_v57, 0.0 }
 0x7be   :  { %v3110_v59 = vsub.f32 1.0, %v5482_v42  ;;  %v3112_v17 = vmul.f32 %v5482_v42, %v6777_v8 }
 0x7bf   :  { %v3108_v37 = vadd.f32 %v3107_v27, %v7116_v28 }
 0x7c0   :  { %5261 = vmatpush1.bf16.msra.mxu1 %v6006_v32  ;;  %5287 = vmatpush3.bf16.msra.mxu0 %v6009_v34 }
 0x7c1   :  { %5483 = vtanh.f32 %v3108_v37  ;;  %5263 = vmatprep.subr.bf16.mxu1 %v6012_v36  ;;  %5288 = vmatprep.subr.bf16.mxu0 %v7003_v38 }
 0x7c4   :  { %5265 = vmatpush1.bf16.msra.mxu1 %v6016_v54  ;;  %5290 = vmatpush3.bf16.msra.mxu0 %v6019_v3 }
 0x7c5   :  { %5267 = vmatprep.subr.bf16.mxu1 %v6022_v4  ;;  %5291 = vmatprep.subr.bf16.mxu0 %v7003_v38  ;;  %v7118_v4 = vld [vmem:[#allocation35_spill] sm:$0xff] }
 0x7c8   :  { %5269 = vmatpush1.bf16.msra.mxu1 %v6026_v13  ;;  %5293 = vmatpush3.bf16.msra.mxu0 %v6029_v48  ;;  %v405_v13 = vadd.f32 %v7118_v4, %v7108_v25  ;;  %v7119_v48 = vld [vmem:[#allocation36_spill] sm:$0xff] }
 0x7c9   :  { %v407_v38 = vadd.f32 %v7119_v48, %v7110_v31  ;;  %v7120_v31 = vld [vmem:[#allocation64_spill] sm:$0xff] }
 0x7cb   :  { %v5484_v60 = vpop.eup %5483 }
 0x7cc   :  { %v3111_v9 = vmul.f32 %v5484_v60, %v3110_v59 }
 0x7ce   :  { %v3113_v32 = vadd.f32 %v3112_v17, %v3111_v9 }
 0x7d0   :  { %v6871_v34 = vsel %vm1205_vm9, %v3113_v32, %v6777_v8  ;;  %v3116_v36 = vmul.f32 0.5, %v3113_v32  ;;  %v3458_v32 = vld [vmem:[#allocation13] sm:$0xff] }
 0x7d1   :  { %3360 = vmatmul.mubr.f32.vlgmr.msra.gmra.mrb[54].mxu1 %v6871_v34  ;;  %4372 = vmatmul.mubr.f32.vlgmr.msra.gmra.mrb[46].mxu0 %v6871_v34 }
 0x7d2   :  { %v3117_v54 = vsel %vm1205_vm9, %v3116_v36, 0.0 }
 0x7d3   :  { %v3118_v3 = vadd.f32 %v3117_v54, %v1209_v18 }
 0x7d5   :  { %3119 = vst [vmem:[#allocation13 + $0x8] sm:$0xff] %v3118_v3 }
 0x87e   :  { %v3190_v39 = vpop.f32.mrb[44].mxu0  ;;  %v3261_v51 = vpop.f32.mrb[52].mxu1 }
 0x87f   :  { %v3265_v5 = vadd.f32 %v3190_v39, %v405_v13  ;;  %v3192_v41 = vpop.f32.mrb[45].mxu0  ;;  %v4338_v8 = vpop.f32.mrb[53].mxu1  ;;  %v3279_v25 = vadd.f32 %v7112_v62, %v3261_v51 }
 0x880   :  { %v3272_v40 = vadd.f32 %v3192_v41, %v407_v38 }
 0x881   :  { %v3538_v26 = vmul.f32 -1.442695, %v3265_v5 }
 0x882   :  { %v3539_v29 = vmul.f32 -1.442695, %v3272_v40 }
 0x883   :  { %5485 = vpow2.f32 %v3538_v26 }
 0x884   :  { %5487 = vpow2.f32 %v3539_v29 }
 0x88d   :  { %v5486_v0 = vpop.eup %5485 }
 0x88e   :  { %v3269_v6 = vadd.f32 1.0, %v5486_v0  ;;  %v5488_v21 = vpop.eup %5487 }
 0x88f   :  { %v3276_v43 = vadd.f32 1.0, %v5488_v21 }
 0x890   :  { %5489 = vrcp.f32 %v3269_v6 }
 0x891   :  { %5491 = vrcp.f32 %v3276_v43 }
 0x89a   :  { %v5490_v55 = vpop.eup %5489 }
 0x89b   :  { %v3280_v56 = vmul.f32 %v5490_v55, %v3279_v25  ;;  %v5492_v7 = vpop.eup %5491 }
 0x89c   :  { %v3283_v24 = vsub.f32 1.0, %v5492_v7  ;;  %v3285_v49 = vmul.f32 %v5492_v7, %v6825_v22  ;;  %v7123_v22 = vld [vmem:[#allocation39_spill] sm:$0xff] }
 0x89d   :  { %v3281_v61 = vadd.f32 %v3280_v56, %v7120_v31 }
 0x89f   :  { %5493 = vtanh.f32 %v3281_v61 }
 0x8a4   :  { %v3361_v1 = vpop.f32.mrb[54].mxu1  ;;  %v3432_v2 = vpop.f32.mrb[46].mxu0 }
 0x8a5   :  { %v3436_v11 = vadd.f32 %v3361_v1, %v7121_v10  ;;  %v3363_v16 = vpop.f32.mrb[55].mxu1  ;;  %v4373_v19 = vpop.f32.mrb[47].mxu0  ;;  %v3450_v27 = vadd.f32 %v6650_v63, %v3432_v2 }
 0x8a6   :  { %v3443_v30 = vadd.f32 %v3363_v16, %v7122_v20 }
 0x8a7   :  { %v3540_v46 = vmul.f32 -1.442695, %v3436_v11 }
 0x8a8   :  { %v3541_v45 = vmul.f32 -1.442695, %v3443_v30 }
 0x8a9   :  { %v5494_v52 = vpop.eup %5493  ;;  %5495 = vpow2.f32 %v3540_v46 }
 0x8aa   :  { %v3284_v62 = vmul.f32 %v5494_v52, %v3283_v24  ;;  %5497 = vpow2.f32 %v3541_v45 }
 0x8ac   :  { %v3286_v58 = vadd.f32 %v3285_v49, %v3284_v62 }
 0x8ae   :  { %v3288_v33 = vmul.f32 0.5, %v3286_v58 }
 0x8b0   :  { %v3289_v47 = vsel %vm1030_vm3, %v3288_v33, 0.0 }
 0x8b1   :  { %v3290_v35 = vadd.f32 %v3289_v47, %v3287_v50 }
 0x8b3   :  { %v5496_v12 = vpop.eup %5495  ;;  %3291 = vst [vmem:[#allocation13 + $0x38] sm:$0xff] %v3290_v35 }
 0x8b4   :  { %v3440_v14 = vadd.f32 1.0, %v5496_v12  ;;  %v5498_v15 = vpop.eup %5497 }
 0x8b5   :  { %v3447_v23 = vadd.f32 1.0, %v5498_v15 }
 0x8b6   :  { %5499 = vrcp.f32 %v3440_v14 }
 0x8b7   :  { %5501 = vrcp.f32 %v3447_v23 }
 0x8c0   :  { %v5500_v28 = vpop.eup %5499 }
 0x8c1   :  { %v3451_v37 = vmul.f32 %v5500_v28, %v3450_v27  ;;  %v5502_v44 = vpop.eup %5501 }
 0x8c2   :  { %v3454_v57 = vsub.f32 1.0, %v5502_v44  ;;  %v3456_v9 = vmul.f32 %v5502_v44, %v6871_v34 }
 0x8c3   :  { %v3452_v42 = vadd.f32 %v3451_v37, %v7123_v22 }
 0x8c5   :  { %5503 = vtanh.f32 %v3452_v42 }
 0x8cf   :  { %v5504_v59 = vpop.eup %5503 }
 0x8d0   :  { %v3455_v60 = vmul.f32 %v5504_v59, %v3454_v57 }
 0x8d2   :  { %v3457_v17 = vadd.f32 %v3456_v9, %v3455_v60 }
 0x8d4   :  { %v3459_v18 = vmul.f32 0.5, %v3457_v17 }
 0x8d6   :  { %v3460_v63 = vsel %vm857_vm2, %v3459_v18, 0.0 }
 0x8d7   :  { %v3461_v36 = vadd.f32 %v3460_v63, %v3458_v32 }
 0x8d9   :  { %3462 = vst [vmem:[#allocation13] sm:$0xff] %v3461_v36 }
 0x8da   :  { %5629 = shalt.err (!%p5626_p2)
}
 0x8db   :  { %s5630_s17 = scalar_lea.hbm %s6914_s8, 1024 }
 0x8dc   :  { %p5631_p3 = scmp.ne.s32.totalorder %s6914_s8, %s5630_s17  ;;  %p5634_p4 = scmp.lt.u32.totalorder %s5630_s17, %s6914_s8 }
 0x8de   :  { %p5636_p5 = pnand %p5634_p4, %p5631_p3 }
 0x8e0   :  { %5639 = shalt.err (!%p5636_p5)
}
 0x8e1   :  { %3474 = dma.vmem_to_hbm [thread:$0]  %s3469_s12, 1024, %s6914_s8, [#allocation6], %s5649_s15, %s5649_s15, %s5650_s16  }
 0x8e2   :  { %5646 = dma.done.wait [#allocation6], 1024  }
 0x8e3   :  { %5647 = vsyncadd [#allocation6], 4294966272 }
 0x8e4   :  { %3478 = vsyncpa [#allocation5], 1 }
 0x8e5   :  { %3479 = vsyncpa [#allocation8], 1 }
 0x8e6   :  { %3480 = vsyncpa [#allocation11], 1 }
 0x8e7   :  { %3481 = vsyncpa [#allocation6], 1 }

</bundles_post_ra>
